<compile_context>
chip_gen: v7x
topology: tpu7x:2x2x1
jax: 0.10.0
libtpu: 0.0.40
codegen_flags: <defaults>
</compile_context>

<pallas_src>
import functools

import jax
import jax.numpy as jnp
from jax.experimental import pallas as pl
from jax.experimental.pallas import tpu as pltpu


def _mlp_kernel(x_ref, w1_ref, b1_ref, w2_ref, b2_ref, w3_ref, b3_ref,
                w4_ref, b4_ref, o_ref, *, slope):
    # x_ref: (TM, K0) f32; w{1,2,3}_ref: bf16 full weights; b*_ref: (1, N) f32
    # w4_ref: (1, 256) f32 (final layer as a lane reduction); o_ref: (TM, 1) f32
    x = x_ref[...].astype(jnp.bfloat16)

    # disc_block 1: Linear(in, 1024) + LeakyReLU(0.2)
    h = jnp.dot(x, w1_ref[...], preferred_element_type=jnp.float32) + b1_ref[...]
    h = jnp.maximum(h, slope * h).astype(jnp.bfloat16)

    # disc_block 2: Linear(1024, 512) + LeakyReLU(0.2)
    h = jnp.dot(h, w2_ref[...], preferred_element_type=jnp.float32) + b2_ref[...]
    h = jnp.maximum(h, slope * h).astype(jnp.bfloat16)

    # disc_block 3: Linear(512, 256) + LeakyReLU(0.2)
    h = jnp.dot(h, w3_ref[...], preferred_element_type=jnp.float32) + b3_ref[...]
    h = jnp.maximum(h, slope * h)            # keep f32 for the final reduction

    # final Linear(256, 1): elementwise multiply + lane reduction (VPU/XLU).
    out = jnp.sum(h * w4_ref[...], axis=-1, keepdims=True) + b4_ref[...]
    o_ref[...] = out.astype(o_ref.dtype)


# tm cap: 512 keeps per-step VMEM (double-buffered x block + ~3.8 MiB weight
# buffers + ~tm*6 KiB f32/bf16 temporaries) comfortably under v7x's 64 MiB,
# and is big enough that per-step overhead (~0.35 us) is negligible.
_TM_CAP = 512


def _pick_batch_tile(m):
    if m <= _TM_CAP:
        return m          # single full-batch tile (full-dim block is always legal)
    return _TM_CAP        # multiple of 8, so the padded last tile is legal too


def prepare_params(params):
    """One-time cast/reshape of parameters for the kernel (do NOT call per step)."""
    (w1, b1), (w2, b2), (w3, b3), (w4, b4) = params
    return (
        w1.astype(jnp.bfloat16), b1.reshape(1, -1).astype(jnp.float32),
        w2.astype(jnp.bfloat16), b2.reshape(1, -1).astype(jnp.float32),
        w3.astype(jnp.bfloat16), b3.reshape(1, -1).astype(jnp.float32),
        w4.reshape(1, -1).astype(jnp.float32), b4.reshape(1, 1).astype(jnp.float32),
    )


def linear_discriminator(x, prepared_params, *, slope=0.2):
    """Fused 4-layer MLP discriminator forward. x: (M, K) f32 -> (M, 1) f32."""
    w1b, b1r, w2b, b2r, w3b, b3r, w4t, b4r = prepared_params
    M, K = x.shape
    assert w1b.shape[0] == K

    tm = _pick_batch_tile(M)
    grid = (pl.cdiv(M, tm),)

    full = lambda i: (0, 0)      # weights/biases: same resident block every step
    kernel = functools.partial(_mlp_kernel, slope=slope)

    return pl.pallas_call(
        kernel,
        out_shape=jax.ShapeDtypeStruct((M, 1), x.dtype),
        grid=grid,
        in_specs=[
            pl.BlockSpec((tm, K), lambda i: (i, 0)),     # streamed batch tile
            pl.BlockSpec(w1b.shape, full),               # full weights resident in VMEM
            pl.BlockSpec(b1r.shape, full),
            pl.BlockSpec(w2b.shape, full),
            pl.BlockSpec(b2r.shape, full),
            pl.BlockSpec(w3b.shape, full),
            pl.BlockSpec(b3r.shape, full),
            pl.BlockSpec(w4t.shape, full),
            pl.BlockSpec(b4r.shape, full),
        ],
        out_specs=pl.BlockSpec((tm, 1), lambda i: (i, 0)),
        compiler_params=pltpu.CompilerParams(
            dimension_semantics=("parallel",),           # batch tiles shard across TCs (v7x)
            vmem_limit_bytes=48 * 1024 * 1024,           # safe on v7x's 64 MiB, roomy on v5e/v6e
        ),
    )(x, w1b, b1r, w2b, b2r, w3b, b3r, w4t, b4r)


def init_params(key, input_dimensions):
    """Deterministic parameter init matching the module's layer shapes (f32 master copy)."""
    sizes = [(input_dimensions, 1024), (1024, 512), (512, 256), (256, 1)]
    params = []
    for (fan_in, fan_out) in sizes:
        key, kw, kb = jax.random.split(key, 3)
        bound = 1.0 / jnp.sqrt(fan_in)  # PyTorch nn.Linear default uniform bound
        w = jax.random.uniform(kw, (fan_in, fan_out), jnp.float32, -bound, bound)
        b = jax.random.uniform(kb, (fan_out,), jnp.float32, -bound, bound)
        params.append((w, b))
    return params


def _ref_bf16(x, params, slope=0.2):
    """Pure-JAX reference with the SAME bf16-operand / f32-accumulate math."""
    h = x
    for (w, b) in params[:3]:
        h = jnp.dot(h.astype(jnp.bfloat16), w.astype(jnp.bfloat16),
                    preferred_element_type=jnp.float32) + b
        h = jnp.where(h >= 0, h, slope * h)
    w4, b4 = params[3]
    return jnp.sum(h * w4.reshape(1, -1), axis=-1, keepdims=True) + b4


def _ref_f32(x, params, slope=0.2):
    """Full-f32 module semantics."""
    r = x
    for i, (w, b) in enumerate(params):
        r = r @ w + b
        if i < len(params) - 1:
            r = jnp.where(r >= 0, r, slope * r)
    return r


if __name__ == "__main__":
    key = jax.random.PRNGKey(0)
    key, kx, kx2 = jax.random.split(key, 3)

    input_dimensions = 256
    batch = 256                      # -> tm=256, grid=(1,): no needless split on single-TC chips
    x = jax.random.normal(kx, (batch, input_dimensions), jnp.float32)

    params = init_params(key, input_dimensions)
    prepared = jax.tree_util.tree_map(jax.block_until_ready, prepare_params(params))

    out = linear_discriminator(x, prepared)
    out = jax.block_until_ready(out)
    assert out.shape == (batch, 1)
    assert jnp.allclose(out, _ref_bf16(x, params), atol=1e-2, rtol=1e-2)
    assert jnp.allclose(out, _ref_f32(x, params), atol=5e-2, rtol=5e-2)

    # Ragged-batch check: M=600 -> tm=512, grid=(2,), padded last tile; padded
    # rows are computed on garbage and discarded (no cross-row reductions).
    batch2 = 600
    x2 = jax.random.normal(kx2, (batch2, input_dimensions), jnp.float32)
    out2 = jax.block_until_ready(linear_discriminator(x2, prepared))
    assert out2.shape == (batch2, 1)
    assert jnp.allclose(out2, _ref_bf16(x2, params), atol=1e-2, rtol=1e-2)

    print("KERNEL_OK")
</pallas_src>

<mosaic_0001>
module attributes {stable_mosaic.version = 11 : i64} {
  func.func @_mlp_kernel(%arg0: i32, %arg1: memref<256x256xf32, #tpu.memory_space<vmem>>, %arg2: memref<256x1024xbf16, #tpu.memory_space<vmem>>, %arg3: memref<1x1024xf32, #tpu.memory_space<vmem>>, %arg4: memref<1024x512xbf16, #tpu.memory_space<vmem>>, %arg5: memref<1x512xf32, #tpu.memory_space<vmem>>, %arg6: memref<512x256xbf16, #tpu.memory_space<vmem>>, %arg7: memref<1x256xf32, #tpu.memory_space<vmem>>, %arg8: memref<1x256xf32, #tpu.memory_space<vmem>>, %arg9: memref<1x1xf32, #tpu.memory_space<vmem>>, %arg10: memref<256x1xf32, #tpu.memory_space<vmem>>) attributes {dimension_semantics = [#tpu.dimension_semantics<parallel>], iteration_bounds = array<i64: 1>, scalar_prefetch = 0 : i64, scratch_operands = 0 : i64, tpu.core_type = #tpu.core_type<tc>, window_params = [{transform_indices = @transform_0, window_bounds = array<i64: 256, 256>}, {pipeline_mode = #tpu.pipeline_mode<synchronous>, transform_indices = @transform_1, window_bounds = array<i64: 256, 1024>}, {pipeline_mode = #tpu.pipeline_mode<synchronous>, transform_indices = @transform_2, window_bounds = array<i64: 1, 1024>}, {pipeline_mode = #tpu.pipeline_mode<synchronous>, transform_indices = @transform_3, window_bounds = array<i64: 1024, 512>}, {pipeline_mode = #tpu.pipeline_mode<synchronous>, transform_indices = @transform_4, window_bounds = array<i64: 1, 512>}, {pipeline_mode = #tpu.pipeline_mode<synchronous>, transform_indices = @transform_5, window_bounds = array<i64: 512, 256>}, {pipeline_mode = #tpu.pipeline_mode<synchronous>, transform_indices = @transform_6, window_bounds = array<i64: 1, 256>}, {pipeline_mode = #tpu.pipeline_mode<synchronous>, transform_indices = @transform_7, window_bounds = array<i64: 1, 256>}, {pipeline_mode = #tpu.pipeline_mode<synchronous>, transform_indices = @transform_8, window_bounds = array<i64: 1, 1>}, {transform_indices = @transform_9, window_bounds = array<i64: 256, 1>}]} {
    %c0 = arith.constant 0 : index
    %c0_0 = arith.constant 0 : index
    %0 = vector.load %arg1[%c0, %c0_0] : memref<256x256xf32, #tpu.memory_space<vmem>>, vector<256x256xf32>
    %1 = arith.truncf %0 : vector<256x256xf32> to vector<256x256xbf16>
    %c0_1 = arith.constant 0 : index
    %c0_2 = arith.constant 0 : index
    %2 = vector.load %arg2[%c0_1, %c0_2] : memref<256x1024xbf16, #tpu.memory_space<vmem>>, vector<256x1024xbf16>
    %cst = arith.constant dense<0.000000e+00> : vector<256x1024xf32>
    %3 = tpu.matmul %1, %2, %cst {dimension_numbers = #tpu.dot_dimension_numbers<[1], [0], [0], [1], [0, 0, 1, 1], [], []>} : vector<256x256xbf16>, vector<256x1024xbf16>, vector<256x1024xf32> -> vector<256x1024xf32>
    %c0_3 = arith.constant 0 : index
    %c0_4 = arith.constant 0 : index
    %4 = vector.load %arg3[%c0_3, %c0_4] : memref<1x1024xf32, #tpu.memory_space<vmem>>, vector<1x1024xf32>
    %5 = vector.broadcast %4 : vector<1x1024xf32> to vector<256x1024xf32>
    %6 = arith.addf %3, %5 : vector<256x1024xf32>
    %cst_5 = arith.constant 2.000000e-01 : f32
    %7 = vector.broadcast %cst_5 : f32 to vector<256x1024xf32>
    %8 = arith.mulf %7, %6 : vector<256x1024xf32>
    %9 = arith.maximumf %6, %8 : vector<256x1024xf32>
    %10 = arith.truncf %9 : vector<256x1024xf32> to vector<256x1024xbf16>
    %c0_6 = arith.constant 0 : index
    %c0_7 = arith.constant 0 : index
    %11 = vector.load %arg4[%c0_6, %c0_7] : memref<1024x512xbf16, #tpu.memory_space<vmem>>, vector<1024x512xbf16>
    %cst_8 = arith.constant dense<0.000000e+00> : vector<256x512xf32>
    %12 = tpu.matmul %10, %11, %cst_8 {dimension_numbers = #tpu.dot_dimension_numbers<[1], [0], [0], [1], [0, 0, 1, 1], [], []>} : vector<256x1024xbf16>, vector<1024x512xbf16>, vector<256x512xf32> -> vector<256x512xf32>
    %c0_9 = arith.constant 0 : index
    %c0_10 = arith.constant 0 : index
    %13 = vector.load %arg5[%c0_9, %c0_10] : memref<1x512xf32, #tpu.memory_space<vmem>>, vector<1x512xf32>
    %14 = vector.broadcast %13 : vector<1x512xf32> to vector<256x512xf32>
    %15 = arith.addf %12, %14 : vector<256x512xf32>
    %cst_11 = arith.constant 2.000000e-01 : f32
    %16 = vector.broadcast %cst_11 : f32 to vector<256x512xf32>
    %17 = arith.mulf %16, %15 : vector<256x512xf32>
    %18 = arith.maximumf %15, %17 : vector<256x512xf32>
    %19 = arith.truncf %18 : vector<256x512xf32> to vector<256x512xbf16>
    %c0_12 = arith.constant 0 : index
    %c0_13 = arith.constant 0 : index
    %20 = vector.load %arg6[%c0_12, %c0_13] : memref<512x256xbf16, #tpu.memory_space<vmem>>, vector<512x256xbf16>
    %cst_14 = arith.constant dense<0.000000e+00> : vector<256x256xf32>
    %21 = tpu.matmul %19, %20, %cst_14 {dimension_numbers = #tpu.dot_dimension_numbers<[1], [0], [0], [1], [0, 0, 1, 1], [], []>} : vector<256x512xbf16>, vector<512x256xbf16>, vector<256x256xf32> -> vector<256x256xf32>
    %c0_15 = arith.constant 0 : index
    %c0_16 = arith.constant 0 : index
    %22 = vector.load %arg7[%c0_15, %c0_16] : memref<1x256xf32, #tpu.memory_space<vmem>>, vector<1x256xf32>
    %23 = vector.broadcast %22 : vector<1x256xf32> to vector<256x256xf32>
    %24 = arith.addf %21, %23 : vector<256x256xf32>
    %cst_17 = arith.constant 2.000000e-01 : f32
    %25 = vector.broadcast %cst_17 : f32 to vector<256x256xf32>
    %26 = arith.mulf %25, %24 : vector<256x256xf32>
    %27 = arith.maximumf %24, %26 : vector<256x256xf32>
    %c0_18 = arith.constant 0 : index
    %c0_19 = arith.constant 0 : index
    %28 = vector.load %arg8[%c0_18, %c0_19] : memref<1x256xf32, #tpu.memory_space<vmem>>, vector<1x256xf32>
    %29 = vector.broadcast %28 : vector<1x256xf32> to vector<256x256xf32>
    %30 = arith.mulf %27, %29 : vector<256x256xf32>
    %cst_20 = arith.constant dense<0.000000e+00> : vector<256xf32>
    %31 = vector.multi_reduction <add>, %30, %cst_20 [1] : vector<256x256xf32> to vector<256xf32>
    %32 = vector.shape_cast %31 : vector<256xf32> to vector<256x1xf32>
    %c0_21 = arith.constant 0 : index
    %c0_22 = arith.constant 0 : index
    %33 = vector.load %arg9[%c0_21, %c0_22] : memref<1x1xf32, #tpu.memory_space<vmem>>, vector<1x1xf32>
    %34 = vector.broadcast %33 : vector<1x1xf32> to vector<256x1xf32>
    %35 = arith.addf %32, %34 : vector<256x1xf32>
    %c0_23 = arith.constant 0 : index
    %c0_24 = arith.constant 0 : index
    %36 = vector.load %arg10[%c0_23, %c0_24] : memref<256x1xf32, #tpu.memory_space<vmem>>, vector<256x1xf32>
    tpu.vector_store %arg10[%c0_23, %c0_24], %35 {strides = array<i32>} : memref<256x1xf32, #tpu.memory_space<vmem>>, vector<256x1xf32>,
    return
  }
  func.func @transform_0(%arg0: i32) -> (i32, i32) {
    %c0_i32 = arith.constant 0 : i32
    %c0_i32_0 = arith.constant 0 : i32
    return %arg0, %c0_i32 : i32, i32
  }
  func.func @transform_1(%arg0: i32) -> (i32, i32) {
    %c0_i32 = arith.constant 0 : i32
    %c0_i32_0 = arith.constant 0 : i32
    %c0_i32_1 = arith.constant 0 : i32
    return %c0_i32, %c0_i32_0 : i32, i32
  }
  func.func @transform_2(%arg0: i32) -> (i32, i32) {
    %c0_i32 = arith.constant 0 : i32
    %c0_i32_0 = arith.constant 0 : i32
    %c0_i32_1 = arith.constant 0 : i32
    return %c0_i32, %c0_i32_0 : i32, i32
  }
  func.func @transform_3(%arg0: i32) -> (i32, i32) {
    %c0_i32 = arith.constant 0 : i32
    %c0_i32_0 = arith.constant 0 : i32
    %c0_i32_1 = arith.constant 0 : i32
    return %c0_i32, %c0_i32_0 : i32, i32
  }
  func.func @transform_4(%arg0: i32) -> (i32, i32) {
    %c0_i32 = arith.constant 0 : i32
    %c0_i32_0 = arith.constant 0 : i32
    %c0_i32_1 = arith.constant 0 : i32
    return %c0_i32, %c0_i32_0 : i32, i32
  }
  func.func @transform_5(%arg0: i32) -> (i32, i32) {
    %c0_i32 = arith.constant 0 : i32
    %c0_i32_0 = arith.constant 0 : i32
    %c0_i32_1 = arith.constant 0 : i32
    return %c0_i32, %c0_i32_0 : i32, i32
  }
  func.func @transform_6(%arg0: i32) -> (i32, i32) {
    %c0_i32 = arith.constant 0 : i32
    %c0_i32_0 = arith.constant 0 : i32
    %c0_i32_1 = arith.constant 0 : i32
    return %c0_i32, %c0_i32_0 : i32, i32
  }
  func.func @transform_7(%arg0: i32) -> (i32, i32) {
    %c0_i32 = arith.constant 0 : i32
    %c0_i32_0 = arith.constant 0 : i32
    %c0_i32_1 = arith.constant 0 : i32
    return %c0_i32, %c0_i32_0 : i32, i32
  }
  func.func @transform_8(%arg0: i32) -> (i32, i32) {
    %c0_i32 = arith.constant 0 : i32
    %c0_i32_0 = arith.constant 0 : i32
    %c0_i32_1 = arith.constant 0 : i32
    return %c0_i32, %c0_i32_0 : i32, i32
  }
  func.func @transform_9(%arg0: i32) -> (i32, i32) {
    %c0_i32 = arith.constant 0 : i32
    %c0_i32_0 = arith.constant 0 : i32
    return %arg0, %c0_i32 : i32, i32
  }
}

</mosaic_0001>

<bundles_post_ra>
// kernel: tpu_custom_call.1
= control target key start
LH: loop header
LB: loop body
LE: loop exit
PB: predicated region body
PF: predicated region fallthrough
CT: control target
= control target key end

     0   :  { %s10272_s0 = inlined_call_operand.hbm [shape: f32[256,256], index: 0, kind: input, shape index: {}]   ;;  %s10273_s1 = inlined_call_operand.hbm [shape: bf16[256,1024], index: 1, kind: input, shape index: {}]   ;;  %s10274_s2 = inlined_call_operand.vmem [shape: f32[1,1024], index: 2, kind: input, shape index: {}]   ;;  %s10275_s3 = inlined_call_operand.hbm [shape: bf16[1024,512], index: 3, kind: input, shape index: {}]   ;;  %s10276_s4 = inlined_call_operand.vmem [shape: f32[1,512], index: 4, kind: input, shape index: {}]   ;;  %s10277_s5 = inlined_call_operand.hbm [shape: bf16[512,256], index: 5, kind: input, shape index: {}]   ;;  %s10278_s6 = inlined_call_operand.vmem [shape: f32[1,256], index: 6, kind: input, shape index: {}]   ;;  %s10279_s7 = inlined_call_operand.vmem [shape: f32[1,256], index: 7, kind: input, shape index: {}]   ;;  %s10280_s8 = inlined_call_operand.<no memory space> [shape: f32[1,1], index: 8, kind: input, shape index: {}]   ;;  %s10281_s9 = inlined_call_operand.vmem [shape: f32[256,1], index: 9, kind: output, shape index: {}]  }
   0x1   :  { %v14_v0 = vstv %s10280_s8 }
   0x2   :  { %15 = vst [vmem:[#allocation2] sm:$0x1] %v14_v0 }
   0x3   :  { %16 = vsyncpa [#allocation4], 0 }
   0x4   :  { %17 = vsyncpa [#allocation6], 0 }
   0x5   :  { %18 = vsyncpa [#allocation9], 0  ;;  %s8665_s11 = smov [#allocation5]   ;;  %s8571_s15 = scalar_lea.hbm %s10273_s1, 16384 }
   0x6   :  { %s36_s12 = sshll.u32 %s8665_s11, 4  ;;  %p8572_p0 = scmp.ne.s32.totalorder %s10273_s1, %s8571_s15  ;;  %s37_s12 = int_to_ptr.vmem [resolvable:$true] %s36_s12 }
   0x7   :  { %p8575_p1 = scmp.lt.u32.totalorder %s8571_s15, %s10273_s1 }
   0x9   :  { %p8577_p2 = pnand %p8575_p1, %p8572_p0 }
   0xb   :  { %8580 = shalt.err (!%p8577_p2)
}
   0xc   :  { %s8581_s8 = scalar_lea.vmem %s37_s12, 16384  ;;  %p8586_p4 = scmp.lt.s32.totalorder %s37_s12, %s37_s12 }
   0xd   :  { %p8582_p3 = scmp.ne.s32.totalorder %s37_s12, %s8581_s8  ;;  %p8587_p5 = scmp.lt.s32.totalorder %s8581_s8, %s8581_s8 }
   0xf   :  { %p8588_p6 = por %p8587_p5, %p8586_p4 }
  0x11   :  { %p8589_p7 = pnand %p8588_p6, %p8582_p3 }
  0x13   :  { %8592 = shalt.err (!%p8589_p7)
}
  0x14   :  { %s8666_s20 = smov 512   ;;  %s8667_s21 = smov 32  }
  0x15   :  { %42 = dma.hbm_to_vmem [thread:$0]  %s10273_s1, 16384, %s37_s12, [#allocation6], %s8666_s20, %s8666_s20, %s8667_s21  }
  0x16   :  { %s8668_s24 = smov [#allocation3]   ;;  %s8593_s28 = scalar_lea.hbm %s10272_s0, 8192 }
  0x17   :  { %s24_s25 = sshll.u32 %s8668_s24, 4  ;;  %p8594_p8 = scmp.ne.s32.totalorder %s10272_s0, %s8593_s28  ;;  %s25_s25 = int_to_ptr.vmem [resolvable:$true] %s24_s25 }
  0x18   :  { %p8597_p9 = scmp.lt.u32.totalorder %s8593_s28, %s10272_s0 }
  0x1a   :  { %p8599_p10 = pnand %p8597_p9, %p8594_p8 }
  0x1c   :  { %8602 = shalt.err (!%p8599_p10)
}
  0x1d   :  { %s8603_s13 = scalar_lea.vmem %s25_s25, 8192  ;;  %p8608_p12 = scmp.lt.s32.totalorder %s25_s25, %s25_s25 }
  0x1e   :  { %p8604_p11 = scmp.ne.s32.totalorder %s25_s25, %s8603_s13  ;;  %p8609_p13 = scmp.lt.s32.totalorder %s8603_s13, %s8603_s13 }
  0x20   :  { %p8610_p0 = por %p8609_p13, %p8608_p12 }
  0x22   :  { %p8611_p1 = pnand %p8610_p0, %p8604_p11 }
  0x24   :  { %8614 = shalt.err (!%p8611_p1)
}
  0x25   :  { %s8669_s1 = smov 256   ;;  %s8670_s12 = smov 16  }
  0x26   :  { %30 = dma.hbm_to_vmem [thread:$0]  %s10272_s0, 8192, %s25_s25, [#allocation4], %s8669_s1, %s8669_s1, %s8670_s12  }
  0x27   :  { %s8671_s16 = smov [#allocation7]   ;;  %s8672_s18 = smov [#allocation8]  }
  0x28   :  { %s50_s17 = sshll.u32 %s8671_s16, 4  ;;  %s64_s19 = sshll.u32 %s8672_s18, 4  ;;  %s51_s17 = int_to_ptr.vmem [resolvable:$true] %s50_s17  ;;  %s8752_s19 = int_to_ptr.vmem [resolvable:$true] %s64_s19 }
  0x29   :  { %s8615_s21 = scalar_lea.hbm %s10275_s3, 32768 }
  0x2a   :  { %p8616_p2 = scmp.ne.s32.totalorder %s10275_s3, %s8615_s21  ;;  %p8619_p3 = scmp.lt.u32.totalorder %s8615_s21, %s10275_s3 }
  0x2c   :  { %p8621_p4 = pnand %p8619_p3, %p8616_p2 }
  0x2e   :  { %8624 = shalt.err (!%p8621_p4)
}
  0x2f   :  { %s8625_s0 = scalar_lea.vmem %s51_s17, 32768  ;;  %p8630_p6 = scmp.lt.s32.totalorder %s51_s17, %s51_s17 }
  0x30   :  { %p8626_p5 = scmp.ne.s32.totalorder %s51_s17, %s8625_s0  ;;  %p8631_p7 = scmp.lt.s32.totalorder %s8625_s0, %s8625_s0 }
  0x32   :  { %p8632_p8 = por %p8631_p7, %p8630_p6 }
  0x34   :  { %p8633_p9 = pnand %p8632_p8, %p8626_p5 }
  0x36   :  { %8636 = shalt.err (!%p8633_p9)
}
  0x37   :  { %56 = dma.hbm_to_vmem [thread:$0]  %s10275_s3, 32768, %s51_s17, [#allocation6], %s8669_s1, %s8669_s1, %s8670_s12  }
  0x38   :  { %s8637_s30 = scalar_lea.hbm %s10277_s5, 8192 }
  0x39   :  { %p8638_p10 = scmp.ne.s32.totalorder %s10277_s5, %s8637_s30  ;;  %p8641_p11 = scmp.lt.u32.totalorder %s8637_s30, %s10277_s5 }
  0x3b   :  { %p8643_p12 = pnand %p8641_p11, %p8638_p10 }
  0x3d   :  { %8646 = shalt.err (!%p8643_p12)
}
  0x3e   :  { %s8647_s15 = scalar_lea.vmem %s8752_s19, 8192  ;;  %p8652_p0 = scmp.lt.s32.totalorder %s8752_s19, %s8752_s19 }
  0x3f   :  { %p8648_p13 = scmp.ne.s32.totalorder %s8752_s19, %s8647_s15  ;;  %p8653_p1 = scmp.lt.s32.totalorder %s8647_s15, %s8647_s15 }
  0x41   :  { %p8654_p2 = por %p8653_p1, %p8652_p0 }
  0x43   :  { %p8655_p3 = pnand %p8654_p2, %p8648_p13 }
  0x45   :  { %8658 = shalt.err (!%p8655_p3)
}
  0x46   :  { %s8673_s3 = smov 128   ;;  %s8674_s1 = smov 8  }
  0x47   :  { %70 = dma.hbm_to_vmem [thread:$0]  %s10277_s5, 8192, %s8752_s19, [#allocation9], %s8673_s3, %s8673_s3, %s8674_s1  }
  0x48   :  { %8659 = dma.done.wait [#allocation4], 8192  }
  0x49   :  { %8660 = vsyncadd [#allocation4], 4294959104 }
  0x4a   :  { %8661 = dma.done.wait [#allocation6], 49152  }
  0x4b   :  { %8662 = vsyncadd [#allocation6], 4294918144 }
  0x4c   :  { %8663 = dma.done.wait [#allocation9], 8192  }
  0x4d   :  { %8664 = vsyncadd [#allocation9], 4294959104  ;;  %v185_v1 = vld [vmem:[#allocation5] sm:$0xff]  ;;  %v90_v18 = vld [vmem:[#allocation3 + $0x8] sm:$0xff]  ;;  %vm6950_vm0 = vcmask 7168  }
  0x4e   :  { %v189_v2 = vld [vmem:[#allocation5 + $0x20] sm:$0xff]  ;;  %v92_v19 = vld [vmem:[#allocation3 + $0x18] sm:$0xff]  ;;  %v187_v30 = vld [vmem:[#allocation5 + $0x10] sm:$0xff] }
  0x4f   :  { %v193_v3 = vld [vmem:[#allocation5 + $0x40] sm:$0xff]  ;;  %v6991_v4 = vcombine.high %v185_v1, %v189_v2  ;;  %v6990_v5 = vcombine.low %v185_v1, %v189_v2  ;;  %v8783_v21 = vpack.c.bf16 %v92_v19, %v90_v18  ;;  %v191_v32 = vld [vmem:[#allocation5 + $0x30] sm:$0xff] }
  0x50   :  { %v197_v6 = vld [vmem:[#allocation5 + $0x60] sm:$0xff]  ;;  %v195_v33 = vld [vmem:[#allocation5 + $0x50] sm:$0xff]  ;;  %v6995_v37 = vcombine.high %v187_v30, %v191_v32  ;;  %v6994_v38 = vcombine.low %v187_v30, %v191_v32 }
  0x51   :  { %v6999_v7 = vcombine.high %v193_v3, %v197_v6  ;;  %v201_v8 = vld [vmem:[#allocation5 + $0x80] sm:$0xff]  ;;  %995 = vmatprep.subr.bf16.mxu1 %v6991_v4  ;;  %v6998_v10 = vcombine.low %v193_v3, %v197_v6  ;;  %1027 = vmatprep.mubr.bf16.mxu1 %v8783_v21  ;;  %v199_v34 = vld [vmem:[#allocation5 + $0x70] sm:$0xff] }
  0x52   :  { %v205_v9 = vld [vmem:[#allocation5 + $0xa0] sm:$0xff]  ;;  %996 = vmatpush1.bf16.msra.mxu1 %v6990_v5  ;;  %1413 = vmatprep.mubr.bf16.mxu0 %v8783_v21  ;;  %v7003_v39 = vcombine.high %v195_v33, %v199_v34  ;;  %v203_v41 = vld [vmem:[#allocation5 + $0x90] sm:$0xff]  ;;  %v7002_v44 = vcombine.low %v195_v33, %v199_v34 }
  0x53   :  { %997 = vmatprep.subr.bf16.mxu1 %v6999_v7  ;;  %v7007_v11 = vcombine.high %v201_v8, %v205_v9  ;;  %v209_v12 = vld [vmem:[#allocation5 + $0xc0] sm:$0xff]  ;;  %v7006_v14 = vcombine.low %v201_v8, %v205_v9  ;;  %1381 = vmatprep.subr.bf16.mxu0 %v6995_v37  ;;  %v207_v42 = vld [vmem:[#allocation5 + $0xb0] sm:$0xff] }
  0x54   :  { %v213_v13 = vld [vmem:[#allocation5 + $0xe0] sm:$0xff]  ;;  %1382 = vmatpush1.bf16.msra.mxu0 %v6994_v38  ;;  %v7011_v47 = vcombine.high %v203_v41, %v207_v42  ;;  %v211_v48 = vld [vmem:[#allocation5 + $0xd0] sm:$0xff]  ;;  %v7010_v52 = vcombine.low %v203_v41, %v207_v42 }
  0x55   :  { %v7015_v15 = vcombine.high %v209_v12, %v213_v13  ;;  %v217_v16 = vld [vmem:[#allocation5 + $0x100] sm:$0xff]  ;;  %v7014_v20 = vcombine.low %v209_v12, %v213_v13  ;;  %1383 = vmatprep.subr.bf16.mxu0 %v7003_v39  ;;  %v215_v49 = vld [vmem:[#allocation5 + $0xf0] sm:$0xff] }
  0x56   :  { %998 = vmatpush1.bf16.msra.mxu1 %v6998_v10  ;;  %v221_v17 = vld [vmem:[#allocation5 + $0x120] sm:$0xff]  ;;  %v7019_v55 = vcombine.high %v211_v48, %v215_v49  ;;  %v219_v56 = vld [vmem:[#allocation5 + $0x110] sm:$0xff]  ;;  %v7018_v60 = vcombine.low %v211_v48, %v215_v49 }
  0x57   :  { %999 = vmatprep.subr.bf16.mxu1 %v7007_v11  ;;  %v7023_v22 = vcombine.high %v217_v16, %v221_v17  ;;  %v225_v23 = vld [vmem:[#allocation5 + $0x140] sm:$0xff]  ;;  %v7022_v25 = vcombine.low %v217_v16, %v221_v17  ;;  %v223_v57 = vld [vmem:[#allocation5 + $0x130] sm:$0xff] }
  0x58   :  { %v229_v24 = vld [vmem:[#allocation5 + $0x160] sm:$0xff]  ;;  %1384 = vmatpush1.bf16.msra.mxu0 %v7002_v44  ;;  %v7027_v63 = vcombine.high %v219_v56, %v223_v57  ;;  %v227_v0 = vld [vmem:[#allocation5 + $0x150] sm:$0xff]  ;;  %v7026_v4 = vcombine.low %v219_v56, %v223_v57  ;;  %v186_v44 = vld [vmem:[#allocation5 + $0x8] sm:$0xff] }
  0x59   :  { %v7031_v26 = vcombine.high %v225_v23, %v229_v24  ;;  %v233_v27 = vld [vmem:[#allocation5 + $0x180] sm:$0xff]  ;;  %v7030_v29 = vcombine.low %v225_v23, %v229_v24  ;;  %1385 = vmatprep.subr.bf16.mxu0 %v7011_v47  ;;  %v231_v1 = vld [vmem:[#allocation5 + $0x170] sm:$0xff]  ;;  %v194_v56 = vld [vmem:[#allocation5 + $0x48] sm:$0xff] }
  0x5a   :  { %1000 = vmatpush1.bf16.msra.mxu1 %v7006_v14  ;;  %v237_v28 = vld [vmem:[#allocation5 + $0x1a0] sm:$0xff]  ;;  %v7035_v7 = vcombine.high %v227_v0, %v231_v1  ;;  %v235_v8 = vld [vmem:[#allocation5 + $0x190] sm:$0xff]  ;;  %v7034_v12 = vcombine.low %v227_v0, %v231_v1  ;;  %v198_v57 = vld [vmem:[#allocation5 + $0x68] sm:$0xff] }
  0x5b   :  { %1001 = vmatprep.subr.bf16.mxu1 %v7015_v15  ;;  %v7039_v31 = vcombine.high %v233_v27, %v237_v28  ;;  %v241_v35 = vld [vmem:[#allocation5 + $0x1c0] sm:$0xff]  ;;  %v7038_v40 = vcombine.low %v233_v27, %v237_v28  ;;  %v239_v9 = vld [vmem:[#allocation5 + $0x1b0] sm:$0xff] }
  0x5c   :  { %v245_v36 = vld [vmem:[#allocation5 + $0x1e0] sm:$0xff]  ;;  %1386 = vmatpush1.bf16.msra.mxu0 %v7010_v52  ;;  %v7043_v15 = vcombine.high %v235_v8, %v239_v9  ;;  %v243_v16 = vld [vmem:[#allocation5 + $0x1d0] sm:$0xff]  ;;  %v96_v52 = vld [vmem:[#allocation3 + $0x38] sm:$0xff] }
  0x5d   :  { %v7047_v43 = vcombine.high %v241_v35, %v245_v36  ;;  %v249_v45 = vld [vmem:[#allocation5 + $0x200] sm:$0xff]  ;;  %v7046_v50 = vcombine.low %v241_v35, %v245_v36  ;;  %1387 = vmatprep.subr.bf16.mxu0 %v7019_v55  ;;  %v247_v17 = vld [vmem:[#allocation5 + $0x1f0] sm:$0xff] }
  0x5e   :  { %1002 = vmatpush1.bf16.msra.mxu1 %v7014_v20  ;;  %v253_v46 = vld [vmem:[#allocation5 + $0x220] sm:$0xff]  ;;  %v7042_v20 = vcombine.low %v235_v8, %v239_v9  ;;  %v7051_v24 = vcombine.high %v243_v16, %v247_v17  ;;  %v259_v33 = vld [vmem:[#allocation5 + $0x250] sm:$0xff] }
  0x5f   :  { %1003 = vmatprep.subr.bf16.mxu1 %v7023_v22  ;;  %v7055_v51 = vcombine.high %v249_v45, %v253_v46  ;;  %v257_v53 = vld [vmem:[#allocation5 + $0x240] sm:$0xff]  ;;  %v7054_v58 = vcombine.low %v249_v45, %v253_v46  ;;  %v263_v34 = vld [vmem:[#allocation5 + $0x270] sm:$0xff]  ;;  %v190_v45 = vld [vmem:[#allocation5 + $0x28] sm:$0xff] }
  0x60   :  { %v261_v54 = vld [vmem:[#allocation5 + $0x260] sm:$0xff]  ;;  %1388 = vmatpush1.bf16.msra.mxu0 %v7018_v60  ;;  %v271_v41 = vld [vmem:[#allocation5 + $0x2b0] sm:$0xff]  ;;  %v7067_v42 = vcombine.high %v259_v33, %v263_v34  ;;  %v7066_v47 = vcombine.low %v259_v33, %v263_v34  ;;  %v6992_v0 = vcombine.low %v186_v44, %v190_v45 }
  0x61   :  { %v7063_v59 = vcombine.high %v257_v53, %v261_v54  ;;  %v265_v61 = vld [vmem:[#allocation5 + $0x280] sm:$0xff]  ;;  %v7062_v2 = vcombine.low %v257_v53, %v261_v54  ;;  %1389 = vmatprep.subr.bf16.mxu0 %v7027_v63  ;;  %v91_v49 = vld [vmem:[#allocation3 + $0x10] sm:$0xff] }
  0x62   :  { %1004 = vmatpush1.bf16.msra.mxu1 %v7022_v25  ;;  %v269_v62 = vld [vmem:[#allocation5 + $0x2a0] sm:$0xff]  ;;  %v251_v25 = vld [vmem:[#allocation5 + $0x210] sm:$0xff] }
  0x63   :  { %1005 = vmatprep.subr.bf16.mxu1 %v7031_v26  ;;  %v7071_v3 = vcombine.high %v265_v61, %v269_v62  ;;  %v273_v5 = vld [vmem:[#allocation5 + $0x2c0] sm:$0xff]  ;;  %v7070_v10 = vcombine.low %v265_v61, %v269_v62  ;;  %v255_v26 = vld [vmem:[#allocation5 + $0x230] sm:$0xff] }
  0x64   :  { %v277_v6 = vld [vmem:[#allocation5 + $0x2e0] sm:$0xff]  ;;  %1390 = vmatpush1.bf16.msra.mxu0 %v7026_v4  ;;  %v7059_v32 = vcombine.high %v251_v25, %v255_v26  ;;  %v7058_v39 = vcombine.low %v251_v25, %v255_v26  ;;  %v275_v53 = vld [vmem:[#allocation5 + $0x2d0] sm:$0xff]  ;;  %v7001_v4 = vcombine.high %v194_v56, %v198_v57 }
  0x65   :  { %v7079_v11 = vcombine.high %v273_v5, %v277_v6  ;;  %v281_v13 = vld [vmem:[#allocation5 + $0x300] sm:$0xff]  ;;  %1391 = vmatprep.subr.bf16.mxu0 %v7035_v7  ;;  %v7078_v18 = vcombine.low %v273_v5, %v277_v6  ;;  %v279_v54 = vld [vmem:[#allocation5 + $0x2f0] sm:$0xff] }
  0x66   :  { %1006 = vmatpush1.bf16.msra.mxu1 %v7030_v29  ;;  %v285_v14 = vld [vmem:[#allocation5 + $0x320] sm:$0xff]  ;;  %v7050_v29 = vcombine.low %v243_v16, %v247_v17  ;;  %v283_v60 = vld [vmem:[#allocation5 + $0x310] sm:$0xff]  ;;  %v7083_v62 = vcombine.high %v275_v53, %v279_v54  ;;  %v7082_v5 = vcombine.low %v275_v53, %v279_v54  ;;  %v210_v16 = vld [vmem:[#allocation5 + $0xc8] sm:$0xff] }
  0x67   :  { %1007 = vmatprep.subr.bf16.mxu1 %v7039_v31  ;;  %v7087_v19 = vcombine.high %v281_v13, %v285_v14  ;;  %v289_v22 = vld [vmem:[#allocation5 + $0x340] sm:$0xff]  ;;  %v7086_v27 = vcombine.low %v281_v13, %v285_v14  ;;  %v287_v61 = vld [vmem:[#allocation5 + $0x330] sm:$0xff]  ;;  %v8792_v13 = vld [vmem:[#allocation5 + $0x18] sm:$0xff] }
  0x68   :  { %1392 = vmatpush1.bf16.msra.mxu0 %v7034_v12  ;;  %v293_v23 = vld [vmem:[#allocation5 + $0x360] sm:$0xff]  ;;  %v291_v6 = vld [vmem:[#allocation5 + $0x350] sm:$0xff]  ;;  %v7091_v9 = vcombine.high %v283_v60, %v287_v61  ;;  %v8794_v14 = vld [vmem:[#allocation5 + $0x38] sm:$0xff] }
  0x69   :  { %1393 = vmatprep.subr.bf16.mxu0 %v7043_v15  ;;  %v7095_v28 = vcombine.high %v289_v22, %v293_v23  ;;  %v297_v30 = vld [vmem:[#allocation5 + $0x380] sm:$0xff]  ;;  %v7094_v35 = vcombine.low %v289_v22, %v293_v23  ;;  %v95_v8 = vld [vmem:[#allocation3 + $0x30] sm:$0xff]  ;;  %v7000_v15 = vcombine.low %v194_v56, %v198_v57  ;;  %v214_v17 = vld [vmem:[#allocation5 + $0xe8] sm:$0xff] }
  0x6a   :  { %1008 = vmatpush1.bf16.msra.mxu1 %v7038_v40  ;;  %v301_v31 = vld [vmem:[#allocation5 + $0x3a0] sm:$0xff]  ;;  %v267_v40 = vld [vmem:[#allocation5 + $0x290] sm:$0xff]  ;;  %v108_v56 = vld [vmem:[#allocation3 + $0x98] sm:$0xff] }
  0x6b   :  { %1009 = vmatprep.subr.bf16.mxu1 %v7047_v43  ;;  %v305_v36 = vld [vmem:[#allocation5 + $0x3c0] sm:$0xff]  ;;  %v7103_v38 = vcombine.high %v297_v30, %v301_v31  ;;  %v7102_v43 = vcombine.low %v297_v30, %v301_v31  ;;  %v295_v12 = vld [vmem:[#allocation5 + $0x370] sm:$0xff]  ;;  %v7017_v30 = vcombine.high %v210_v16, %v214_v17 }
  0x6c   :  { %1394 = vmatpush1.bf16.msra.mxu0 %v7042_v20  ;;  %v309_v37 = vld [vmem:[#allocation5 + $0x3e0] sm:$0xff]  ;;  %v7090_v20 = vcombine.low %v283_v60, %v287_v61  ;;  %v299_v22 = vld [vmem:[#allocation5 + $0x390] sm:$0xff]  ;;  %v7098_v31 = vcombine.low %v291_v6, %v295_v12 }
  0x6d   :  { %1395 = vmatprep.subr.bf16.mxu0 %v7051_v24  ;;  %v7111_v46 = vcombine.high %v305_v36, %v309_v37  ;;  %v89_v48 = vld [vmem:[#allocation3] sm:$0xff]  ;;  %v7110_v55 = vcombine.low %v305_v36, %v309_v37  ;;  %v303_v23 = vld [vmem:[#allocation5 + $0x3b0] sm:$0xff]  ;;  %v7099_v24 = vcombine.high %v291_v6, %v295_v12  ;;  %v104_v36 = vld [vmem:[#allocation3 + $0x78] sm:$0xff] }
  0x6e   :  { %1010 = vmatpush1.bf16.msra.mxu1 %v7046_v50  ;;  %v7075_v50 = vcombine.high %v267_v40, %v271_v41  ;;  %v8787_v63 = vpack.c.bf16 %v91_v49, %v89_v48  ;;  %v93_v7 = vld [vmem:[#allocation3 + $0x20] sm:$0xff]  ;;  %v99_v33 = vld [vmem:[#allocation3 + $0x50] sm:$0xff]  ;;  %v7107_v34 = vcombine.high %v299_v22, %v303_v23  ;;  %v234_v48 = vld [vmem:[#allocation5 + $0x188] sm:$0xff] }
  0x6f   :  { %1011 = vmatprep.subr.bf16.mxu1 %v7055_v51  ;;  %v94_v51 = vld [vmem:[#allocation3 + $0x28] sm:$0xff]  ;;  %v8799_v25 = vpack.c.bf16 %v95_v8, %v93_v7  ;;  %v307_v37 = vld [vmem:[#allocation5 + $0x3d0] sm:$0xff]  ;;  %v101_v53 = vld [vmem:[#allocation3 + $0x60] sm:$0xff] }
  0x70   :  { %1396 = vmatpush1.bf16.msra.mxu0 %v7050_v29  ;;  %v8789_v1 = vpack.c.bf16 %v96_v52, %v94_v51  ;;  %v222_v29 = vld [vmem:[#allocation5 + $0x128] sm:$0xff]  ;;  %v103_v54 = vld [vmem:[#allocation3 + $0x70] sm:$0xff]  ;;  %v105_v8 = vld [vmem:[#allocation3 + $0x80] sm:$0xff] }
  0x71   :  { %1397 = vmatprep.subr.bf16.mxu0 %v7059_v32  ;;  %v97_v32 = vld [vmem:[#allocation3 + $0x40] sm:$0xff]  ;;  %v238_v49 = vld [vmem:[#allocation5 + $0x1a8] sm:$0xff] }
  0x72   :  { %1012 = vmatpush1.bf16.msra.mxu1 %v7054_v58  ;;  %v6993_v58 = vcombine.high %v186_v44, %v190_v45  ;;  %v8805_v45 = vpack.c.bf16 %v99_v33, %v97_v32  ;;  %v8089_v60 = vld [vmem:[#allocation7] ss:$16 sps:$4 sm:$0xff]   ;;  %v7041_v61 = vcombine.high %v234_v48, %v238_v49  ;;  %v8097_v12 = vld [vmem:[#allocation7 + $0x44] ss:$16 sps:$4 sm:$0xff]  }
  0x73   :  { %1013 = vmatprep.subr.bf16.mxu1 %v7063_v59  ;;  %v7074_v59 = vcombine.low %v267_v40, %v271_v41  ;;  %v226_v40 = vld [vmem:[#allocation5 + $0x148] sm:$0xff]  ;;  %v8092_v6 = vld [vmem:[#allocation7 + $0x20] ss:$16 sps:$4 sm:$0xff]  }
  0x74   :  { %1398 = vmatpush1.bf16.msra.mxu0 %v7058_v39  ;;  %v7016_v39 = vcombine.low %v210_v16, %v214_v17  ;;  %v230_v41 = vld [vmem:[#allocation5 + $0x168] sm:$0xff]  ;;  %v109_v32 = vld [vmem:[#allocation3 + $0xa0] sm:$0xff]  ;;  %v111_v33 = vld [vmem:[#allocation3 + $0xb0] sm:$0xff] }
  0x75   :  { %1399 = vmatprep.subr.bf16.mxu0 %v7067_v42  ;;  %v7033_v51 = vcombine.high %v226_v40, %v230_v41  ;;  %v7032_v57 = vcombine.low %v226_v40, %v230_v41  ;;  %v258_v16 = vld [vmem:[#allocation5 + $0x248] sm:$0xff]  ;;  %v8103_v40 = vld [vmem:[#allocation7 + $0x84] ss:$16 sps:$4 sm:$0xff]  }
  0x76   :  { %1014 = vmatpush1.bf16.msra.mxu1 %v7062_v2  ;;  %v202_v2 = vld [vmem:[#allocation5 + $0x88] sm:$0xff] }
  0x77   :  { %1015 = vmatprep.subr.bf16.mxu1 %v7071_v3  ;;  %v206_v3 = vld [vmem:[#allocation5 + $0xa8] sm:$0xff] }
  0x78   :  { %1400 = vmatpush1.bf16.msra.mxu0 %v7066_v47  ;;  %v262_v17 = vld [vmem:[#allocation5 + $0x268] sm:$0xff] }
  0x79   :  { %1401 = vmatprep.subr.bf16.mxu0 %v7075_v50  ;;  %v8091_v50 = vld [vmem:[#allocation7 + $0x4] ss:$16 sps:$4 sm:$0xff]  }
  0x7a   :  { %1016 = vmatpush1.bf16.msra.mxu1 %v7070_v10  ;;  %v98_v10 = vld [vmem:[#allocation3 + $0x48] sm:$0xff] }
  0x7b   :  { %1017 = vmatprep.subr.bf16.mxu1 %v7079_v11  ;;  %v100_v11 = vld [vmem:[#allocation3 + $0x58] sm:$0xff] }
  0x7c   :  { %1402 = vmatpush1.bf16.msra.mxu0 %v7074_v59  ;;  %v8801_v26 = vpack.c.bf16 %v100_v11, %v98_v10  ;;  %v246_v59 = vld [vmem:[#allocation5 + $0x1e8] sm:$0xff]  ;;  %v112_v11 = vld [vmem:[#allocation3 + $0xb8] sm:$0xff] }
  0x7d   :  { %1403 = vmatprep.subr.bf16.mxu0 %v7083_v62  ;;  %v8094_v62 = vld [vmem:[#allocation7 + $0x24] ss:$16 sps:$4 sm:$0xff]   ;;  %v110_v10 = vld [vmem:[#allocation3 + $0xa8] sm:$0xff] }
  0x7e   :  { %1018 = vmatpush1.bf16.msra.mxu1 %v7078_v18  ;;  %v6996_v18 = vcombine.low %v8792_v13, %v8794_v14 }
  0x7f   :  { %1019 = vmatprep.subr.bf16.mxu1 %v7087_v19  ;;  %v7009_v19 = vcombine.high %v202_v2, %v206_v3 }
  0x80   :  { %1404 = vmatpush1.bf16.msra.mxu0 %v7082_v5  ;;  %v254_v5 = vld [vmem:[#allocation5 + $0x228] sm:$0xff] }
  0x81   :  { %1405 = vmatprep.subr.bf16.mxu0 %v7091_v9  ;;  %v107_v9 = vld [vmem:[#allocation3 + $0x90] sm:$0xff] }
  0x82   :  { %1020 = vmatpush1.bf16.msra.mxu1 %v7086_v27  ;;  %v7008_v27 = vcombine.low %v202_v2, %v206_v3  ;;  %v7040_v3 = vcombine.low %v234_v48, %v238_v49  ;;  %v286_v48 = vld [vmem:[#allocation5 + $0x328] sm:$0xff] }
  0x83   :  { %1021 = vmatprep.subr.bf16.mxu1 %v7095_v28  ;;  %v218_v28 = vld [vmem:[#allocation5 + $0x108] sm:$0xff] }
  0x84   :  { %1406 = vmatpush1.bf16.msra.mxu0 %v7090_v20  ;;  %v7025_v42 = vcombine.high %v218_v28, %v222_v29  ;;  %v7024_v47 = vcombine.low %v218_v28, %v222_v29  ;;  %v266_v28 = vld [vmem:[#allocation5 + $0x288] sm:$0xff] }
  0x85   :  { %1407 = vmatprep.subr.bf16.mxu0 %v7099_v24  ;;  %v8821_v24 = vpack.c.bf16 %v112_v11, %v110_v10  ;;  %v270_v29 = vld [vmem:[#allocation5 + $0x2a8] sm:$0xff]  ;;  %v8107_v10 = vld [vmem:[#allocation7 + $0xc0] ss:$16 sps:$4 sm:$0xff]  }
  0x86   :  { %1022 = vmatpush1.bf16.msra.mxu1 %v7094_v35  ;;  %v102_v35 = vld [vmem:[#allocation3 + $0x68] sm:$0xff]  ;;  %v7073_v41 = vcombine.high %v266_v28, %v270_v29 }
  0x87   :  { %1023 = vmatprep.subr.bf16.mxu1 %v7103_v38  ;;  %v311_v38 = vld [vmem:[#allocation5 + $0x3f0] sm:$0xff] }
  0x88   :  { %1408 = vmatpush1.bf16.msra.mxu0 %v7098_v31  ;;  %v7115_v44 = vcombine.high %v307_v37, %v311_v38  ;;  %v7114_v52 = vcombine.low %v307_v37, %v311_v38  ;;  %v7065_v31 = vcombine.high %v258_v16, %v262_v17  ;;  %v274_v37 = vld [vmem:[#allocation5 + $0x2c8] sm:$0xff] }
  0x89   :  { %1409 = vmatprep.subr.bf16.mxu0 %v7107_v34  ;;  %v114_v34 = vld [vmem:[#allocation3 + $0xc8] sm:$0xff] }
  0x8a   :  { %1024 = vmatpush1.bf16.msra.mxu1 %v7102_v43  ;;  %v7106_v43 = vcombine.low %v299_v22, %v303_v23  ;;  %v8100_v22 = vld [vmem:[#allocation7 + $0x64] ss:$16 sps:$4 sm:$0xff]   ;;  %v8819_v23 = vpack.c.bf16 %v107_v9, %v105_v8  ;;  %v278_v38 = vld [vmem:[#allocation5 + $0x2e8] sm:$0xff]  ;;  %v124_v9 = vld [vmem:[#allocation3 + $0x118] sm:$0xff] }
  0x8b   :  { %1025 = vmatprep.subr.bf16.mxu1 %v7111_v46  ;;  %v8807_v46 = vpack.c.bf16 %v104_v36, %v102_v35  ;;  %v116_v35 = vld [vmem:[#allocation3 + $0xd8] sm:$0xff]  ;;  %v7064_v36 = vcombine.low %v258_v16, %v262_v17  ;;  %v7081_v49 = vcombine.high %v274_v37, %v278_v38  ;;  %v122_v8 = vld [vmem:[#allocation3 + $0x108] sm:$0xff]  ;;  %v8109_v16 = vld [vmem:[#allocation7 + $0xc4] ss:$16 sps:$4 sm:$0xff]  }
  0x8c   :  { %1410 = vmatpush1.bf16.msra.mxu0 %v7106_v43  ;;  %v8829_v43 = vpack.c.bf16 %v116_v35, %v114_v34  ;;  %v8112_v34 = vld [vmem:[#allocation7 + $0xe4] ss:$16 sps:$4 sm:$0xff]   ;;  %v6997_v35 = vcombine.high %v8792_v13, %v8794_v14 }
  0x8d   :  { %1411 = vmatprep.subr.bf16.mxu0 %v7115_v44  ;;  %v7072_v44 = vcombine.low %v266_v28, %v270_v29  ;;  %v121_v28 = vld [vmem:[#allocation3 + $0x100] sm:$0xff]  ;;  %v123_v29 = vld [vmem:[#allocation3 + $0x110] sm:$0xff] }
  0x8e   :  { %1026 = vmatpush1.bf16.msra.mxu1 %v7110_v55  ;;  %v106_v55 = vld [vmem:[#allocation3 + $0x88] sm:$0xff] }
  0x8f   :  { %1188 = vmatprep.subr.bf16.mxu1 %v6993_v58  ;;  %v242_v58 = vld [vmem:[#allocation5 + $0x1c8] sm:$0xff]  ;;  %v8813_v2 = vpack.c.bf16 %v108_v56, %v106_v55  ;;  %v7080_v55 = vcombine.low %v274_v37, %v278_v38  ;;  %v8115_v38 = vld [vmem:[#allocation7 + $0x104] ss:$16 sps:$4 sm:$0xff]  }
  0x90   :  { %1412 = vmatpush1.bf16.msra.mxu0 %v7114_v52  ;;  %v7049_v7 = vcombine.high %v242_v58, %v246_v59  ;;  %v118_v52 = vld [vmem:[#allocation3 + $0xe8] sm:$0xff] }
  0x91   :  { %1028 = vmatmul.mubr.bf16.vlgmr.msra.gmra.mrb[0].mxu1 %v8787_v63  ;;  %3965 = vmatprep.subr.bf16.mxu0 %v8091_v50  ;;  %v113_v50 = vld [vmem:[#allocation3 + $0xc0] sm:$0xff]  ;;  %v290_v56 = vld [vmem:[#allocation5 + $0x348] sm:$0xff] }
  0x92   :  { %1189 = vmatpush1.bf16.msra.mxu1 %v6992_v0  ;;  %1037 = vmatprep.mubr.bf16.mxu1 %v8789_v1  ;;  %v8811_v0 = vpack.c.bf16 %v103_v54, %v101_v53  ;;  %v120_v53 = vld [vmem:[#allocation3 + $0xf8] sm:$0xff]  ;;  %v8104_v54 = vld [vmem:[#allocation7 + $0xa0] ss:$16 sps:$4 sm:$0xff]  }
  0x93   :  { %1190 = vmatprep.subr.bf16.mxu1 %v7001_v4  ;;  %v250_v4 = vld [vmem:[#allocation5 + $0x208] sm:$0xff]  ;;  %1414 = vmatmul.mubr.bf16.vlgmr.msra.gmra.mrb[0].mxu0 %v8787_v63 }
  0x94   :  { %1423 = vmatprep.mubr.bf16.mxu0 %v8789_v1  ;;  %3966 = vmatpush1.bf16.msra.mxu0 %v8089_v60  ;;  %v7057_v20 = vcombine.high %v250_v4, %v254_v5 }
  0x95   :  { %3967 = vmatprep.subr.bf16.mxu0 %v8094_v62 }
  0x96   :  { %1191 = vmatpush1.bf16.msra.mxu1 %v7000_v15  ;;  %v7048_v15 = vcombine.low %v242_v58, %v246_v59  ;;  %v8106_v58 = vld [vmem:[#allocation7 + $0xa4] ss:$16 sps:$4 sm:$0xff]  }
  0x97   :  { %1192 = vmatprep.subr.bf16.mxu1 %v7009_v19  ;;  %v8095_v19 = vld [vmem:[#allocation7 + $0x40] ss:$16 sps:$4 sm:$0xff]  }
  0x98   :  { %3968 = vmatpush1.bf16.msra.mxu0 %v8092_v6  ;;  %v117_v6 = vld [vmem:[#allocation3 + $0xe0] sm:$0xff] }
  0x99   :  { %1038 = vmatmul.mubr.bf16.gmra.mrb[4].mxu1 %v8799_v25  ;;  %3969 = vmatprep.subr.bf16.mxu0 %v8097_v12  ;;  %v306_v12 = vld [vmem:[#allocation5 + $0x3c8] sm:$0xff] }
  0x9a   :  { %1047 = vmatprep.mubr.bf16.mxu1 %v8801_v26  ;;  %1193 = vmatpush1.bf16.msra.mxu1 %v7008_v27  ;;  %v7056_v27 = vcombine.low %v250_v4, %v254_v5  ;;  %v302_v4 = vld [vmem:[#allocation5 + $0x3a8] sm:$0xff] }
  0x9b   :  { %1194 = vmatprep.subr.bf16.mxu1 %v7017_v30  ;;  %1424 = vmatmul.mubr.bf16.gmra.mrb[4].mxu0 %v8799_v25  ;;  %v8098_v30 = vld [vmem:[#allocation7 + $0x60] ss:$16 sps:$4 sm:$0xff]  }
  0x9c   :  { %1433 = vmatprep.mubr.bf16.mxu0 %v8801_v26  ;;  %3970 = vmatpush1.bf16.msra.mxu0 %v8095_v19 }
  0x9d   :  { %3971 = vmatprep.subr.bf16.mxu0 %v8100_v22 }
  0x9e   :  { %1195 = vmatpush1.bf16.msra.mxu1 %v7016_v39  ;;  %v8101_v39 = vld [vmem:[#allocation7 + $0x80] ss:$16 sps:$4 sm:$0xff]  }
  0x9f   :  { %1196 = vmatprep.subr.bf16.mxu1 %v7025_v42  ;;  %v8827_v42 = vpack.c.bf16 %v111_v33, %v109_v32  ;;  %v8110_v32 = vld [vmem:[#allocation7 + $0xe0] ss:$16 sps:$4 sm:$0xff]  }
  0xa0   :  { %3972 = vmatpush1.bf16.msra.mxu0 %v8098_v30  ;;  %v126_v30 = vld [vmem:[#allocation3 + $0x128] sm:$0xff] }
  0xa1   :  { %1048 = vmatmul.mubr.bf16.gmra.mrb[8].mxu1 %v8805_v45  ;;  %3973 = vmatprep.subr.bf16.mxu0 %v8103_v40  ;;  %v127_v40 = vld [vmem:[#allocation3 + $0x130] sm:$0xff] }
  0xa2   :  { %1057 = vmatprep.mubr.bf16.mxu1 %v8807_v46  ;;  %1197 = vmatpush1.bf16.msra.mxu1 %v7024_v47  ;;  %v282_v47 = vld [vmem:[#allocation5 + $0x308] sm:$0xff] }
  0xa3   :  { %1198 = vmatprep.subr.bf16.mxu1 %v7033_v51  ;;  %1434 = vmatmul.mubr.bf16.gmra.mrb[8].mxu0 %v8805_v45  ;;  %v115_v51 = vld [vmem:[#allocation3 + $0xd0] sm:$0xff]  ;;  %v7089_v59 = vcombine.high %v282_v47, %v286_v48  ;;  %v7088_v62 = vcombine.low %v282_v47, %v286_v48  ;;  %v132_v47 = vld [vmem:[#allocation3 + $0x158] sm:$0xff] }
  0xa4   :  { %1443 = vmatprep.mubr.bf16.mxu0 %v8807_v46  ;;  %3974 = vmatpush1.bf16.msra.mxu0 %v8101_v39  ;;  %v8835_v60 = vpack.c.bf16 %v115_v51, %v113_v50  ;;  %v125_v39 = vld [vmem:[#allocation3 + $0x120] sm:$0xff] }
  0xa5   :  { %3975 = vmatprep.subr.bf16.mxu0 %v8106_v58  ;;  %v8116_v48 = vld [vmem:[#allocation7 + $0x120] ss:$16 sps:$4 sm:$0xff]   ;;  %v8861_v50 = vpack.c.bf16 %v127_v40, %v125_v39  ;;  %v148_v39 = vld [vmem:[#allocation3 + $0x1d8] sm:$0xff] }
  0xa6   :  { %1199 = vmatpush1.bf16.msra.mxu1 %v7032_v57  ;;  %v294_v57 = vld [vmem:[#allocation5 + $0x368] sm:$0xff]  ;;  %v8122_v58 = vld [vmem:[#allocation7 + $0x160] ss:$16 sps:$4 sm:$0xff]  }
  0xa7   :  { %1200 = vmatprep.subr.bf16.mxu1 %v7041_v61  ;;  %v8837_v61 = vpack.c.bf16 %v120_v53, %v118_v52  ;;  %v7097_v5 = vcombine.high %v290_v56, %v294_v57  ;;  %v7096_v11 = vcombine.low %v290_v56, %v294_v57  ;;  %v8121_v52 = vld [vmem:[#allocation7 + $0x144] ss:$16 sps:$4 sm:$0xff]   ;;  %v134_v56 = vld [vmem:[#allocation3 + $0x168] sm:$0xff]  ;;  %v136_v57 = vld [vmem:[#allocation3 + $0x178] sm:$0xff] }
  0xa8   :  { %3976 = vmatpush1.bf16.msra.mxu0 %v8104_v54  ;;  %v129_v53 = vld [vmem:[#allocation3 + $0x140] sm:$0xff]  ;;  %v131_v54 = vld [vmem:[#allocation3 + $0x150] sm:$0xff] }
  0xa9   :  { %1058 = vmatmul.mubr.bf16.gmra.mrb[12].mxu1 %v8811_v0  ;;  %3977 = vmatprep.subr.bf16.mxu0 %v8109_v16  ;;  %v8133_v16 = vld [vmem:[#allocation7 + $0x1c4] ss:$16 sps:$4 sm:$0xff]  }
  0xaa   :  { %1067 = vmatprep.mubr.bf16.mxu1 %v8813_v2  ;;  %1201 = vmatpush1.bf16.msra.mxu1 %v7040_v3  ;;  %v298_v3 = vld [vmem:[#allocation5 + $0x388] sm:$0xff] }
  0xab   :  { %1202 = vmatprep.subr.bf16.mxu1 %v7049_v7  ;;  %1444 = vmatmul.mubr.bf16.gmra.mrb[12].mxu0 %v8811_v0  ;;  %v119_v7 = vld [vmem:[#allocation3 + $0xf0] sm:$0xff]  ;;  %v7105_v17 = vcombine.high %v298_v3, %v302_v4  ;;  %v7104_v22 = vcombine.low %v298_v3, %v302_v4  ;;  %v8871_v3 = vpack.c.bf16 %v136_v57, %v134_v56  ;;  %v196_v57 = vld [vmem:[#allocation5 + $0x58] sm:$0xff] }
  0xac   :  { %1453 = vmatprep.mubr.bf16.mxu0 %v8813_v2  ;;  %v8843_v19 = vpack.c.bf16 %v119_v7, %v117_v6  ;;  %3978 = vmatpush1.bf16.msra.mxu0 %v8107_v10  ;;  %v8127_v4 = vld [vmem:[#allocation7 + $0x184] ss:$16 sps:$4 sm:$0xff]   ;;  %v8125_v6 = vld [vmem:[#allocation7 + $0x180] ss:$16 sps:$4 sm:$0xff]  }
  0xad   :  { %3979 = vmatprep.subr.bf16.mxu0 %v8112_v34  ;;  %v135_v7 = vld [vmem:[#allocation3 + $0x170] sm:$0xff]  ;;  %v141_v34 = vld [vmem:[#allocation3 + $0x1a0] sm:$0xff] }
  0xae   :  { %1203 = vmatpush1.bf16.msra.mxu1 %v7048_v15  ;;  %v310_v15 = vld [vmem:[#allocation5 + $0x3e8] sm:$0xff]  ;;  %v8130_v10 = vld [vmem:[#allocation7 + $0x1a4] ss:$16 sps:$4 sm:$0xff]  }
  0xaf   :  { %1204 = vmatprep.subr.bf16.mxu1 %v7057_v20  ;;  %v8845_v20 = vpack.c.bf16 %v124_v9, %v122_v8  ;;  %v7112_v33 = vcombine.low %v306_v12, %v310_v15  ;;  %v138_v8 = vld [vmem:[#allocation3 + $0x188] sm:$0xff]  ;;  %v140_v9 = vld [vmem:[#allocation3 + $0x198] sm:$0xff] }
  0xb0   :  { %3980 = vmatpush1.bf16.msra.mxu0 %v8110_v32 }
  0xb1   :  { %1068 = vmatmul.mubr.bf16.gmra.mrb[16].mxu1 %v8819_v23  ;;  %3981 = vmatprep.subr.bf16.mxu0 %v8115_v38  ;;  %v146_v38 = vld [vmem:[#allocation3 + $0x1c8] sm:$0xff] }
  0xb2   :  { %1077 = vmatprep.mubr.bf16.mxu1 %v8821_v24  ;;  %1205 = vmatpush1.bf16.msra.mxu1 %v7056_v27  ;;  %v7113_v27 = vcombine.high %v306_v12, %v310_v15  ;;  %v8879_v15 = vpack.c.bf16 %v140_v9, %v138_v8  ;;  %v212_v8 = vld [vmem:[#allocation5 + $0xd8] sm:$0xff] }
  0xb3   :  { %1206 = vmatprep.subr.bf16.mxu1 %v7065_v31  ;;  %1454 = vmatmul.mubr.bf16.gmra.mrb[16].mxu0 %v8819_v23  ;;  %v128_v31 = vld [vmem:[#allocation3 + $0x138] sm:$0xff] }
  0xb4   :  { %1463 = vmatprep.mubr.bf16.mxu0 %v8821_v24  ;;  %v8855_v37 = vpack.c.bf16 %v128_v31, %v126_v30  ;;  %v8136_v30 = vld [vmem:[#allocation7 + $0x1e4] ss:$16 sps:$4 sm:$0xff]   ;;  %v8134_v31 = vld [vmem:[#allocation7 + $0x1e0] ss:$16 sps:$4 sm:$0xff]   ;;  %v216_v9 = vld [vmem:[#allocation5 + $0xf8] sm:$0xff] }
  0xb5   :  { %v7020_v13 = vcombine.low %v212_v8, %v216_v9 }
  0xb6   :  { %1207 = vmatpush1.bf16.msra.mxu1 %v7064_v36  ;;  %v8853_v36 = vpack.c.bf16 %v123_v29, %v121_v28  ;;  %v142_v28 = vld [vmem:[#allocation3 + $0x1a8] sm:$0xff]  ;;  %v144_v29 = vld [vmem:[#allocation3 + $0x1b8] sm:$0xff] }
  0xb7   :  { %1208 = vmatprep.subr.bf16.mxu1 %v7073_v41  ;;  %v8113_v41 = vld [vmem:[#allocation7 + $0x100] ss:$16 sps:$4 sm:$0xff]  }
  0xb8   :  { %3982 = vmatpush1.bf16.msra.mxu0 %v8113_v41  ;;  %v8895_v41 = vpack.c.bf16 %v148_v39, %v146_v38  ;;  %v244_v38 = vld [vmem:[#allocation5 + $0x1d8] sm:$0xff] }
  0xb9   :  { %1078 = vmatmul.mubr.bf16.gmra.mrb[20].mxu1 %v8827_v42  ;;  %v248_v39 = vld [vmem:[#allocation5 + $0x1f8] sm:$0xff] }
  0xba   :  { %1087 = vmatprep.mubr.bf16.mxu1 %v8829_v43  ;;  %1209 = vmatpush1.bf16.msra.mxu1 %v7072_v44  ;;  %v130_v44 = vld [vmem:[#allocation3 + $0x148] sm:$0xff]  ;;  %10337 = vst [vmem:[#allocation13_spill] sm:$0xff] %v8895_v41 }
  0xbb   :  { %1210 = vmatprep.subr.bf16.mxu1 %v7081_v49  ;;  %1464 = vmatmul.mubr.bf16.gmra.mrb[20].mxu0 %v8827_v42  ;;  %v8118_v49 = vld [vmem:[#allocation7 + $0x124] ss:$16 sps:$4 sm:$0xff]   ;;  %v8863_v51 = vpack.c.bf16 %v132_v47, %v130_v44 }
  0xbc   :  { %1473 = vmatprep.mubr.bf16.mxu0 %v8829_v43  ;;  %3983 = vmatprep.subr.bf16.mxu0 %v8118_v49  ;;  %v145_v44 = vld [vmem:[#allocation3 + $0x1c0] sm:$0xff]  ;;  %v147_v47 = vld [vmem:[#allocation3 + $0x1d0] sm:$0xff]  ;;  %v152_v49 = vld [vmem:[#allocation3 + $0x1f8] sm:$0xff] }
  0xbd   :  { %3984 = vmatpush1.bf16.msra.mxu0 %v8116_v48  ;;  %v150_v48 = vld [vmem:[#allocation3 + $0x1e8] sm:$0xff] }
  0xbe   :  { %1211 = vmatpush1.bf16.msra.mxu1 %v7080_v55  ;;  %v8119_v55 = vld [vmem:[#allocation7 + $0x140] ss:$16 sps:$4 sm:$0xff]   ;;  %3985 = vmatprep.subr.bf16.mxu0 %v8121_v52  ;;  %v8901_v52 = vpack.c.bf16 %v147_v47, %v145_v44  ;;  %v7053_v47 = vcombine.high %v244_v38, %v248_v39 }
  0xbf   :  { %1212 = vmatprep.subr.bf16.mxu1 %v7089_v59  ;;  %v8124_v59 = vld [vmem:[#allocation7 + $0x164] ss:$16 sps:$4 sm:$0xff]  }
  0xc1   :  { %1088 = vmatmul.mubr.bf16.gmra.mrb[24].mxu1 %v8835_v60  ;;  %3986 = vmatpush1.bf16.msra.mxu0 %v8119_v55  ;;  %v151_v55 = vld [vmem:[#allocation3 + $0x1f0] sm:$0xff] }
  0xc2   :  { %1097 = vmatprep.mubr.bf16.mxu1 %v8837_v61  ;;  %1213 = vmatpush1.bf16.msra.mxu1 %v7088_v62  ;;  %v8869_v62 = vpack.c.bf16 %v131_v54, %v129_v53  ;;  %v8903_v53 = vpack.c.bf16 %v152_v49, %v150_v48  ;;  %v149_v54 = vld [vmem:[#allocation3 + $0x1e0] sm:$0xff]  ;;  %v252_v48 = vld [vmem:[#allocation5 + $0x218] sm:$0xff] }
  0xc3   :  { %1214 = vmatprep.subr.bf16.mxu1 %v7097_v5  ;;  %1474 = vmatmul.mubr.bf16.gmra.mrb[24].mxu0 %v8835_v60  ;;  %v133_v5 = vld [vmem:[#allocation3 + $0x160] sm:$0xff]  ;;  %v8909_v56 = vpack.c.bf16 %v151_v55, %v149_v54  ;;  %v256_v49 = vld [vmem:[#allocation5 + $0x238] sm:$0xff]  ;;  %v7052_v54 = vcombine.low %v244_v38, %v248_v39 }
  0xc4   :  { %1483 = vmatprep.mubr.bf16.mxu0 %v8837_v61  ;;  %3987 = vmatprep.subr.bf16.mxu0 %v8124_v59  ;;  %v8877_v12 = vpack.c.bf16 %v135_v7, %v133_v5  ;;  %10338 = vst [vmem:[#allocation14_spill] sm:$0xff] %v8903_v53  ;;  %v208_v5 = vld [vmem:[#allocation5 + $0xb8] sm:$0xff]  ;;  %v7061_v55 = vcombine.high %v252_v48, %v256_v49 }
  0xc5   :  { %3988 = vmatpush1.bf16.msra.mxu0 %v8122_v58  ;;  %v200_v58 = vld [vmem:[#allocation5 + $0x78] sm:$0xff] }
  0xc6   :  { %1215 = vmatpush1.bf16.msra.mxu1 %v7096_v11  ;;  %3989 = vmatprep.subr.bf16.mxu0 %v8127_v4  ;;  %v8128_v11 = vld [vmem:[#allocation7 + $0x1a0] ss:$16 sps:$4 sm:$0xff]   ;;  %v7005_v59 = vcombine.high %v196_v57, %v200_v58  ;;  %v204_v4 = vld [vmem:[#allocation5 + $0x98] sm:$0xff] }
  0xc7   :  { %1216 = vmatprep.subr.bf16.mxu1 %v7105_v17  ;;  %v137_v17 = vld [vmem:[#allocation3 + $0x180] sm:$0xff]  ;;  %v7013_v7 = vcombine.high %v204_v4, %v208_v5  ;;  %v308_v38 = vld [vmem:[#allocation5 + $0x3d8] sm:$0xff] }
  0xc8   :  { %v312_v39 = vld [vmem:[#allocation5 + $0x3f8] sm:$0xff] }
  0xc9   :  { %1098 = vmatmul.mubr.bf16.gmra.mrb[28].mxu1 %v8843_v19  ;;  %3990 = vmatpush1.bf16.msra.mxu0 %v8125_v6  ;;  %v7004_v6 = vcombine.low %v196_v57, %v200_v58  ;;  %v260_v57 = vld [vmem:[#allocation5 + $0x258] sm:$0xff] }
  0xca   :  { %1107 = vmatprep.mubr.bf16.mxu1 %v8845_v20  ;;  %1217 = vmatpush1.bf16.msra.mxu1 %v7104_v22  ;;  %v139_v22 = vld [vmem:[#allocation3 + $0x190] sm:$0xff]  ;;  %v264_v58 = vld [vmem:[#allocation5 + $0x278] sm:$0xff] }
  0xcb   :  { %1218 = vmatprep.subr.bf16.mxu1 %v7113_v27  ;;  %1484 = vmatmul.mubr.bf16.gmra.mrb[28].mxu0 %v8843_v19  ;;  %v8131_v27 = vld [vmem:[#allocation7 + $0x1c0] ss:$16 sps:$4 sm:$0xff]   ;;  %v8885_v32 = vpack.c.bf16 %v139_v22, %v137_v17  ;;  %v220_v17 = vld [vmem:[#allocation5 + $0x118] sm:$0xff] }
  0xcc   :  { %1493 = vmatprep.mubr.bf16.mxu0 %v8845_v20  ;;  %3991 = vmatprep.subr.bf16.mxu0 %v8130_v10  ;;  %v8139_v10 = vld [vmem:[#allocation7 + $0x204] ss:$16 sps:$4 sm:$0xff]   ;;  %v224_v22 = vld [vmem:[#allocation5 + $0x138] sm:$0xff] }
  0xcd   :  { %3992 = vmatpush1.bf16.msra.mxu0 %v8128_v11  ;;  %v7012_v11 = vcombine.low %v204_v4, %v208_v5  ;;  %v7029_v14 = vcombine.high %v220_v17, %v224_v22  ;;  %v7069_v4 = vcombine.high %v260_v57, %v264_v58  ;;  %v268_v5 = vld [vmem:[#allocation5 + $0x298] sm:$0xff] }
  0xce   :  { %1219 = vmatpush1.bf16.msra.mxu1 %v7112_v33  ;;  %3993 = vmatprep.subr.bf16.mxu0 %v8133_v16  ;;  %v8887_v33 = vpack.c.bf16 %v144_v29, %v142_v28  ;;  %v7021_v16 = vcombine.high %v212_v8, %v216_v9  ;;  %v7028_v28 = vcombine.low %v220_v17, %v224_v22  ;;  %v276_v9 = vld [vmem:[#allocation5 + $0x2d8] sm:$0xff] }
  0xcf   :  { %1574 = vmatprep.subr.bf16.mxu1 %v6997_v35  ;;  %v143_v35 = vld [vmem:[#allocation3 + $0x1b0] sm:$0xff]  ;;  %v284_v17 = vld [vmem:[#allocation5 + $0x318] sm:$0xff] }
  0xd0   :  { %v8893_v40 = vpack.c.bf16 %v143_v35, %v141_v34  ;;  %v288_v22 = vld [vmem:[#allocation5 + $0x338] sm:$0xff] }
  0xd1   :  { %1108 = vmatmul.mubr.bf16.gmra.mrb[32].mxu1 %v8853_v36  ;;  %3994 = vmatpush1.bf16.msra.mxu0 %v8131_v27  ;;  %v232_v27 = vld [vmem:[#allocation5 + $0x178] sm:$0xff] }
  0xd2   :  { %1117 = vmatprep.mubr.bf16.mxu1 %v8855_v37  ;;  %3995 = vmatprep.subr.bf16.mxu0 %v8136_v30  ;;  %v236_v30 = vld [vmem:[#allocation5 + $0x198] sm:$0xff] }
  0xd3   :  { %1494 = vmatmul.mubr.bf16.gmra.mrb[32].mxu0 %v8853_v36 }
  0xd4   :  { %1503 = vmatprep.mubr.bf16.mxu0 %v8855_v37 }
  0xd5   :  { %3996 = vmatpush1.bf16.msra.mxu0 %v8134_v31  ;;  %v240_v31 = vld [vmem:[#allocation5 + $0x1b8] sm:$0xff] }
  0xd6   :  { %4158 = vmatprep.subr.bf16.mxu0 %v8139_v10  ;;  %v7045_v35 = vcombine.high %v236_v30, %v240_v31  ;;  %v7044_v44 = vcombine.low %v236_v30, %v240_v31  ;;  %v280_v10 = vld [vmem:[#allocation5 + $0x2f8] sm:$0xff] }
  0xd7   :  { %v300_v30 = vld [vmem:[#allocation5 + $0x398] sm:$0xff] }
  0xd8   :  { %v304_v31 = vld [vmem:[#allocation5 + $0x3b8] sm:$0xff] }
  0xd9   :  { %1118 = vmatmul.mubr.bf16.gmra.mrb[36].mxu1 %v8861_v50 }
  0xda   :  { %1127 = vmatprep.mubr.bf16.mxu1 %v8863_v51 }
  0xdb   :  { %1504 = vmatmul.mubr.bf16.gmra.mrb[36].mxu0 %v8861_v50 }
  0xdc   :  { %1513 = vmatprep.mubr.bf16.mxu0 %v8863_v51 }
  0xe1   :  { %1128 = vmatmul.mubr.bf16.gmra.mrb[40].mxu1 %v8869_v62 }
  0xe2   :  { %1137 = vmatprep.mubr.bf16.mxu1 %v8871_v3 }
  0xe3   :  { %1514 = vmatmul.mubr.bf16.gmra.mrb[40].mxu0 %v8869_v62 }
  0xe4   :  { %1523 = vmatprep.mubr.bf16.mxu0 %v8871_v3 }
  0xe9   :  { %1138 = vmatmul.mubr.bf16.gmra.mrb[44].mxu1 %v8877_v12 }
  0xea   :  { %1147 = vmatprep.mubr.bf16.mxu1 %v8879_v15 }
  0xeb   :  { %1524 = vmatmul.mubr.bf16.gmra.mrb[44].mxu0 %v8877_v12 }
  0xec   :  { %1533 = vmatprep.mubr.bf16.mxu0 %v8879_v15 }
  0xf1   :  { %1148 = vmatmul.mubr.bf16.gmra.mrb[48].mxu1 %v8885_v32 }
  0xf2   :  { %1157 = vmatprep.mubr.bf16.mxu1 %v8887_v33 }
  0xf3   :  { %1534 = vmatmul.mubr.bf16.gmra.mrb[48].mxu0 %v8885_v32 }
  0xf4   :  { %1543 = vmatprep.mubr.bf16.mxu0 %v8887_v33 }
  0xf9   :  { %1158 = vmatmul.mubr.bf16.gmra.mrb[52].mxu1 %v8893_v40 }
  0xfa   :  { %1167 = vmatprep.mubr.bf16.mxu1 %v8895_v41 }
  0xfb   :  { %1544 = vmatmul.mubr.bf16.gmra.mrb[52].mxu0 %v8893_v40 }
  0xfc   :  { %1553 = vmatprep.mubr.bf16.mxu0 %v8895_v41 }
 0x101   :  { %1168 = vmatmul.mubr.bf16.gmra.mrb[56].mxu1 %v8901_v52 }
 0x102   :  { %1177 = vmatprep.mubr.bf16.mxu1 %v8903_v53 }
 0x103   :  { %1554 = vmatmul.mubr.bf16.gmra.mrb[56].mxu0 %v8901_v52 }
 0x104   :  { %1563 = vmatprep.mubr.bf16.mxu0 %v8903_v53 }
 0x109   :  { %1178 = vmatmul.mubr.bf16.gmra.mrb[60].mxu1 %v8909_v56 }
 0x10a   :  { %1220 = vmatprep.mubr.bf16.mxu1 %v8783_v21 }
 0x10b   :  { %1564 = vmatmul.mubr.bf16.gmra.mrb[60].mxu0 %v8909_v56 }
 0x111   :  { %1221 = vmatmul.mubr.bf16.vlgmr.msra.gmra.mrb[64].mxu1 %v8787_v63 }
 0x112   :  { %1575 = vmatpush1.bf16.msra.mxu1 %v6996_v18  ;;  %1230 = vmatprep.mubr.bf16.mxu1 %v8789_v1  ;;  %v228_v18 = vld [vmem:[#allocation5 + $0x158] sm:$0xff] }
 0x113   :  { %1576 = vmatprep.subr.bf16.mxu1 %v7005_v59  ;;  %v7037_v29 = vcombine.high %v228_v18, %v232_v27  ;;  %v7036_v34 = vcombine.low %v228_v18, %v232_v27  ;;  %v7060_v59 = vcombine.low %v252_v48, %v256_v49  ;;  %v292_v18 = vld [vmem:[#allocation5 + $0x358] sm:$0xff]  ;;  %v7116_v48 = vcombine.low %v308_v38, %v312_v39 }
 0x114   :  { %v296_v27 = vld [vmem:[#allocation5 + $0x378] sm:$0xff] }
 0x115   :  { %v8142_v49 = vld [vmem:[#allocation7 + $0xc] ss:$16 sps:$4 sm:$0xff]  }
 0x116   :  { %1577 = vmatpush1.bf16.msra.mxu1 %v7004_v6  ;;  %v272_v6 = vld [vmem:[#allocation5 + $0x2b8] sm:$0xff] }
 0x117   :  { %1578 = vmatprep.subr.bf16.mxu1 %v7013_v7  ;;  %v7068_v7 = vcombine.low %v260_v57, %v264_v58  ;;  %v7077_v8 = vcombine.high %v268_v5, %v272_v6  ;;  %v8951_v58 = vld [vmem:[%s10274_s2] sm:$0xff] }
 0x119   :  { %1231 = vmatmul.mubr.bf16.gmra.mrb[68].mxu1 %v8799_v25 }
 0x11a   :  { %1240 = vmatprep.mubr.bf16.mxu1 %v8801_v26  ;;  %1579 = vmatpush1.bf16.msra.mxu1 %v7012_v11  ;;  %v7076_v11 = vcombine.low %v268_v5, %v272_v6 }
 0x11b   :  { %1580 = vmatprep.subr.bf16.mxu1 %v7021_v16  ;;  %v7085_v16 = vcombine.high %v276_v9, %v280_v10 }
 0x11e   :  { %1581 = vmatpush1.bf16.msra.mxu1 %v7020_v13  ;;  %v7084_v13 = vcombine.low %v276_v9, %v280_v10 }
 0x11f   :  { %1582 = vmatprep.subr.bf16.mxu1 %v7029_v14  ;;  %v7093_v14 = vcombine.high %v284_v17, %v288_v22 }
 0x121   :  { %1241 = vmatmul.mubr.bf16.gmra.mrb[72].mxu1 %v8805_v45 }
 0x122   :  { %1250 = vmatprep.mubr.bf16.mxu1 %v8807_v46  ;;  %1583 = vmatpush1.bf16.msra.mxu1 %v7028_v28  ;;  %v7092_v28 = vcombine.low %v284_v17, %v288_v22 }
 0x123   :  { %1584 = vmatprep.subr.bf16.mxu1 %v7037_v29  ;;  %v7101_v29 = vcombine.high %v292_v18, %v296_v27 }
 0x126   :  { %1585 = vmatpush1.bf16.msra.mxu1 %v7036_v34  ;;  %v7100_v34 = vcombine.low %v292_v18, %v296_v27 }
 0x127   :  { %1586 = vmatprep.subr.bf16.mxu1 %v7045_v35  ;;  %v7109_v35 = vcombine.high %v300_v30, %v304_v31 }
 0x129   :  { %1251 = vmatmul.mubr.bf16.gmra.mrb[76].mxu1 %v8811_v0 }
 0x12a   :  { %1260 = vmatprep.mubr.bf16.mxu1 %v8813_v2  ;;  %1587 = vmatpush1.bf16.msra.mxu1 %v7044_v44  ;;  %v7108_v44 = vcombine.low %v300_v30, %v304_v31 }
 0x12b   :  { %1588 = vmatprep.subr.bf16.mxu1 %v7053_v47  ;;  %v7117_v47 = vcombine.high %v308_v38, %v312_v39 }
 0x12e   :  { %1589 = vmatpush1.bf16.msra.mxu1 %v7052_v54  ;;  %v315_v54 = vlaneseq }
 0x12f   :  { %1590 = vmatprep.subr.bf16.mxu1 %v7061_v55 }
 0x130   :  { %v8942_v55 = vshrl.u32 %v315_v54, 7 }
 0x131   :  { %1261 = vmatmul.mubr.bf16.gmra.mrb[80].mxu1 %v8819_v23 }
 0x132   :  { %1270 = vmatprep.mubr.bf16.mxu1 %v8821_v24  ;;  %1591 = vmatpush1.bf16.msra.mxu1 %v7060_v59  ;;  %10339 = vst [vmem:[#allocation15_spill] sm:$0xff] %v8942_v55  ;;  %v8946_v57 = vsub.s32 0, %v8942_v55  ;;  %v8954_v59 = vsub.s32 1, %v8942_v55 }
 0x133   :  { %1592 = vmatprep.subr.bf16.mxu1 %v7069_v4 }
 0x134   :  { %10340 = vst [vmem:[#allocation16_spill] sm:$0xff] %v8946_v57  ;;  %10341 = vst [vmem:[#allocation17_spill] sm:$0xff] %v8954_v59  ;;  %v8959_v4 = vrot.slane %v8951_v58, %v8946_v57  ;;  %v8963_v5 = vrot.slane %v8951_v58, %v8954_v59 }
 0x136   :  { %1593 = vmatpush1.bf16.msra.mxu1 %v7068_v7 }
 0x137   :  { %1594 = vmatprep.subr.bf16.mxu1 %v7077_v8 }
 0x139   :  { %1271 = vmatmul.mubr.bf16.gmra.mrb[84].mxu1 %v8827_v42 }
 0x13a   :  { %1280 = vmatprep.mubr.bf16.mxu1 %v8829_v43  ;;  %1595 = vmatpush1.bf16.msra.mxu1 %v7076_v11 }
 0x13b   :  { %1596 = vmatprep.subr.bf16.mxu1 %v7085_v16 }
 0x13e   :  { %1597 = vmatpush1.bf16.msra.mxu1 %v7084_v13 }
 0x13f   :  { %1598 = vmatprep.subr.bf16.mxu1 %v7093_v14 }
 0x141   :  { %1281 = vmatmul.mubr.bf16.gmra.mrb[88].mxu1 %v8835_v60 }
 0x142   :  { %1290 = vmatprep.mubr.bf16.mxu1 %v8837_v61  ;;  %1599 = vmatpush1.bf16.msra.mxu1 %v7092_v28 }
 0x143   :  { %1600 = vmatprep.subr.bf16.mxu1 %v7101_v29 }
 0x146   :  { %1601 = vmatpush1.bf16.msra.mxu1 %v7100_v34 }
 0x147   :  { %1602 = vmatprep.subr.bf16.mxu1 %v7109_v35 }
 0x149   :  { %1291 = vmatmul.mubr.bf16.gmra.mrb[92].mxu1 %v8843_v19 }
 0x14a   :  { %1300 = vmatprep.mubr.bf16.mxu1 %v8845_v20  ;;  %1603 = vmatpush1.bf16.msra.mxu1 %v7108_v44 }
 0x14b   :  { %1604 = vmatprep.subr.bf16.mxu1 %v7117_v47 }
 0x14e   :  { %1605 = vmatpush1.bf16.msra.mxu1 %v7116_v48  ;;  %v8137_v48 = vld [vmem:[#allocation7 + $0x200] ss:$16 sps:$4 sm:$0xff]  }
 0x14f   :  { %4737 = vmatprep.subr.bf16.mxu1 %v8142_v49 }
 0x151   :  { %1301 = vmatmul.mubr.bf16.gmra.mrb[96].mxu1 %v8853_v36 }
 0x152   :  { %1310 = vmatprep.mubr.bf16.mxu1 %v8855_v37 }
 0x159   :  { %1311 = vmatmul.mubr.bf16.gmra.mrb[100].mxu1 %v8861_v50 }
 0x15a   :  { %1320 = vmatprep.mubr.bf16.mxu1 %v8863_v51 }
 0x161   :  { %1321 = vmatmul.mubr.bf16.gmra.mrb[104].mxu1 %v8869_v62 }
 0x162   :  { %1330 = vmatprep.mubr.bf16.mxu1 %v8871_v3 }
 0x164   :  { %v1029_v6 = vpop.f32.mrb[0].mxu1 }
 0x165   :  { %v1030_v7 = vadd.f32 %v1029_v6, %v8959_v4  ;;  %v1031_v8 = vpop.f32.mrb[1].mxu1 }
 0x166   :  { %v1032_v9 = vadd.f32 %v1031_v8, %v8963_v5  ;;  %v1033_v10 = vpop.f32.mrb[2].mxu1 }
 0x167   :  { %v1767_v11 = vmul.f32 0.2, %v1030_v7  ;;  %v1034_v16 = vadd.f32 %v1033_v10, %v8959_v4  ;;  %v1035_v17 = vpop.f32.mrb[3].mxu1 }
 0x168   :  { %v1768_v22 = vmul.f32 0.2, %v1032_v9  ;;  %v1036_v13 = vadd.f32 %v1035_v17, %v8963_v5  ;;  %v333_v17 = vsub.s32 4, %v8942_v55 }
 0x169   :  { %v1775_v14 = vmul.f32 0.2, %v1034_v16  ;;  %1331 = vmatmul.mubr.bf16.gmra.mrb[108].mxu1 %v8877_v12  ;;  %v2023_v27 = vmax.f32 %v1030_v7, %v1767_v11  ;;  %v8145_v7 = vld [vmem:[#allocation7 + $0x224] ss:$16 sps:$4 sm:$0xff]  }
 0x16a   :  { %v1776_v18 = vmul.f32 0.2, %v1036_v13  ;;  %1340 = vmatprep.mubr.bf16.mxu1 %v8879_v15  ;;  %v2024_v29 = vmax.f32 %v1032_v9, %v1768_v22 }
 0x16b   :  { %v2031_v28 = vmax.f32 %v1034_v16, %v1775_v14  ;;  %v8143_v16 = vld [vmem:[#allocation7 + $0x220] ss:$16 sps:$4 sm:$0xff]   ;;  %v8151_v14 = vld [vmem:[#allocation7 + $0x244] ss:$16 sps:$4 sm:$0xff]  }
 0x16c   :  { %v2032_v30 = vmax.f32 %v1036_v13, %v1776_v18  ;;  %v1039_v31 = vpop.f32.mrb[4].mxu1  ;;  %v337_v18 = vsub.s32 5, %v8942_v55 }
 0x16d   :  { %v8972_v34 = vpack.c.bf16 %v2031_v28, %v2023_v27  ;;  %v1040_v35 = vadd.f32 %v1039_v31, %v8959_v4  ;;  %v1041_v38 = vpop.f32.mrb[5].mxu1 }
 0x16e   :  { %v1042_v39 = vadd.f32 %v1041_v38, %v8963_v5  ;;  %v1043_v44 = vpop.f32.mrb[6].mxu1  ;;  %v8976_v47 = vpack.c.bf16 %v2032_v30, %v2024_v29 }
 0x16f   :  { %10342 = vst [vmem:[#allocation18_spill] sm:$0xff] %v8972_v34  ;;  %v1783_v49 = vmul.f32 0.2, %v1040_v35  ;;  %v1044_v54 = vadd.f32 %v1043_v44, %v8959_v4  ;;  %v1045_v6 = vpop.f32.mrb[7].mxu1 }
 0x170   :  { %10343 = vst [vmem:[#allocation19_spill] sm:$0xff] %v8976_v47  ;;  %v1784_v8 = vmul.f32 0.2, %v1042_v39  ;;  %v1046_v9 = vadd.f32 %v1045_v6, %v8963_v5  ;;  %3997 = vmatprep.mubr.bf16.mxu0 %v8976_v47 }
 0x171   :  { %v1791_v10 = vmul.f32 0.2, %v1044_v54  ;;  %1341 = vmatmul.mubr.bf16.gmra.mrb[112].mxu1 %v8885_v32  ;;  %3998 = vmatmul.mubr.bf16.vlgmr.msra.gmra.mrb[64].mxu0 %v8972_v34  ;;  %v2039_v22 = vmax.f32 %v1040_v35, %v1783_v49  ;;  %v8149_v35 = vld [vmem:[#allocation7 + $0x240] ss:$16 sps:$4 sm:$0xff]   ;;  %v8993_v49 = vrot.slane %v8951_v58, %v333_v17 }
 0x172   :  { %v1792_v11 = vmul.f32 0.2, %v1046_v9  ;;  %1350 = vmatprep.mubr.bf16.mxu1 %v8887_v33  ;;  %4159 = vmatpush1.bf16.msra.mxu0 %v8137_v48  ;;  %v2040_v27 = vmax.f32 %v1042_v39, %v1784_v8  ;;  %v8157_v8 = vld [vmem:[#allocation7 + $0x264] ss:$16 sps:$4 sm:$0xff]  }
 0x173   :  { %v2047_v13 = vmax.f32 %v1044_v54, %v1791_v10  ;;  %4160 = vmatprep.subr.bf16.mxu0 %v8145_v7 }
 0x174   :  { %v2048_v28 = vmax.f32 %v1046_v9, %v1792_v11  ;;  %v1049_v29 = vpop.f32.mrb[8].mxu1  ;;  %v8997_v9 = vrot.slane %v8951_v58, %v337_v18 }
 0x175   :  { %v1050_v30 = vadd.f32 %v1049_v29, %v8959_v4  ;;  %v1051_v31 = vpop.f32.mrb[9].mxu1  ;;  %v8987_v38 = vpack.c.bf16 %v2047_v13, %v2039_v22  ;;  %v8155_v13 = vld [vmem:[#allocation7 + $0x260] ss:$16 sps:$4 sm:$0xff]  }
 0x176   :  { %v1052_v44 = vadd.f32 %v1051_v31, %v8963_v5  ;;  %v1053_v48 = vpop.f32.mrb[10].mxu1  ;;  %v8990_v6 = vpack.c.bf16 %v2048_v28, %v2040_v27  ;;  %4161 = vmatpush1.bf16.msra.mxu0 %v8143_v16  ;;  %v1415_v16 = vpop.f32.mrb[0].mxu0  ;;  %v8163_v28 = vld [vmem:[#allocation7 + $0x284] ss:$16 sps:$4 sm:$0xff]  }
 0x177   :  { %10344 = vst [vmem:[#allocation20_spill] sm:$0xff] %v8987_v38  ;;  %v1799_v54 = vmul.f32 0.2, %v1050_v30  ;;  %v1054_v39 = vadd.f32 %v1053_v48, %v8959_v4  ;;  %v1055_v7 = vpop.f32.mrb[11].mxu1  ;;  %4162 = vmatprep.subr.bf16.mxu0 %v8151_v14  ;;  %v1416_v14 = vadd.f32 %v1415_v16, %v8993_v49  ;;  %v1417_v58 = vpop.f32.mrb[1].mxu0 }
 0x178   :  { %10345 = vst [vmem:[#allocation21_spill] sm:$0xff] %v8990_v6  ;;  %v1800_v10 = vmul.f32 0.2, %v1052_v44  ;;  %v1056_v11 = vadd.f32 %v1055_v7, %v8963_v5  ;;  %4007 = vmatprep.mubr.bf16.mxu0 %v8990_v6  ;;  %v1418_v29 = vadd.f32 %v1417_v58, %v8997_v9  ;;  %v1419_v31 = vpop.f32.mrb[2].mxu0  ;;  %v8161_v16 = vld [vmem:[#allocation7 + $0x280] ss:$16 sps:$4 sm:$0xff]  }
 0x179   :  { %v1807_v22 = vmul.f32 0.2, %v1054_v39  ;;  %1351 = vmatmul.mubr.bf16.gmra.mrb[116].mxu1 %v8893_v40  ;;  %4008 = vmatmul.mubr.bf16.gmra.mrb[68].mxu0 %v8987_v38  ;;  %v2055_v18 = vmax.f32 %v1050_v30, %v1799_v54  ;;  %v1771_v57 = vmul.f32 0.2, %v1416_v14  ;;  %v1420_v38 = vadd.f32 %v1419_v31, %v8993_v49  ;;  %v1421_v6 = vpop.f32.mrb[3].mxu0 }
 0x17a   :  { %v1808_v17 = vmul.f32 0.2, %v1056_v11  ;;  %1360 = vmatprep.mubr.bf16.mxu1 %v8895_v41  ;;  %4163 = vmatpush1.bf16.msra.mxu0 %v8149_v35  ;;  %v2056_v48 = vmax.f32 %v1052_v44, %v1800_v10  ;;  %v1772_v30 = vmul.f32 0.2, %v1418_v29  ;;  %v1422_v54 = vadd.f32 %v1421_v6, %v8997_v9  ;;  %v8169_v44 = vld [vmem:[#allocation7 + $0x2a4] ss:$16 sps:$4 sm:$0xff]  }
 0x17b   :  { %v2063_v27 = vmax.f32 %v1054_v39, %v1807_v22  ;;  %4164 = vmatprep.subr.bf16.mxu0 %v8157_v8  ;;  %v2027_v10 = vmax.f32 %v1416_v14, %v1771_v57 }
 0x17c   :  { %v2064_v7 = vmax.f32 %v1056_v11, %v1808_v17  ;;  %v1059_v59 = vpop.f32.mrb[12].mxu1  ;;  %v1779_v11 = vmul.f32 0.2, %v1420_v38 }
 0x17d   :  { %v1060_v35 = vadd.f32 %v1059_v59, %v8959_v4  ;;  %v1061_v34 = vpop.f32.mrb[13].mxu1  ;;  %v9008_v47 = vpack.c.bf16 %v2063_v27, %v2055_v18  ;;  %v2028_v18 = vmax.f32 %v1418_v29, %v1772_v30  ;;  %v1780_v27 = vmul.f32 0.2, %v1422_v54 }
 0x17e   :  { %v1062_v39 = vadd.f32 %v1061_v34, %v8963_v5  ;;  %v1063_v8 = vpop.f32.mrb[14].mxu1  ;;  %v9012_v22 = vpack.c.bf16 %v2064_v7, %v2056_v48  ;;  %4165 = vmatpush1.bf16.msra.mxu0 %v8155_v13  ;;  %v2035_v34 = vmax.f32 %v1420_v38, %v1779_v11  ;;  %v1425_v13 = vpop.f32.mrb[4].mxu0  ;;  %v8175_v38 = vld [vmem:[#allocation7 + $0x2c4] ss:$16 sps:$4 sm:$0xff]  }
 0x17f   :  { %10346 = vst [vmem:[#allocation22_spill] sm:$0xff] %v9008_v47  ;;  %v1815_v17 = vmul.f32 0.2, %v1060_v35  ;;  %v1064_v58 = vadd.f32 %v1063_v8, %v8959_v4  ;;  %v1065_v59 = vpop.f32.mrb[15].mxu1  ;;  %4166 = vmatprep.subr.bf16.mxu0 %v8163_v28  ;;  %v2036_v57 = vmax.f32 %v1422_v54, %v1780_v27  ;;  %v8167_v28 = vld [vmem:[#allocation7 + $0x2a0] ss:$16 sps:$4 sm:$0xff]   ;;  %v1426_v48 = vadd.f32 %v1425_v13, %v8993_v49 }
 0x180   :  { %10347 = vst [vmem:[#allocation23_spill] sm:$0xff] %v9012_v22  ;;  %v1816_v31 = vmul.f32 0.2, %v1062_v39  ;;  %v1066_v41 = vadd.f32 %v1065_v59, %v8963_v5  ;;  %4017 = vmatprep.mubr.bf16.mxu0 %v9012_v22  ;;  %v9020_v29 = vpack.c.bf16 %v2035_v34, %v2027_v10  ;;  %v1427_v7 = vpop.f32.mrb[5].mxu0 }
 0x181   :  { %v1823_v6 = vmul.f32 0.2, %v1064_v58  ;;  %1361 = vmatmul.mubr.bf16.gmra.mrb[120].mxu1 %v8901_v52  ;;  %4018 = vmatmul.mubr.bf16.gmra.mrb[72].mxu0 %v9008_v47  ;;  %v2071_v30 = vmax.f32 %v1060_v35, %v1815_v17  ;;  %v1428_v11 = vadd.f32 %v1427_v7, %v8997_v9  ;;  %v1429_v59 = vpop.f32.mrb[6].mxu0  ;;  %v9024_v47 = vpack.c.bf16 %v2036_v57, %v2028_v18  ;;  %v8173_v35 = vld [vmem:[#allocation7 + $0x2c0] ss:$16 sps:$4 sm:$0xff]  }
 0x182   :  { %v1824_v14 = vmul.f32 0.2, %v1066_v41  ;;  %1370 = vmatprep.mubr.bf16.mxu1 %v8903_v53  ;;  %4167 = vmatpush1.bf16.msra.mxu0 %v8161_v16  ;;  %10348 = vst [vmem:[#allocation24_spill] sm:$0xff] %v9020_v29  ;;  %v2072_v54 = vmax.f32 %v1062_v39, %v1816_v31  ;;  %v1787_v53 = vmul.f32 0.2, %v1426_v48  ;;  %v1430_v16 = vadd.f32 %v1429_v59, %v8993_v49  ;;  %v1431_v10 = vpop.f32.mrb[7].mxu0 }
 0x183   :  { %v2079_v8 = vmax.f32 %v1064_v58, %v1823_v6  ;;  %4168 = vmatprep.subr.bf16.mxu0 %v8169_v44  ;;  %10349 = vst [vmem:[#allocation25_spill] sm:$0xff] %v9024_v47  ;;  %v1788_v44 = vmul.f32 0.2, %v1428_v11  ;;  %v1432_v17 = vadd.f32 %v1431_v10, %v8997_v9 }
 0x184   :  { %v2080_v27 = vmax.f32 %v1066_v41, %v1824_v14  ;;  %v1069_v22 = vpop.f32.mrb[16].mxu1  ;;  %v8181_v41 = vld [vmem:[#allocation7 + $0x2e4] ss:$16 sps:$4 sm:$0xff]   ;;  %v2043_v39 = vmax.f32 %v1426_v48, %v1787_v53  ;;  %v1795_v31 = vmul.f32 0.2, %v1430_v16 }
 0x185   :  { %v1070_v34 = vadd.f32 %v1069_v22, %v8959_v4  ;;  %v1071_v13 = vpop.f32.mrb[17].mxu1  ;;  %v9028_v29 = vpack.c.bf16 %v2079_v8, %v2071_v30  ;;  %v2044_v7 = vmax.f32 %v1428_v11, %v1788_v44  ;;  %v1796_v30 = vmul.f32 0.2, %v1432_v17 }
 0x186   :  { %v1072_v58 = vadd.f32 %v1071_v13, %v8963_v5  ;;  %v1073_v18 = vpop.f32.mrb[18].mxu1  ;;  %v9032_v6 = vpack.c.bf16 %v2080_v27, %v2072_v54  ;;  %4169 = vmatpush1.bf16.msra.mxu0 %v8167_v28  ;;  %v2051_v10 = vmax.f32 %v1430_v16, %v1795_v31  ;;  %v1435_v28 = vpop.f32.mrb[8].mxu0  ;;  %v8187_v16 = vld [vmem:[#allocation7 + $0x304] ss:$16 sps:$4 sm:$0xff]  }
 0x187   :  { %10350 = vst [vmem:[#allocation26_spill] sm:$0xff] %v9028_v29  ;;  %v1831_v57 = vmul.f32 0.2, %v1070_v34  ;;  %v1074_v14 = vadd.f32 %v1073_v18, %v8959_v4  ;;  %v1075_v22 = vpop.f32.mrb[19].mxu1  ;;  %4170 = vmatprep.subr.bf16.mxu0 %v8175_v38  ;;  %v2052_v53 = vmax.f32 %v1432_v17, %v1796_v30  ;;  %v8179_v38 = vld [vmem:[#allocation7 + $0x2e0] ss:$16 sps:$4 sm:$0xff]   ;;  %v1436_v11 = vadd.f32 %v1435_v28, %v8993_v49 }
 0x188   :  { %10351 = vst [vmem:[#allocation27_spill] sm:$0xff] %v9032_v6  ;;  %v1832_v8 = vmul.f32 0.2, %v1072_v58  ;;  %v1076_v59 = vadd.f32 %v1075_v22, %v8963_v5  ;;  %4027 = vmatprep.mubr.bf16.mxu0 %v9032_v6  ;;  %v1437_v54 = vpop.f32.mrb[9].mxu0  ;;  %v9041_v27 = vpack.c.bf16 %v2051_v10, %v2043_v39 }
 0x189   :  { %v1839_v13 = vmul.f32 0.2, %v1074_v14  ;;  %1371 = vmatmul.mubr.bf16.gmra.mrb[124].mxu1 %v8909_v56  ;;  %4028 = vmatmul.mubr.bf16.gmra.mrb[76].mxu0 %v9028_v29  ;;  %v2087_v44 = vmax.f32 %v1070_v34, %v1831_v57  ;;  %v1438_v31 = vadd.f32 %v1437_v54, %v8997_v9  ;;  %v1439_v22 = vpop.f32.mrb[10].mxu0  ;;  %v9044_v47 = vpack.c.bf16 %v2052_v53, %v2044_v7 }
 0x18a   :  { %v1840_v48 = vmul.f32 0.2, %v1076_v59  ;;  %1606 = vmatprep.mubr.bf16.mxu1 %v8783_v21  ;;  %4171 = vmatpush1.bf16.msra.mxu0 %v8173_v35  ;;  %10352 = vst [vmem:[#allocation28_spill] sm:$0xff] %v9041_v27  ;;  %v2088_v17 = vmax.f32 %v1072_v58, %v1832_v8  ;;  %v8140_v21 = vld [vmem:[#allocation7 + $0x8] ss:$16 sps:$4 sm:$0xff]   ;;  %v1440_v6 = vadd.f32 %v1439_v22, %v8993_v49  ;;  %v1441_v28 = vpop.f32.mrb[11].mxu0 }
 0x18b   :  { %v2095_v18 = vmax.f32 %v1074_v14, %v1839_v13  ;;  %4172 = vmatprep.subr.bf16.mxu0 %v8181_v41  ;;  %10353 = vst [vmem:[#allocation29_spill] sm:$0xff] %v9044_v47  ;;  %v1803_v35 = vmul.f32 0.2, %v1436_v11  ;;  %v8148_v41 = vld [vmem:[#allocation7 + $0x2c] ss:$16 sps:$4 sm:$0xff]   ;;  %v1442_v14 = vadd.f32 %v1441_v28, %v8997_v9 }
 0x18c   :  { %v2096_v30 = vmax.f32 %v1076_v59, %v1840_v48  ;;  %v1079_v29 = vpop.f32.mrb[20].mxu1  ;;  %v1804_v57 = vmul.f32 0.2, %v1438_v31  ;;  %v8185_v8 = vld [vmem:[#allocation7 + $0x300] ss:$16 sps:$4 sm:$0xff]  }
 0x18d   :  { %v1080_v39 = vadd.f32 %v1079_v29, %v8959_v4  ;;  %v1081_v10 = vpop.f32.mrb[21].mxu1  ;;  %v9048_v34 = vpack.c.bf16 %v2095_v18, %v2087_v44  ;;  %v2059_v59 = vmax.f32 %v1436_v11, %v1803_v35  ;;  %v1811_v53 = vmul.f32 0.2, %v1440_v6  ;;  %v8193_v28 = vld [vmem:[#allocation7 + $0x324] ss:$16 sps:$4 sm:$0xff]   ;;  %v1445_v11 = vpop.f32.mrb[12].mxu0 }
 0x18e   :  { %v1082_v7 = vadd.f32 %v1081_v10, %v8963_v5  ;;  %v1083_v13 = vpop.f32.mrb[22].mxu1  ;;  %v9052_v58 = vpack.c.bf16 %v2096_v30, %v2088_v17  ;;  %4173 = vmatpush1.bf16.msra.mxu0 %v8179_v38  ;;  %v2060_v44 = vmax.f32 %v1438_v31, %v1804_v57  ;;  %v1812_v18 = vmul.f32 0.2, %v1442_v14  ;;  %v1447_v57 = vpop.f32.mrb[13].mxu0  ;;  %v8196_v47 = vld [vmem:[#allocation7 + $0x344] ss:$16 sps:$4 sm:$0xff]  }
 0x18f   :  { %v1847_v48 = vmul.f32 0.2, %v1080_v39  ;;  %v1084_v54 = vadd.f32 %v1083_v13, %v8959_v4  ;;  %v1085_v29 = vpop.f32.mrb[23].mxu1  ;;  %4174 = vmatprep.subr.bf16.mxu0 %v8187_v16  ;;  %v2067_v10 = vmax.f32 %v1440_v6, %v1811_v53  ;;  %v8146_v16 = vld [vmem:[#allocation7 + $0x28] ss:$16 sps:$4 sm:$0xff]   ;;  %v1446_v31 = vadd.f32 %v1445_v11, %v8993_v49 }
 0x190   :  { %v1848_v22 = vmul.f32 0.2, %v1082_v7  ;;  %v1086_v27 = vadd.f32 %v1085_v29, %v8963_v5  ;;  %4037 = vmatprep.mubr.bf16.mxu0 %v9052_v58  ;;  %v2068_v38 = vmax.f32 %v1442_v14, %v1812_v18  ;;  %v8154_v6 = vld [vmem:[#allocation7 + $0x4c] ss:$16 sps:$4 sm:$0xff]   ;;  %v1448_v53 = vadd.f32 %v1447_v57, %v8997_v9  ;;  %v1449_v14 = vpop.f32.mrb[14].mxu0 }
 0x191   :  { %v1855_v17 = vmul.f32 0.2, %v1084_v54  ;;  %1607 = vmatmul.mubr.bf16.vlgmr.msra.gmra.mrb[128].mxu1 %v8787_v63  ;;  %4038 = vmatmul.mubr.bf16.gmra.mrb[80].mxu0 %v9048_v34  ;;  %v2103_v30 = vmax.f32 %v1080_v39, %v1847_v48  ;;  %v9061_v13 = vpack.c.bf16 %v2067_v10, %v2059_v59  ;;  %v8191_v63 = vld [vmem:[#allocation7 + $0x320] ss:$16 sps:$4 sm:$0xff]   ;;  %v1819_v11 = vmul.f32 0.2, %v1446_v31 }
 0x192   :  { %v1856_v35 = vmul.f32 0.2, %v1086_v27  ;;  %4738 = vmatpush1.bf16.msra.mxu1 %v8140_v21  ;;  %1616 = vmatprep.mubr.bf16.mxu1 %v8789_v1  ;;  %v9064_v18 = vpack.c.bf16 %v2068_v38, %v2060_v44  ;;  %v2104_v39 = vmax.f32 %v1082_v7, %v1848_v22  ;;  %v8152_v1 = vld [vmem:[#allocation7 + $0x48] ss:$16 sps:$4 sm:$0xff]   ;;  %v1450_v59 = vadd.f32 %v1449_v14, %v8993_v49  ;;  %v1451_v10 = vpop.f32.mrb[15].mxu0 }
 0x193   :  { %10354 = vst [vmem:[#allocation30_spill] sm:$0xff] %v9061_v13  ;;  %v2111_v29 = vmax.f32 %v1084_v54, %v1855_v17  ;;  %4739 = vmatprep.subr.bf16.mxu1 %v8148_v41  ;;  %4175 = vmatpush1.bf16.msra.mxu0 %v8185_v8  ;;  %v8160_v17 = vld [vmem:[#allocation7 + $0x6c] ss:$16 sps:$4 sm:$0xff]   ;;  %v1820_v57 = vmul.f32 0.2, %v1448_v53  ;;  %v1452_v44 = vadd.f32 %v1451_v10, %v8997_v9 }
 0x194   :  { %10355 = vst [vmem:[#allocation31_spill] sm:$0xff] %v9064_v18  ;;  %v2112_v21 = vmax.f32 %v1086_v27, %v1856_v35  ;;  %v1089_v48 = vpop.f32.mrb[24].mxu1  ;;  %4176 = vmatprep.subr.bf16.mxu0 %v8193_v28  ;;  %v8194_v28 = vld [vmem:[#allocation7 + $0x340] ss:$16 sps:$4 sm:$0xff]   ;;  %v2075_v38 = vmax.f32 %v1446_v31, %v1819_v11  ;;  %v1827_v35 = vmul.f32 0.2, %v1450_v59 }
 0x195   :  { %v1090_v41 = vadd.f32 %v1089_v48, %v8959_v4  ;;  %v1091_v54 = vpop.f32.mrb[25].mxu1  ;;  %v9068_v8 = vpack.c.bf16 %v2111_v29, %v2103_v30  ;;  %v2076_v30 = vmax.f32 %v1448_v53, %v1820_v57  ;;  %v1828_v29 = vmul.f32 0.2, %v1452_v44  ;;  %v1455_v11 = vpop.f32.mrb[16].mxu0 }
 0x196   :  { %v1092_v7 = vadd.f32 %v1091_v54, %v8963_v5  ;;  %v1093_v27 = vpop.f32.mrb[26].mxu1  ;;  %v9072_v22 = vpack.c.bf16 %v2112_v21, %v2104_v39  ;;  %4740 = vmatpush1.bf16.msra.mxu1 %v8146_v16  ;;  %v8202_v39 = vld [vmem:[#allocation7 + $0x364] ss:$16 sps:$4 sm:$0xff]   ;;  %v2083_v21 = vmax.f32 %v1450_v59, %v1827_v35  ;;  %v1456_v53 = vadd.f32 %v1455_v11, %v8993_v49  ;;  %v1457_v57 = vpop.f32.mrb[17].mxu0  ;;  %v8166_v59 = vld [vmem:[#allocation7 + $0x8c] ss:$16 sps:$4 sm:$0xff]  }
 0x197   :  { %v1863_v14 = vmul.f32 0.2, %v1090_v41  ;;  %v1094_v13 = vadd.f32 %v1093_v27, %v8959_v4  ;;  %v1095_v48 = vpop.f32.mrb[27].mxu1  ;;  %4741 = vmatprep.subr.bf16.mxu1 %v8154_v6  ;;  %4177 = vmatpush1.bf16.msra.mxu0 %v8191_v63  ;;  %v2084_v31 = vmax.f32 %v1452_v44, %v1828_v29  ;;  %v8158_v63 = vld [vmem:[#allocation7 + $0x68] ss:$16 sps:$4 sm:$0xff]   ;;  %v1458_v35 = vadd.f32 %v1457_v57, %v8997_v9  ;;  %v1459_v44 = vpop.f32.mrb[18].mxu0 }
 0x198   :  { %v1864_v18 = vmul.f32 0.2, %v1092_v7  ;;  %v1096_v10 = vadd.f32 %v1095_v48, %v8963_v5  ;;  %4047 = vmatprep.mubr.bf16.mxu0 %v9072_v22  ;;  %4178 = vmatprep.subr.bf16.mxu0 %v8196_v47  ;;  %v9081_v27 = vpack.c.bf16 %v2083_v21, %v2075_v38  ;;  %v8205_v29 = vld [vmem:[#allocation7 + $0x384] ss:$16 sps:$4 sm:$0xff]   ;;  %v1835_v11 = vmul.f32 0.2, %v1456_v53 }
 0x199   :  { %v1871_v16 = vmul.f32 0.2, %v1094_v13  ;;  %1617 = vmatmul.mubr.bf16.gmra.mrb[132].mxu1 %v8799_v25  ;;  %4048 = vmatmul.mubr.bf16.gmra.mrb[84].mxu0 %v9068_v8  ;;  %v2119_v54 = vmax.f32 %v1090_v41, %v1863_v14  ;;  %v8200_v25 = vld [vmem:[#allocation7 + $0x360] ss:$16 sps:$4 sm:$0xff]   ;;  %v9084_v48 = vpack.c.bf16 %v2084_v31, %v2076_v30  ;;  %v1460_v38 = vadd.f32 %v1459_v44, %v8993_v49  ;;  %v1461_v21 = vpop.f32.mrb[19].mxu0 }
 0x19a   :  { %v1872_v6 = vmul.f32 0.2, %v1096_v10  ;;  %1626 = vmatprep.mubr.bf16.mxu1 %v8801_v26  ;;  %4742 = vmatpush1.bf16.msra.mxu1 %v8152_v1  ;;  %10356 = vst [vmem:[#allocation32_spill] sm:$0xff] %v9081_v27  ;;  %v2120_v41 = vmax.f32 %v1092_v7, %v1864_v18  ;;  %v8164_v1 = vld [vmem:[#allocation7 + $0x88] ss:$16 sps:$4 sm:$0xff]   ;;  %v1462_v30 = vadd.f32 %v1461_v21, %v8997_v9 }
 0x19b   :  { %v2127_v47 = vmax.f32 %v1094_v13, %v1871_v16  ;;  %4743 = vmatprep.subr.bf16.mxu1 %v8160_v17  ;;  %4179 = vmatpush1.bf16.msra.mxu0 %v8194_v28  ;;  %10357 = vst [vmem:[#allocation33_spill] sm:$0xff] %v9084_v48  ;;  %v8172_v16 = vld [vmem:[#allocation7 + $0xac] ss:$16 sps:$4 sm:$0xff]   ;;  %v1836_v57 = vmul.f32 0.2, %v1458_v35  ;;  %v2091_v31 = vmax.f32 %v1456_v53, %v1835_v11  ;;  %v1465_v11 = vpop.f32.mrb[20].mxu0 }
 0x19c   :  { %v2128_v14 = vmax.f32 %v1096_v10, %v1872_v6  ;;  %v1099_v26 = vpop.f32.mrb[28].mxu1  ;;  %4180 = vmatprep.subr.bf16.mxu0 %v8202_v39  ;;  %v8203_v39 = vld [vmem:[#allocation7 + $0x380] ss:$16 sps:$4 sm:$0xff]   ;;  %v1843_v6 = vmul.f32 0.2, %v1460_v38 }
 0x19d   :  { %v1100_v13 = vadd.f32 %v1099_v26, %v8959_v4  ;;  %v1101_v17 = vpop.f32.mrb[29].mxu1  ;;  %v9088_v28 = vpack.c.bf16 %v2127_v47, %v2119_v54  ;;  %v2092_v54 = vmax.f32 %v1458_v35, %v1836_v57  ;;  %v1844_v47 = vmul.f32 0.2, %v1462_v30  ;;  %v1467_v57 = vpop.f32.mrb[21].mxu0 }
 0x19e   :  { %v1102_v18 = vadd.f32 %v1101_v17, %v8963_v5  ;;  %v1103_v7 = vpop.f32.mrb[30].mxu1  ;;  %v9092_v10 = vpack.c.bf16 %v2128_v14, %v2120_v41  ;;  %4744 = vmatpush1.bf16.msra.mxu1 %v8158_v63  ;;  %v8211_v41 = vld [vmem:[#allocation7 + $0x3a4] ss:$16 sps:$4 sm:$0xff]   ;;  %v2099_v14 = vmax.f32 %v1460_v38, %v1843_v6  ;;  %v1466_v35 = vadd.f32 %v1465_v11, %v8993_v49  ;;  %v8178_v38 = vld [vmem:[#allocation7 + $0xcc] ss:$16 sps:$4 sm:$0xff]  }
 0x19f   :  { %v1879_v44 = vmul.f32 0.2, %v1100_v13  ;;  %v1104_v27 = vadd.f32 %v1103_v7, %v8959_v4  ;;  %v1105_v26 = vpop.f32.mrb[31].mxu1  ;;  %4745 = vmatprep.subr.bf16.mxu1 %v8166_v59  ;;  %4181 = vmatpush1.bf16.msra.mxu0 %v8200_v25  ;;  %v2100_v53 = vmax.f32 %v1462_v30, %v1844_v47  ;;  %v8170_v25 = vld [vmem:[#allocation7 + $0xa8] ss:$16 sps:$4 sm:$0xff]   ;;  %v1468_v6 = vadd.f32 %v1467_v57, %v8997_v9  ;;  %v1469_v30 = vpop.f32.mrb[22].mxu0 }
 0x1a0   :  { %v1880_v48 = vmul.f32 0.2, %v1102_v18  ;;  %v1106_v21 = vadd.f32 %v1105_v26, %v8963_v5  ;;  %4057 = vmatprep.mubr.bf16.mxu0 %v9092_v10  ;;  %4182 = vmatprep.subr.bf16.mxu0 %v8205_v29  ;;  %v9101_v7 = vpack.c.bf16 %v2099_v14, %v2091_v31  ;;  %v8214_v47 = vld [vmem:[#allocation7 + $0x3c4] ss:$16 sps:$4 sm:$0xff]   ;;  %v1851_v11 = vmul.f32 0.2, %v1466_v35 }
 0x1a1   :  { %v1887_v63 = vmul.f32 0.2, %v1104_v27  ;;  %1627 = vmatmul.mubr.bf16.gmra.mrb[136].mxu1 %v8805_v45  ;;  %4058 = vmatmul.mubr.bf16.gmra.mrb[88].mxu0 %v9088_v28  ;;  %v2135_v17 = vmax.f32 %v1100_v13, %v1879_v44  ;;  %v8209_v45 = vld [vmem:[#allocation7 + $0x3a0] ss:$16 sps:$4 sm:$0xff]   ;;  %v9104_v26 = vpack.c.bf16 %v2100_v53, %v2092_v54  ;;  %v1470_v31 = vadd.f32 %v1469_v30, %v8993_v49  ;;  %v1471_v14 = vpop.f32.mrb[23].mxu0 }
 0x1a2   :  { %v1888_v59 = vmul.f32 0.2, %v1106_v21  ;;  %1636 = vmatprep.mubr.bf16.mxu1 %v8807_v46  ;;  %4746 = vmatpush1.bf16.msra.mxu1 %v8164_v1  ;;  %10358 = vst [vmem:[#allocation34_spill] sm:$0xff] %v9101_v7  ;;  %v2136_v13 = vmax.f32 %v1102_v18, %v1880_v48  ;;  %v8176_v1 = vld [vmem:[#allocation7 + $0xc8] ss:$16 sps:$4 sm:$0xff]   ;;  %v1472_v54 = vadd.f32 %v1471_v14, %v8997_v9 }
 0x1a3   :  { %v2143_v29 = vmax.f32 %v1104_v27, %v1887_v63  ;;  %4747 = vmatprep.subr.bf16.mxu1 %v8172_v16  ;;  %4183 = vmatpush1.bf16.msra.mxu0 %v8203_v39  ;;  %10359 = vst [vmem:[#allocation35_spill] sm:$0xff] %v9104_v26  ;;  %v8184_v63 = vld [vmem:[#allocation7 + $0xec] ss:$16 sps:$4 sm:$0xff]   ;;  %v1852_v57 = vmul.f32 0.2, %v1468_v6  ;;  %v2107_v53 = vmax.f32 %v1466_v35, %v1851_v11  ;;  %v1475_v11 = vpop.f32.mrb[24].mxu0 }
 0x1a4   :  { %v2144_v44 = vmax.f32 %v1106_v21, %v1888_v59  ;;  %v1109_v46 = vpop.f32.mrb[32].mxu1  ;;  %4184 = vmatprep.subr.bf16.mxu0 %v8211_v41  ;;  %v8212_v41 = vld [vmem:[#allocation7 + $0x3c0] ss:$16 sps:$4 sm:$0xff]   ;;  %v1859_v59 = vmul.f32 0.2, %v1470_v31 }
 0x1a5   :  { %v1110_v27 = vadd.f32 %v1109_v46, %v8959_v4  ;;  %v1111_v16 = vpop.f32.mrb[33].mxu1  ;;  %v9108_v39 = vpack.c.bf16 %v2143_v29, %v2135_v17  ;;  %v2108_v17 = vmax.f32 %v1468_v6, %v1852_v57  ;;  %v1860_v29 = vmul.f32 0.2, %v1472_v54  ;;  %v1477_v57 = vpop.f32.mrb[25].mxu0 }
 0x1a6   :  { %v1112_v48 = vadd.f32 %v1111_v16, %v8963_v5  ;;  %v1113_v18 = vpop.f32.mrb[34].mxu1  ;;  %v9112_v21 = vpack.c.bf16 %v2144_v44, %v2136_v13  ;;  %4748 = vmatpush1.bf16.msra.mxu1 %v8170_v25  ;;  %v8220_v13 = vld [vmem:[#allocation7 + $0x3e4] ss:$16 sps:$4 sm:$0xff]   ;;  %v2115_v44 = vmax.f32 %v1470_v31, %v1859_v59  ;;  %v1476_v6 = vadd.f32 %v1475_v11, %v8993_v49  ;;  %v8190_v31 = vld [vmem:[#allocation7 + $0x10c] ss:$16 sps:$4 sm:$0xff]  }
 0x1a7   :  { %v1895_v30 = vmul.f32 0.2, %v1110_v27  ;;  %v1114_v7 = vadd.f32 %v1113_v18, %v8959_v4  ;;  %v1115_v46 = vpop.f32.mrb[35].mxu1  ;;  %4749 = vmatprep.subr.bf16.mxu1 %v8178_v38  ;;  %4185 = vmatpush1.bf16.msra.mxu0 %v8209_v45  ;;  %v2116_v35 = vmax.f32 %v1472_v54, %v1860_v29  ;;  %v8182_v45 = vld [vmem:[#allocation7 + $0xe8] ss:$16 sps:$4 sm:$0xff]   ;;  %v1478_v59 = vadd.f32 %v1477_v57, %v8997_v9  ;;  %v1479_v54 = vpop.f32.mrb[26].mxu0 }
 0x1a8   :  { %v1896_v26 = vmul.f32 0.2, %v1112_v48  ;;  %v1116_v14 = vadd.f32 %v1115_v46, %v8963_v5  ;;  %4067 = vmatprep.mubr.bf16.mxu0 %v9112_v21  ;;  %4186 = vmatprep.subr.bf16.mxu0 %v8214_v47  ;;  %v9121_v18 = vpack.c.bf16 %v2115_v44, %v2107_v53  ;;  %v8235_v29 = vld [vmem:[#allocation7 + $0x404] ss:$16 sps:$4 sm:$0xff]   ;;  %v1480_v11 = vadd.f32 %v1479_v54, %v8993_v49  ;;  %v1481_v53 = vpop.f32.mrb[27].mxu0 }
 0x1a9   :  { %v1903_v25 = vmul.f32 0.2, %v1114_v7  ;;  %1637 = vmatmul.mubr.bf16.gmra.mrb[140].mxu1 %v8811_v0  ;;  %4068 = vmatmul.mubr.bf16.gmra.mrb[92].mxu0 %v9108_v39  ;;  %v2151_v16 = vmax.f32 %v1110_v27, %v1895_v30  ;;  %v8218_v0 = vld [vmem:[#allocation7 + $0x3e0] ss:$16 sps:$4 sm:$0xff]   ;;  %v9124_v46 = vpack.c.bf16 %v2116_v35, %v2108_v17  ;;  %v1482_v57 = vadd.f32 %v1481_v53, %v8997_v9 }
 0x1aa   :  { %v1904_v38 = vmul.f32 0.2, %v1116_v14  ;;  %1646 = vmatprep.mubr.bf16.mxu1 %v8813_v2  ;;  %4750 = vmatpush1.bf16.msra.mxu1 %v8176_v1  ;;  %10360 = vst [vmem:[#allocation36_spill] sm:$0xff] %v9121_v18  ;;  %v2152_v27 = vmax.f32 %v1112_v48, %v1896_v26  ;;  %v1867_v1 = vmul.f32 0.2, %v1476_v6 }
 0x1ab   :  { %v2159_v47 = vmax.f32 %v1114_v7, %v1903_v25  ;;  %4751 = vmatprep.subr.bf16.mxu1 %v8184_v63  ;;  %4187 = vmatpush1.bf16.msra.mxu0 %v8212_v41  ;;  %10361 = vst [vmem:[#allocation37_spill] sm:$0xff] %v9124_v46  ;;  %v8188_v41 = vld [vmem:[#allocation7 + $0x108] ss:$16 sps:$4 sm:$0xff]   ;;  %v1868_v25 = vmul.f32 0.2, %v1478_v59 }
 0x1ac   :  { %v2160_v30 = vmax.f32 %v1116_v14, %v1904_v38  ;;  %v1119_v2 = vpop.f32.mrb[36].mxu1  ;;  %4188 = vmatprep.subr.bf16.mxu0 %v8220_v13  ;;  %v8199_v14 = vld [vmem:[#allocation7 + $0x12c] ss:$16 sps:$4 sm:$0xff]   ;;  %v2123_v13 = vmax.f32 %v1476_v6, %v1867_v1  ;;  %v1875_v35 = vmul.f32 0.2, %v1480_v11  ;;  %v1485_v6 = vpop.f32.mrb[28].mxu0 }
 0x1ad   :  { %v1120_v7 = vadd.f32 %v1119_v2, %v8959_v4  ;;  %v1121_v63 = vpop.f32.mrb[37].mxu1  ;;  %v9128_v44 = vpack.c.bf16 %v2159_v47, %v2151_v16  ;;  %v2124_v16 = vmax.f32 %v1478_v59, %v1868_v25  ;;  %v1876_v47 = vmul.f32 0.2, %v1482_v57  ;;  %v1487_v59 = vpop.f32.mrb[29].mxu0 }
 0x1ae   :  { %v1122_v17 = vadd.f32 %v1121_v63, %v8963_v5  ;;  %v1123_v26 = vpop.f32.mrb[38].mxu1  ;;  %v9132_v48 = vpack.c.bf16 %v2160_v30, %v2152_v27  ;;  %4752 = vmatpush1.bf16.msra.mxu1 %v8182_v45  ;;  %v2131_v27 = vmax.f32 %v1480_v11, %v1875_v35  ;;  %v8208_v11 = vld [vmem:[#allocation7 + $0x14c] ss:$16 sps:$4 sm:$0xff]  }
 0x1af   :  { %v1911_v38 = vmul.f32 0.2, %v1120_v7  ;;  %v1124_v54 = vadd.f32 %v1123_v26, %v8959_v4  ;;  %v1125_v2 = vpop.f32.mrb[39].mxu1  ;;  %4753 = vmatprep.subr.bf16.mxu1 %v8190_v31  ;;  %4189 = vmatpush1.bf16.msra.mxu0 %v8218_v0  ;;  %v2132_v45 = vmax.f32 %v1482_v57, %v1876_v47  ;;  %v8197_v31 = vld [vmem:[#allocation7 + $0x128] ss:$16 sps:$4 sm:$0xff]   ;;  %v1486_v0 = vadd.f32 %v1485_v6, %v8993_v49  ;;  %v1489_v26 = vpop.f32.mrb[30].mxu0 }
 0x1b0   :  { %v1912_v18 = vmul.f32 0.2, %v1122_v17  ;;  %v1126_v53 = vadd.f32 %v1125_v2, %v8963_v5  ;;  %4077 = vmatprep.mubr.bf16.mxu0 %v9132_v48  ;;  %4351 = vmatprep.subr.bf16.mxu0 %v8235_v29  ;;  %v9141_v63 = vpack.c.bf16 %v2131_v27, %v2123_v13  ;;  %v1491_v46 = vpop.f32.mrb[31].mxu0 }
 0x1b1   :  { %v1919_v30 = vmul.f32 0.2, %v1124_v54  ;;  %1647 = vmatmul.mubr.bf16.gmra.mrb[144].mxu1 %v8819_v23  ;;  %4078 = vmatmul.mubr.bf16.gmra.mrb[96].mxu0 %v9128_v44  ;;  %v2167_v25 = vmax.f32 %v1120_v7, %v1911_v38  ;;  %v1488_v23 = vadd.f32 %v1487_v59, %v8997_v9  ;;  %v9144_v35 = vpack.c.bf16 %v2132_v45, %v2124_v16  ;;  %v8206_v7 = vld [vmem:[#allocation7 + $0x148] ss:$16 sps:$4 sm:$0xff]  }
 0x1b2   :  { %v1920_v1 = vmul.f32 0.2, %v1126_v53  ;;  %1656 = vmatprep.mubr.bf16.mxu1 %v8821_v24  ;;  %4754 = vmatpush1.bf16.msra.mxu1 %v8188_v41  ;;  %10362 = vst [vmem:[#allocation38_spill] sm:$0xff] %v9141_v63  ;;  %v2168_v57 = vmax.f32 %v1122_v17, %v1912_v18  ;;  %v1883_v24 = vmul.f32 0.2, %v1486_v0  ;;  %v1490_v41 = vadd.f32 %v1489_v26, %v8993_v49 }
 0x1b3   :  { %v2175_v29 = vmax.f32 %v1124_v54, %v1919_v30  ;;  %4755 = vmatprep.subr.bf16.mxu1 %v8199_v14  ;;  %10363 = vst [vmem:[#allocation39_spill] sm:$0xff] %v9144_v35  ;;  %v1884_v14 = vmul.f32 0.2, %v1488_v23  ;;  %v1492_v38 = vadd.f32 %v1491_v46, %v8997_v9  ;;  %v8217_v18 = vld [vmem:[#allocation7 + $0x16c] ss:$16 sps:$4 sm:$0xff]  }
 0x1b4   :  { %v2176_v2 = vmax.f32 %v1126_v53, %v1920_v1  ;;  %v1129_v47 = vpop.f32.mrb[40].mxu1  ;;  %v2139_v17 = vmax.f32 %v1486_v0, %v1883_v24  ;;  %v1891_v53 = vmul.f32 0.2, %v1490_v41  ;;  %v1495_v0 = vpop.f32.mrb[32].mxu0 }
 0x1b5   :  { %v1130_v6 = vadd.f32 %v1129_v47, %v8959_v4  ;;  %v1131_v13 = vpop.f32.mrb[41].mxu1  ;;  %v9148_v27 = vpack.c.bf16 %v2175_v29, %v2167_v25  ;;  %v2140_v25 = vmax.f32 %v1488_v23, %v1884_v14  ;;  %v1892_v29 = vmul.f32 0.2, %v1492_v38 }
 0x1b6   :  { %v1132_v54 = vadd.f32 %v1131_v13, %v8963_v5  ;;  %v1133_v16 = vpop.f32.mrb[42].mxu1  ;;  %v9152_v30 = vpack.c.bf16 %v2176_v2, %v2168_v57  ;;  %4756 = vmatpush1.bf16.msra.mxu1 %v8197_v31  ;;  %v2147_v46 = vmax.f32 %v1490_v41, %v1891_v53  ;;  %v1496_v23 = vadd.f32 %v1495_v0, %v8993_v49  ;;  %v1497_v2 = vpop.f32.mrb[33].mxu0  ;;  %v8223_v41 = vld [vmem:[#allocation7 + $0x18c] ss:$16 sps:$4 sm:$0xff]  }
 0x1b7   :  { %v1927_v45 = vmul.f32 0.2, %v1130_v6  ;;  %v1134_v1 = vadd.f32 %v1133_v16, %v8959_v4  ;;  %v1135_v59 = vpop.f32.mrb[43].mxu1  ;;  %4757 = vmatprep.subr.bf16.mxu1 %v8208_v11  ;;  %v2148_v31 = vmax.f32 %v1492_v38, %v1892_v29  ;;  %v8215_v11 = vld [vmem:[#allocation7 + $0x168] ss:$16 sps:$4 sm:$0xff]   ;;  %v1499_v53 = vpop.f32.mrb[34].mxu0 }
 0x1b8   :  { %v1928_v26 = vmul.f32 0.2, %v1132_v54  ;;  %v1136_v47 = vadd.f32 %v1135_v59, %v8963_v5  ;;  %4087 = vmatprep.mubr.bf16.mxu0 %v9152_v30  ;;  %v9161_v24 = vpack.c.bf16 %v2147_v46, %v2139_v17  ;;  %v1501_v35 = vpop.f32.mrb[35].mxu0 }
 0x1b9   :  { %v1935_v13 = vmul.f32 0.2, %v1134_v1  ;;  %1657 = vmatmul.mubr.bf16.gmra.mrb[148].mxu1 %v8827_v42  ;;  %4088 = vmatmul.mubr.bf16.gmra.mrb[100].mxu0 %v9148_v27  ;;  %v2183_v14 = vmax.f32 %v1130_v6, %v1927_v45  ;;  %v1498_v42 = vadd.f32 %v1497_v2, %v8997_v9  ;;  %v9164_v59 = vpack.c.bf16 %v2148_v31, %v2140_v25  ;;  %v8221_v6 = vld [vmem:[#allocation7 + $0x188] ss:$16 sps:$4 sm:$0xff]  }
 0x1ba   :  { %v1936_v57 = vmul.f32 0.2, %v1136_v47  ;;  %1666 = vmatprep.mubr.bf16.mxu1 %v8829_v43  ;;  %4758 = vmatpush1.bf16.msra.mxu1 %v8206_v7  ;;  %10364 = vst [vmem:[#allocation40_spill] sm:$0xff] %v9161_v24  ;;  %v2184_v38 = vmax.f32 %v1132_v54, %v1928_v26  ;;  %v1899_v43 = vmul.f32 0.2, %v1496_v23  ;;  %v1500_v7 = vadd.f32 %v1499_v53, %v8993_v49 }
 0x1bb   :  { %v2191_v16 = vmax.f32 %v1134_v1, %v1935_v13  ;;  %4759 = vmatprep.subr.bf16.mxu1 %v8217_v18  ;;  %10365 = vst [vmem:[#allocation41_spill] sm:$0xff] %v9164_v59  ;;  %v1900_v18 = vmul.f32 0.2, %v1498_v42  ;;  %v1502_v45 = vadd.f32 %v1501_v35, %v8997_v9  ;;  %v8226_v54 = vld [vmem:[#allocation7 + $0x1ac] ss:$16 sps:$4 sm:$0xff]  }
 0x1bc   :  { %v2192_v29 = vmax.f32 %v1136_v47, %v1936_v57  ;;  %v1139_v63 = vpop.f32.mrb[44].mxu1  ;;  %v2155_v26 = vmax.f32 %v1496_v23, %v1899_v43  ;;  %v1907_v47 = vmul.f32 0.2, %v1500_v7  ;;  %v1505_v23 = vpop.f32.mrb[36].mxu0 }
 0x1bd   :  { %v1140_v0 = vadd.f32 %v1139_v63, %v8959_v4  ;;  %v1141_v17 = vpop.f32.mrb[45].mxu1  ;;  %v9168_v46 = vpack.c.bf16 %v2191_v16, %v2183_v14  ;;  %v2156_v2 = vmax.f32 %v1498_v42, %v1900_v18  ;;  %v1908_v14 = vmul.f32 0.2, %v1502_v45 }
 0x1be   :  { %v1142_v1 = vadd.f32 %v1141_v17, %v8963_v5  ;;  %v1143_v25 = vpop.f32.mrb[46].mxu1  ;;  %v9172_v13 = vpack.c.bf16 %v2192_v29, %v2184_v38  ;;  %4760 = vmatpush1.bf16.msra.mxu1 %v8215_v11  ;;  %v2163_v35 = vmax.f32 %v1500_v7, %v1907_v47  ;;  %v1506_v42 = vadd.f32 %v1505_v23, %v8993_v49  ;;  %v1507_v29 = vpop.f32.mrb[37].mxu0  ;;  %v8229_v7 = vld [vmem:[#allocation7 + $0x1cc] ss:$16 sps:$4 sm:$0xff]  }
 0x1bf   :  { %v1943_v31 = vmul.f32 0.2, %v1140_v0  ;;  %v1144_v57 = vadd.f32 %v1143_v25, %v8959_v4  ;;  %v1145_v63 = vpop.f32.mrb[47].mxu1  ;;  %4761 = vmatprep.subr.bf16.mxu1 %v8223_v41  ;;  %v2164_v11 = vmax.f32 %v1502_v45, %v1908_v14  ;;  %v8224_v41 = vld [vmem:[#allocation7 + $0x1a8] ss:$16 sps:$4 sm:$0xff]   ;;  %v1509_v47 = vpop.f32.mrb[38].mxu0 }
 0x1c0   :  { %v1944_v16 = vmul.f32 0.2, %v1142_v1  ;;  %v1146_v53 = vadd.f32 %v1145_v63, %v8963_v5  ;;  %4097 = vmatprep.mubr.bf16.mxu0 %v9172_v13  ;;  %v9181_v43 = vpack.c.bf16 %v2163_v35, %v2155_v26  ;;  %v1511_v59 = vpop.f32.mrb[39].mxu0 }
 0x1c1   :  { %v1951_v17 = vmul.f32 0.2, %v1144_v57  ;;  %1667 = vmatmul.mubr.bf16.gmra.mrb[152].mxu1 %v8835_v60  ;;  %4098 = vmatmul.mubr.bf16.gmra.mrb[104].mxu0 %v9168_v46  ;;  %v2199_v18 = vmax.f32 %v1140_v0, %v1943_v31  ;;  %v1508_v60 = vadd.f32 %v1507_v29, %v8997_v9  ;;  %v9184_v63 = vpack.c.bf16 %v2164_v11, %v2156_v2  ;;  %v8227_v0 = vld [vmem:[#allocation7 + $0x1c8] ss:$16 sps:$4 sm:$0xff]  }
 0x1c2   :  { %v1952_v38 = vmul.f32 0.2, %v1146_v53  ;;  %1676 = vmatprep.mubr.bf16.mxu1 %v8837_v61  ;;  %4762 = vmatpush1.bf16.msra.mxu1 %v8221_v6  ;;  %10366 = vst [vmem:[#allocation42_spill] sm:$0xff] %v9181_v43  ;;  %v2200_v45 = vmax.f32 %v1142_v1, %v1944_v16  ;;  %v1915_v61 = vmul.f32 0.2, %v1506_v42  ;;  %v1510_v6 = vadd.f32 %v1509_v47, %v8993_v49 }
 0x1c3   :  { %v2207_v25 = vmax.f32 %v1144_v57, %v1951_v17  ;;  %4763 = vmatprep.subr.bf16.mxu1 %v8226_v54  ;;  %10367 = vst [vmem:[#allocation43_spill] sm:$0xff] %v9184_v63  ;;  %v1916_v54 = vmul.f32 0.2, %v1508_v60  ;;  %v1512_v31 = vadd.f32 %v1511_v59, %v8997_v9  ;;  %v8232_v1 = vld [vmem:[#allocation7 + $0x1ec] ss:$16 sps:$4 sm:$0xff]  }
 0x1c4   :  { %v2208_v14 = vmax.f32 %v1146_v53, %v1952_v38  ;;  %v1149_v24 = vpop.f32.mrb[48].mxu1  ;;  %v2171_v16 = vmax.f32 %v1506_v42, %v1915_v61  ;;  %v1923_v53 = vmul.f32 0.2, %v1510_v6  ;;  %v1515_v42 = vpop.f32.mrb[40].mxu0 }
 0x1c5   :  { %v1150_v23 = vadd.f32 %v1149_v24, %v8959_v4  ;;  %v1151_v26 = vpop.f32.mrb[49].mxu1  ;;  %v9188_v35 = vpack.c.bf16 %v2207_v25, %v2199_v18  ;;  %v2172_v29 = vmax.f32 %v1508_v60, %v1916_v54  ;;  %v1924_v18 = vmul.f32 0.2, %v1512_v31 }
 0x1c6   :  { %v1152_v57 = vadd.f32 %v1151_v26, %v8963_v5  ;;  %v1153_v2 = vpop.f32.mrb[50].mxu1  ;;  %v9192_v17 = vpack.c.bf16 %v2208_v14, %v2200_v45  ;;  %4764 = vmatpush1.bf16.msra.mxu1 %v8224_v41  ;;  %v2179_v59 = vmax.f32 %v1510_v6, %v1923_v53  ;;  %v1516_v60 = vadd.f32 %v1515_v42, %v8993_v49  ;;  %v1517_v14 = vpop.f32.mrb[41].mxu0  ;;  %v8238_v6 = vld [vmem:[#allocation7 + $0x20c] ss:$16 sps:$4 sm:$0xff]  }
 0x1c7   :  { %v1959_v11 = vmul.f32 0.2, %v1150_v23  ;;  %v1154_v38 = vadd.f32 %v1153_v2, %v8959_v4  ;;  %v1155_v24 = vpop.f32.mrb[51].mxu1  ;;  %4765 = vmatprep.subr.bf16.mxu1 %v8229_v7  ;;  %v2180_v41 = vmax.f32 %v1512_v31, %v1924_v18  ;;  %v8230_v7 = vld [vmem:[#allocation7 + $0x1e8] ss:$16 sps:$4 sm:$0xff]   ;;  %v1519_v53 = vpop.f32.mrb[42].mxu0 }
 0x1c8   :  { %v1960_v25 = vmul.f32 0.2, %v1152_v57  ;;  %v1156_v47 = vadd.f32 %v1155_v24, %v8963_v5  ;;  %4107 = vmatprep.mubr.bf16.mxu0 %v9192_v17  ;;  %v9201_v61 = vpack.c.bf16 %v2179_v59, %v2171_v16  ;;  %v1521_v63 = vpop.f32.mrb[43].mxu0 }
 0x1c9   :  { %v1967_v26 = vmul.f32 0.2, %v1154_v38  ;;  %1677 = vmatmul.mubr.bf16.gmra.mrb[156].mxu1 %v8843_v19  ;;  %4108 = vmatmul.mubr.bf16.gmra.mrb[108].mxu0 %v9188_v35  ;;  %v2215_v54 = vmax.f32 %v1150_v23, %v1959_v11  ;;  %v1518_v19 = vadd.f32 %v1517_v14, %v8997_v9  ;;  %v9204_v24 = vpack.c.bf16 %v2180_v41, %v2172_v29 }
 0x1ca   :  { %v1968_v45 = vmul.f32 0.2, %v1156_v47  ;;  %1686 = vmatprep.mubr.bf16.mxu1 %v8845_v20  ;;  %4766 = vmatpush1.bf16.msra.mxu1 %v8227_v0  ;;  %10368 = vst [vmem:[#allocation44_spill] sm:$0xff] %v9201_v61  ;;  %v2216_v31 = vmax.f32 %v1152_v57, %v1960_v25  ;;  %v1931_v20 = vmul.f32 0.2, %v1516_v60  ;;  %v1520_v0 = vadd.f32 %v1519_v53, %v8993_v49 }
 0x1cb   :  { %v2223_v2 = vmax.f32 %v1154_v38, %v1967_v26  ;;  %4767 = vmatprep.subr.bf16.mxu1 %v8232_v1  ;;  %10369 = vst [vmem:[#allocation45_spill] sm:$0xff] %v9204_v24  ;;  %v1932_v23 = vmul.f32 0.2, %v1518_v19  ;;  %v1522_v1 = vadd.f32 %v1521_v63, %v8997_v9 }
 0x1cc   :  { %v2224_v18 = vmax.f32 %v1156_v47, %v1968_v45  ;;  %v1159_v43 = vpop.f32.mrb[52].mxu1  ;;  %v2187_v57 = vmax.f32 %v1516_v60, %v1931_v20  ;;  %v1939_v25 = vmul.f32 0.2, %v1520_v0  ;;  %v1525_v60 = vpop.f32.mrb[44].mxu0 }
 0x1cd   :  { %v1160_v42 = vadd.f32 %v1159_v43, %v8959_v4  ;;  %v1161_v16 = vpop.f32.mrb[53].mxu1  ;;  %v9208_v59 = vpack.c.bf16 %v2223_v2, %v2215_v54  ;;  %v2188_v43 = vmax.f32 %v1518_v19, %v1932_v23  ;;  %v1940_v45 = vmul.f32 0.2, %v1522_v1  ;;  %v1527_v19 = vpop.f32.mrb[45].mxu0 }
 0x1ce   :  { %v1162_v11 = vadd.f32 %v1161_v16, %v8963_v5  ;;  %v1163_v38 = vpop.f32.mrb[54].mxu1  ;;  %v9212_v29 = vpack.c.bf16 %v2224_v18, %v2216_v31  ;;  %4768 = vmatpush1.bf16.msra.mxu1 %v8230_v7  ;;  %v2195_v63 = vmax.f32 %v1520_v0, %v1939_v25  ;;  %v1528_v16 = vadd.f32 %v1527_v19, %v8997_v9  ;;  %v1529_v0 = vpop.f32.mrb[46].mxu0 }
 0x1cf   :  { %v1975_v47 = vmul.f32 0.2, %v1160_v42  ;;  %v1164_v26 = vadd.f32 %v1163_v38, %v8959_v4  ;;  %v1165_v41 = vpop.f32.mrb[55].mxu1  ;;  %4930 = vmatprep.subr.bf16.mxu1 %v8238_v6  ;;  %v2196_v7 = vmax.f32 %v1522_v1, %v1940_v45  ;;  %v1526_v6 = vadd.f32 %v1525_v60, %v8993_v49  ;;  %v1531_v45 = vpop.f32.mrb[47].mxu0 }
 0x1d0   :  { %v1976_v14 = vmul.f32 0.2, %v1162_v11  ;;  %v1166_v54 = vadd.f32 %v1165_v41, %v8963_v5  ;;  %4117 = vmatprep.mubr.bf16.mxu0 %v9212_v29  ;;  %v9221_v31 = vpack.c.bf16 %v2195_v63, %v2187_v57  ;;  %v1530_v41 = vadd.f32 %v1529_v0, %v8993_v49 }
 0x1d1   :  { %v1983_v2 = vmul.f32 0.2, %v1164_v26  ;;  %1687 = vmatmul.mubr.bf16.gmra.mrb[160].mxu1 %v8853_v36  ;;  %4118 = vmatmul.mubr.bf16.gmra.mrb[112].mxu0 %v9208_v59  ;;  %v2231_v18 = vmax.f32 %v1160_v42, %v1975_v47  ;;  %v9224_v23 = vpack.c.bf16 %v2196_v7, %v2188_v43  ;;  %v1947_v1 = vmul.f32 0.2, %v1526_v6 }
 0x1d2   :  { %v1984_v53 = vmul.f32 0.2, %v1166_v54  ;;  %1696 = vmatprep.mubr.bf16.mxu1 %v8855_v37  ;;  %10370 = vst [vmem:[#allocation46_spill] sm:$0xff] %v9221_v31  ;;  %v2232_v36 = vmax.f32 %v1162_v11, %v1976_v14  ;;  %v1948_v57 = vmul.f32 0.2, %v1528_v16  ;;  %v1532_v42 = vadd.f32 %v1531_v45, %v8997_v9 }
 0x1d3   :  { %v2239_v20 = vmax.f32 %v1164_v26, %v1983_v2  ;;  %10371 = vst [vmem:[#allocation47_spill] sm:$0xff] %v9224_v23  ;;  %v2203_v11 = vmax.f32 %v1526_v6, %v1947_v1  ;;  %v1955_v14 = vmul.f32 0.2, %v1530_v41  ;;  %v1535_v6 = vpop.f32.mrb[48].mxu0 }
 0x1d4   :  { %v2240_v38 = vmax.f32 %v1166_v54, %v1984_v53  ;;  %v1169_v25 = vpop.f32.mrb[56].mxu1  ;;  %v2204_v7 = vmax.f32 %v1528_v16, %v1948_v57  ;;  %v1956_v53 = vmul.f32 0.2, %v1532_v42  ;;  %v9242_v16 = vadd.f32 %v1535_v6, %v8993_v49  ;;  %v1537_v1 = vpop.f32.mrb[49].mxu0 }
 0x1d5   :  { %v1170_v37 = vadd.f32 %v1169_v25, %v8959_v4  ;;  %v1171_v60 = vpop.f32.mrb[57].mxu1  ;;  %v9228_v61 = vpack.c.bf16 %v2239_v20, %v2231_v18  ;;  %v2211_v20 = vmax.f32 %v1530_v41, %v1955_v14  ;;  %v1538_v57 = vadd.f32 %v1537_v1, %v8997_v9 }
 0x1d6   :  { %v1172_v47 = vadd.f32 %v1171_v60, %v8963_v5  ;;  %v1173_v26 = vpop.f32.mrb[58].mxu1  ;;  %v9232_v43 = vpack.c.bf16 %v2240_v38, %v2232_v36  ;;  %v2212_v36 = vmax.f32 %v1532_v42, %v1956_v53 }
 0x1d7   :  { %v1991_v54 = vmul.f32 0.2, %v1170_v37  ;;  %v1174_v63 = vadd.f32 %v1173_v26, %v8959_v4  ;;  %v1175_v2 = vpop.f32.mrb[59].mxu1  ;;  %v9244_v45 = vpack.c.bf16 %v2211_v20, %v2203_v11 }
 0x1d8   :  { %v1992_v19 = vmul.f32 0.2, %v1172_v47  ;;  %v1176_v18 = vadd.f32 %v1175_v2, %v8963_v5  ;;  %4127 = vmatprep.mubr.bf16.mxu0 %v9232_v43  ;;  %v9247_v26 = vpack.c.bf16 %v2212_v36, %v2204_v7 }
 0x1d9   :  { %v1999_v0 = vmul.f32 0.2, %v1174_v63  ;;  %1697 = vmatmul.mubr.bf16.gmra.mrb[164].mxu1 %v8861_v50  ;;  %4128 = vmatmul.mubr.bf16.gmra.mrb[116].mxu0 %v9228_v61  ;;  %10372 = vst [vmem:[#allocation48_spill] sm:$0xff] %v9244_v45  ;;  %v2247_v60 = vmax.f32 %v1170_v37, %v1991_v54  ;;  %v1539_v50 = vpop.f32.mrb[50].mxu0  ;;  %v1964_v37 = vmul.f32 0.2, %v1538_v57 }
 0x1da   :  { %v2000_v38 = vmul.f32 0.2, %v1176_v18  ;;  %1706 = vmatprep.mubr.bf16.mxu1 %v8863_v51  ;;  %10373 = vst [vmem:[#allocation49_spill] sm:$0xff] %v9247_v26  ;;  %v2248_v42 = vmax.f32 %v1172_v47, %v1992_v19  ;;  %v10319_v51 = vsub.s32 3, %v8942_v55  ;;  %v9251_v53 = vadd.f32 %v1539_v50, %v8993_v49  ;;  %v1541_v6 = vpop.f32.mrb[51].mxu0 }
 0x1db   :  { %v2255_v41 = vmax.f32 %v1174_v63, %v1999_v0  ;;  %v1542_v54 = vadd.f32 %v1541_v6, %v8997_v9  ;;  %v1963_v19 = vmul.f32 0.2, %v9242_v16  ;;  %v2220_v1 = vmax.f32 %v1538_v57, %v1964_v37  ;;  %v1545_v6 = vpop.f32.mrb[52].mxu0 }
 0x1dc   :  { %v2256_v14 = vmax.f32 %v1176_v18, %v2000_v38  ;;  %v1179_v2 = vpop.f32.mrb[60].mxu1  ;;  %v1971_v18 = vmul.f32 0.2, %v9251_v53 }
 0x1dd   :  { %v1180_v25 = vadd.f32 %v1179_v2, %v8959_v4  ;;  %v1181_v11 = vpop.f32.mrb[61].mxu1  ;;  %v9254_v20 = vpack.c.bf16 %v2255_v41, %v2247_v60  ;;  %v1972_v50 = vmul.f32 0.2, %v1542_v54 }
 0x1de   :  { %v1182_v63 = vadd.f32 %v1181_v11, %v8963_v5  ;;  %v1183_v7 = vpop.f32.mrb[62].mxu1  ;;  %v9258_v47 = vpack.c.bf16 %v2256_v14, %v2248_v42  ;;  %v8569_v42 = vld [vmem:[%s10274_s2] sm:$0xff]  ;;  %v10374_v14 = vsub.s32 2, %v8942_v55  ;;  %v2227_v37 = vmax.f32 %v9251_v53, %v1971_v18 }
 0x1df   :  { %v2007_v0 = vmul.f32 0.2, %v1180_v25  ;;  %v1184_v36 = vadd.f32 %v1183_v7, %v8959_v4  ;;  %v1185_v38 = vpop.f32.mrb[63].mxu1  ;;  %v9276_v57 = vrot.slane %v8569_v42, %v10319_v51  ;;  %v1546_v7 = vadd.f32 %v1545_v6, %v8993_v49 }
 0x1e0   :  { %v2008_v60 = vmul.f32 0.2, %v1182_v63  ;;  %v1186_v41 = vadd.f32 %v1185_v38, %v8963_v5  ;;  %4137 = vmatprep.mubr.bf16.mxu0 %v9258_v47  ;;  %v9272_v4 = vrot.slane %v8569_v42, %v10374_v14  ;;  %v2228_v5 = vmax.f32 %v1542_v54, %v1972_v50  ;;  %v1547_v38 = vpop.f32.mrb[53].mxu0 }
 0x1e1   :  { %v2015_v2 = vmul.f32 0.2, %v1184_v36  ;;  %1707 = vmatmul.mubr.bf16.gmra.mrb[168].mxu1 %v8869_v62  ;;  %4138 = vmatmul.mubr.bf16.gmra.mrb[120].mxu0 %v9254_v20  ;;  %v2219_v62 = vmax.f32 %v9242_v16, %v1963_v19  ;;  %v2263_v45 = vmax.f32 %v1180_v25, %v2007_v0  ;;  %v1548_v14 = vadd.f32 %v1547_v38, %v8997_v9  ;;  %v1549_v31 = vpop.f32.mrb[54].mxu0 }
 0x1e2   :  { %v2016_v11 = vmul.f32 0.2, %v1186_v41  ;;  %1716 = vmatprep.mubr.bf16.mxu1 %v8871_v3  ;;  %v9283_v23 = vpack.c.bf16 %v2228_v5, %v2220_v1  ;;  %v2264_v42 = vmax.f32 %v1182_v63, %v2008_v60  ;;  %v1979_v51 = vmul.f32 0.2, %v1546_v7  ;;  %v1551_v24 = vpop.f32.mrb[55].mxu0 }
 0x1e3   :  { %v2271_v26 = vmax.f32 %v1184_v36, %v2015_v2  ;;  %v1550_v3 = vadd.f32 %v1549_v31, %v8993_v49  ;;  %v1980_v18 = vmul.f32 0.2, %v1548_v14  ;;  %v1552_v25 = vadd.f32 %v1551_v24, %v8997_v9 }
 0x1e4   :  { %10375 = vst [vmem:[#allocation50_spill] sm:$0xff] %v9283_v23  ;;  %v2272_v54 = vmax.f32 %v1186_v41, %v2016_v11  ;;  %v1222_v50 = vpop.f32.mrb[64].mxu1  ;;  %v2235_v63 = vmax.f32 %v1546_v7, %v1979_v51  ;;  %v9296_v24 = vpack.c.bf16 %v2227_v37, %v2219_v62  ;;  %v1555_v7 = vpop.f32.mrb[56].mxu0 }
 0x1e5   :  { %v1223_v16 = vadd.f32 %v1222_v50, %v9272_v4  ;;  %v1224_v53 = vpop.f32.mrb[65].mxu1  ;;  %v9287_v19 = vpack.c.bf16 %v2271_v26, %v2263_v45  ;;  %v1987_v60 = vmul.f32 0.2, %v1550_v3  ;;  %v2236_v5 = vmax.f32 %v1548_v14, %v1980_v18 }
 0x1e6   :  { %v1225_v0 = vadd.f32 %v1224_v53, %v9276_v57  ;;  %v1226_v36 = vpop.f32.mrb[66].mxu1  ;;  %v9291_v1 = vpack.c.bf16 %v2272_v54, %v2264_v42  ;;  %v1988_v6 = vmul.f32 0.2, %v1552_v25  ;;  %10376 = vst [vmem:[#allocation51_spill] sm:$0xff] %v9296_v24  ;;  %v1556_v14 = vadd.f32 %v1555_v7, %v8993_v49  ;;  %v1557_v54 = vpop.f32.mrb[57].mxu0 }
 0x1e7   :  { %v1769_v41 = vmul.f32 0.2, %v1223_v16  ;;  %v1227_v2 = vadd.f32 %v1226_v36, %v9272_v4  ;;  %v1228_v31 = vpop.f32.mrb[67].mxu1  ;;  %v2243_v26 = vmax.f32 %v1550_v3, %v1987_v60  ;;  %v1558_v62 = vadd.f32 %v1557_v54, %v8997_v9  ;;  %v1559_v37 = vpop.f32.mrb[58].mxu0 }
 0x1e8   :  { %v1770_v11 = vmul.f32 0.2, %v1225_v0  ;;  %v1229_v45 = vadd.f32 %v1228_v31, %v9276_v57  ;;  %4147 = vmatprep.mubr.bf16.mxu0 %v9291_v1  ;;  %v2244_v51 = vmax.f32 %v1552_v25, %v1988_v6  ;;  %v1995_v25 = vmul.f32 0.2, %v1556_v14  ;;  %v1561_v6 = vpop.f32.mrb[59].mxu0 }
 0x1e9   :  { %v1777_v38 = vmul.f32 0.2, %v1227_v2  ;;  %1717 = vmatmul.mubr.bf16.gmra.mrb[172].mxu1 %v8877_v12  ;;  %4148 = vmatmul.mubr.bf16.gmra.mrb[124].mxu0 %v9287_v19  ;;  %v9302_v50 = vpack.c.bf16 %v2243_v26, %v2235_v63  ;;  %v2025_v53 = vmax.f32 %v1223_v16, %v1769_v41  ;;  %v1560_v31 = vadd.f32 %v1559_v37, %v8993_v49  ;;  %v8233_v26 = vld [vmem:[#allocation7 + $0x400] ss:$16 sps:$4 sm:$0xff]  }
 0x1ea   :  { %v1778_v42 = vmul.f32 0.2, %v1229_v45  ;;  %1726 = vmatprep.mubr.bf16.mxu1 %v8879_v15  ;;  %v9305_v3 = vpack.c.bf16 %v2244_v51, %v2236_v5  ;;  %v2026_v12 = vmax.f32 %v1225_v0, %v1770_v11  ;;  %v1996_v16 = vmul.f32 0.2, %v1558_v62  ;;  %v8241_v0 = vld [vmem:[#allocation7 + $0x424] ss:$16 sps:$4 sm:$0xff]  }
 0x1eb   :  { %10377 = vst [vmem:[#allocation52_spill] sm:$0xff] %v9302_v50  ;;  %v2033_v18 = vmax.f32 %v1227_v2, %v1777_v38  ;;  %v1562_v41 = vadd.f32 %v1561_v6, %v8997_v9  ;;  %v2251_v11 = vmax.f32 %v1556_v14, %v1995_v25  ;;  %v1565_v14 = vpop.f32.mrb[60].mxu0  ;;  %v8239_v25 = vld [vmem:[#allocation7 + $0x420] ss:$16 sps:$4 sm:$0xff]  }
 0x1ec   :  { %10378 = vst [vmem:[#allocation53_spill] sm:$0xff] %v9305_v3  ;;  %v2034_v36 = vmax.f32 %v1229_v45, %v1778_v42  ;;  %v1232_v60 = vpop.f32.mrb[68].mxu1  ;;  %v2003_v45 = vmul.f32 0.2, %v1560_v31 }
 0x1ed   :  { %v9308_v15 = vpack.c.bf16 %v2033_v18, %v2025_v53  ;;  %v1233_v7 = vadd.f32 %v1232_v60, %v9272_v4  ;;  %v1234_v63 = vpop.f32.mrb[69].mxu1  ;;  %v2252_v53 = vmax.f32 %v1558_v62, %v1996_v16  ;;  %v2004_v18 = vmul.f32 0.2, %v1562_v41 }
 0x1ee   :  { %v1235_v2 = vadd.f32 %v1234_v63, %v9276_v57  ;;  %v1236_v5 = vpop.f32.mrb[70].mxu1  ;;  %v9313_v38 = vpack.c.bf16 %v2034_v36, %v2026_v12  ;;  %v2259_v6 = vmax.f32 %v1560_v31, %v2003_v45  ;;  %v1566_v62 = vadd.f32 %v1565_v14, %v8993_v49  ;;  %v1567_v63 = vpop.f32.mrb[61].mxu0  ;;  %v8247_v31 = vld [vmem:[#allocation7 + $0x444] ss:$16 sps:$4 sm:$0xff]  }
 0x1ef   :  { %v1785_v51 = vmul.f32 0.2, %v1233_v7  ;;  %v1237_v42 = vadd.f32 %v1236_v5, %v9272_v4  ;;  %v1238_v54 = vpop.f32.mrb[71].mxu1  ;;  %v2260_v12 = vmax.f32 %v1562_v41, %v2004_v18  ;;  %v1569_v45 = vpop.f32.mrb[62].mxu0 }
 0x1f0   :  { %v1786_v37 = vmul.f32 0.2, %v1235_v2  ;;  %v1239_v60 = vadd.f32 %v1238_v54, %v9276_v57  ;;  %4190 = vmatprep.mubr.bf16.mxu0 %v9313_v38  ;;  %v9322_v16 = vpack.c.bf16 %v2259_v6, %v2251_v11  ;;  %v1571_v23 = vpop.f32.mrb[63].mxu0 }
 0x1f1   :  { %v1793_v50 = vmul.f32 0.2, %v1237_v42  ;;  %1727 = vmatmul.mubr.bf16.gmra.mrb[176].mxu1 %v8885_v32  ;;  %4191 = vmatmul.mubr.bf16.vlgmr.msra.gmra.mrb[64].mxu0 %v9308_v15  ;;  %v2041_v5 = vmax.f32 %v1233_v7, %v1785_v51  ;;  %v1568_v32 = vadd.f32 %v1567_v63, %v8997_v9  ;;  %v9325_v3 = vpack.c.bf16 %v2260_v12, %v2252_v53 }
 0x1f2   :  { %v1794_v36 = vmul.f32 0.2, %v1239_v60  ;;  %1736 = vmatprep.mubr.bf16.mxu1 %v8887_v33  ;;  %4352 = vmatpush1.bf16.msra.mxu0 %v8233_v26  ;;  %10379 = vst [vmem:[#allocation54_spill] sm:$0xff] %v9322_v16  ;;  %v2042_v41 = vmax.f32 %v1235_v2, %v1786_v37  ;;  %v2011_v33 = vmul.f32 0.2, %v1566_v62  ;;  %v1570_v26 = vadd.f32 %v1569_v45, %v8993_v49  ;;  %v10381_v45 = vld [vmem:[#allocation13_spill] sm:$0xff] }
 0x1f3   :  { %v2049_v54 = vmax.f32 %v1237_v42, %v1793_v50  ;;  %4353 = vmatprep.subr.bf16.mxu0 %v8241_v0  ;;  %10380 = vst [vmem:[#allocation55_spill] sm:$0xff] %v9325_v3  ;;  %v8245_v50 = vld [vmem:[#allocation7 + $0x440] ss:$16 sps:$4 sm:$0xff]   ;;  %v2012_v7 = vmul.f32 0.2, %v1568_v32  ;;  %v1572_v0 = vadd.f32 %v1571_v23, %v8997_v9 }
 0x1f4   :  { %v2050_v18 = vmax.f32 %v1239_v60, %v1794_v36  ;;  %v1242_v24 = vpop.f32.mrb[72].mxu1  ;;  %v8253_v2 = vld [vmem:[#allocation7 + $0x464] ss:$16 sps:$4 sm:$0xff]   ;;  %v2267_v37 = vmax.f32 %v1566_v62, %v2011_v33  ;;  %v2019_v60 = vmul.f32 0.2, %v1570_v26 }
 0x1f5   :  { %v1243_v14 = vadd.f32 %v1242_v24, %v9272_v4  ;;  %v1244_v11 = vpop.f32.mrb[73].mxu1  ;;  %v9329_v6 = vpack.c.bf16 %v2049_v54, %v2041_v5  ;;  %v2268_v36 = vmax.f32 %v1568_v32, %v2012_v7  ;;  %v2020_v63 = vmul.f32 0.2, %v1572_v0  ;;  %v8259_v33 = vld [vmem:[#allocation7 + $0x484] ss:$16 sps:$4 sm:$0xff]  }
 0x1f6   :  { %v1245_v51 = vadd.f32 %v1244_v11, %v9276_v57  ;;  %v1246_v42 = vpop.f32.mrb[74].mxu1  ;;  %v9333_v53 = vpack.c.bf16 %v2050_v18, %v2042_v41  ;;  %4354 = vmatpush1.bf16.msra.mxu0 %v8239_v25  ;;  %v2275_v9 = vmax.f32 %v1570_v26, %v2019_v60  ;;  %v8251_v41 = vld [vmem:[#allocation7 + $0x460] ss:$16 sps:$4 sm:$0xff]  }
 0x1f7   :  { %v1801_v49 = vmul.f32 0.2, %v1243_v14  ;;  %v1247_v12 = vadd.f32 %v1246_v42, %v9272_v4  ;;  %v1248_v24 = vpop.f32.mrb[75].mxu1  ;;  %4355 = vmatprep.subr.bf16.mxu0 %v8247_v31  ;;  %v2276_v25 = vmax.f32 %v1572_v0, %v2020_v63 }
 0x1f8   :  { %v1802_v5 = vmul.f32 0.2, %v1245_v51  ;;  %v1249_v54 = vadd.f32 %v1248_v24, %v9276_v57  ;;  %4200 = vmatprep.mubr.bf16.mxu0 %v9333_v53  ;;  %v9341_v31 = vpack.c.bf16 %v2275_v9, %v2267_v37  ;;  %v10384_v9 = vld [vmem:[#allocation14_spill] sm:$0xff] }
 0x1f9   :  { %v1809_v23 = vmul.f32 0.2, %v1247_v12  ;;  %1737 = vmatmul.mubr.bf16.gmra.mrb[180].mxu1 %v8893_v40  ;;  %4201 = vmatmul.mubr.bf16.gmra.mrb[68].mxu0 %v9329_v6  ;;  %v2057_v32 = vmax.f32 %v1243_v14, %v1801_v49  ;;  %v9343_v11 = vpack.c.bf16 %v2276_v25, %v2268_v36  ;;  %v8257_v14 = vld [vmem:[#allocation7 + $0x480] ss:$16 sps:$4 sm:$0xff]  }
 0x1fa   :  { %v1810_v62 = vmul.f32 0.2, %v1249_v54  ;;  %1746 = vmatprep.mubr.bf16.mxu1 %v10381_v45  ;;  %4356 = vmatpush1.bf16.msra.mxu0 %v8245_v50  ;;  %10382 = vst [vmem:[#allocation13_spill] sm:$0xff] %v9341_v31  ;;  %v2058_v26 = vmax.f32 %v1245_v51, %v1802_v5  ;;  %v8265_v51 = vld [vmem:[#allocation7 + $0x4a4] ss:$16 sps:$4 sm:$0xff]  }
 0x1fb   :  { %v2065_v18 = vmax.f32 %v1247_v12, %v1809_v23  ;;  %4357 = vmatprep.subr.bf16.mxu0 %v8253_v2  ;;  %10383 = vst [vmem:[#allocation56_spill] sm:$0xff] %v9343_v11  ;;  %v8263_v23 = vld [vmem:[#allocation7 + $0x4a0] ss:$16 sps:$4 sm:$0xff]   ;;  %v8271_v45 = vld [vmem:[#allocation7 + $0x4c4] ss:$16 sps:$4 sm:$0xff]  }
 0x1fc   :  { %v2066_v7 = vmax.f32 %v1249_v54, %v1810_v62  ;;  %v1252_v42 = vpop.f32.mrb[76].mxu1 }
 0x1fd   :  { %v1253_v40 = vadd.f32 %v1252_v42, %v9272_v4  ;;  %v1254_v60 = vpop.f32.mrb[77].mxu1  ;;  %v9346_v0 = vpack.c.bf16 %v2065_v18, %v2057_v32 }
 0x1fe   :  { %v1255_v24 = vadd.f32 %v1254_v60, %v9276_v57  ;;  %v1256_v50 = vpop.f32.mrb[78].mxu1  ;;  %v9349_v63 = vpack.c.bf16 %v2066_v7, %v2058_v26  ;;  %4358 = vmatpush1.bf16.msra.mxu0 %v8251_v41 }
 0x1ff   :  { %v1817_v37 = vmul.f32 0.2, %v1253_v40  ;;  %v1257_v2 = vadd.f32 %v1256_v50, %v9272_v4  ;;  %v1258_v49 = vpop.f32.mrb[79].mxu1  ;;  %4359 = vmatprep.subr.bf16.mxu0 %v8259_v33  ;;  %v8269_v50 = vld [vmem:[#allocation7 + $0x4c0] ss:$16 sps:$4 sm:$0xff]  }
 0x200   :  { %v1818_v12 = vmul.f32 0.2, %v1255_v24  ;;  %v1259_v36 = vadd.f32 %v1258_v49, %v9276_v57  ;;  %4210 = vmatprep.mubr.bf16.mxu0 %v9349_v63 }
 0x201   :  { %v1825_v5 = vmul.f32 0.2, %v1257_v2  ;;  %1747 = vmatmul.mubr.bf16.gmra.mrb[184].mxu1 %v8901_v52  ;;  %4211 = vmatmul.mubr.bf16.gmra.mrb[72].mxu0 %v9346_v0  ;;  %v2073_v25 = vmax.f32 %v1253_v40, %v1817_v37 }
 0x202   :  { %v1826_v54 = vmul.f32 0.2, %v1259_v36  ;;  %1756 = vmatprep.mubr.bf16.mxu1 %v10384_v9  ;;  %4360 = vmatpush1.bf16.msra.mxu0 %v8257_v14  ;;  %v2074_v41 = vmax.f32 %v1255_v24, %v1818_v12  ;;  %v8277_v24 = vld [vmem:[#allocation7 + $0x4e4] ss:$16 sps:$4 sm:$0xff]  }
 0x203   :  { %v2081_v62 = vmax.f32 %v1257_v2, %v1825_v5  ;;  %4361 = vmatprep.subr.bf16.mxu0 %v8265_v51  ;;  %v8275_v5 = vld [vmem:[#allocation7 + $0x4e0] ss:$16 sps:$4 sm:$0xff]  }
 0x204   :  { %v2082_v32 = vmax.f32 %v1259_v36, %v1826_v54  ;;  %v1262_v18 = vpop.f32.mrb[80].mxu1  ;;  %v10385_v36 = vld [vmem:[#allocation19_spill] sm:$0xff] }
 0x205   :  { %v1263_v33 = vadd.f32 %v1262_v18, %v9272_v4  ;;  %v1264_v26 = vpop.f32.mrb[81].mxu1  ;;  %v9358_v7 = vpack.c.bf16 %v2081_v62, %v2073_v25 }
 0x206   :  { %v1265_v52 = vadd.f32 %v1264_v26, %v9276_v57  ;;  %v1266_v42 = vpop.f32.mrb[82].mxu1  ;;  %v9361_v60 = vpack.c.bf16 %v2082_v32, %v2074_v41  ;;  %4362 = vmatpush1.bf16.msra.mxu0 %v8263_v23  ;;  %v8283_v23 = vld [vmem:[#allocation7 + $0x504] ss:$16 sps:$4 sm:$0xff]  }
 0x207   :  { %v1833_v14 = vmul.f32 0.2, %v1263_v33  ;;  %v1267_v40 = vadd.f32 %v1266_v42, %v9272_v4  ;;  %v1268_v37 = vpop.f32.mrb[83].mxu1  ;;  %4363 = vmatprep.subr.bf16.mxu0 %v8271_v45 }
 0x208   :  { %v1834_v2 = vmul.f32 0.2, %v1265_v52  ;;  %v1269_v49 = vadd.f32 %v1268_v37, %v9276_v57  ;;  %4220 = vmatprep.mubr.bf16.mxu0 %v9361_v60  ;;  %v8236_v37 = vld [vmem:[#allocation7 + $0x208] ss:$16 sps:$4 sm:$0xff]  }
 0x209   :  { %v1841_v51 = vmul.f32 0.2, %v1267_v40  ;;  %1757 = vmatmul.mubr.bf16.gmra.mrb[188].mxu1 %v8909_v56  ;;  %4221 = vmatmul.mubr.bf16.gmra.mrb[76].mxu0 %v9358_v7  ;;  %v2089_v54 = vmax.f32 %v1263_v33, %v1833_v14 }
 0x20a   :  { %v1842_v12 = vmul.f32 0.2, %v1269_v49  ;;  %4769 = vmatprep.mubr.bf16.mxu1 %v10385_v36  ;;  %4364 = vmatpush1.bf16.msra.mxu0 %v8269_v50  ;;  %v2090_v25 = vmax.f32 %v1265_v52, %v1834_v2  ;;  %v8244_v50 = vld [vmem:[#allocation7 + $0x22c] ss:$16 sps:$4 sm:$0xff]   ;;  %v8281_v52 = vld [vmem:[#allocation7 + $0x500] ss:$16 sps:$4 sm:$0xff]  }
 0x20b   :  { %v2097_v9 = vmax.f32 %v1267_v40, %v1841_v51  ;;  %4365 = vmatprep.subr.bf16.mxu0 %v8277_v24 }
 0x20c   :  { %v2098_v62 = vmax.f32 %v1269_v49, %v1842_v12  ;;  %v1272_v45 = vpop.f32.mrb[84].mxu1  ;;  %v8289_v49 = vld [vmem:[#allocation7 + $0x524] ss:$16 sps:$4 sm:$0xff]   ;;  %v10386_v12 = vld [vmem:[#allocation18_spill] sm:$0xff] }
 0x20d   :  { %v1273_v41 = vadd.f32 %v1272_v45, %v9272_v4  ;;  %v1274_v32 = vpop.f32.mrb[85].mxu1  ;;  %v9370_v18 = vpack.c.bf16 %v2097_v9, %v2089_v54  ;;  %v10387_v54 = vld [vmem:[#allocation21_spill] sm:$0xff] }
 0x20e   :  { %v1275_v56 = vadd.f32 %v1274_v32, %v9276_v57  ;;  %v1276_v26 = vpop.f32.mrb[86].mxu1  ;;  %v9373_v42 = vpack.c.bf16 %v2098_v62, %v2090_v25  ;;  %4366 = vmatpush1.bf16.msra.mxu0 %v8275_v5  ;;  %v8242_v5 = vld [vmem:[#allocation7 + $0x228] ss:$16 sps:$4 sm:$0xff]   ;;  %v8287_v62 = vld [vmem:[#allocation7 + $0x520] ss:$16 sps:$4 sm:$0xff]  }
 0x20f   :  { %v1849_v33 = vmul.f32 0.2, %v1273_v41  ;;  %v1277_v14 = vadd.f32 %v1276_v26, %v9272_v4  ;;  %v1278_v40 = vpop.f32.mrb[87].mxu1  ;;  %4367 = vmatprep.subr.bf16.mxu0 %v8283_v23  ;;  %v8250_v23 = vld [vmem:[#allocation7 + $0x24c] ss:$16 sps:$4 sm:$0xff]  }
 0x210   :  { %v1850_v24 = vmul.f32 0.2, %v1275_v56  ;;  %v1279_v2 = vadd.f32 %v1278_v40, %v9276_v57  ;;  %4230 = vmatprep.mubr.bf16.mxu0 %v9373_v42  ;;  %v8292_v40 = vld [vmem:[#allocation7 + $0x544] ss:$16 sps:$4 sm:$0xff]  }
 0x211   :  { %v1857_v51 = vmul.f32 0.2, %v1277_v14  ;;  %4231 = vmatmul.mubr.bf16.gmra.mrb[80].mxu0 %v9370_v18  ;;  %4770 = vmatmul.mubr.bf16.vlgmr.msra.gmra.mrb[192].mxu1 %v10386_v12  ;;  %v2105_v9 = vmax.f32 %v1273_v41, %v1849_v33  ;;  %v8248_v41 = vld [vmem:[#allocation7 + $0x248] ss:$16 sps:$4 sm:$0xff]  }
 0x212   :  { %v1858_v36 = vmul.f32 0.2, %v1279_v2  ;;  %4779 = vmatprep.mubr.bf16.mxu1 %v10387_v54  ;;  %4931 = vmatpush1.bf16.msra.mxu1 %v8236_v37  ;;  %v2106_v45 = vmax.f32 %v1275_v56, %v1850_v24 }
 0x213   :  { %v2113_v25 = vmax.f32 %v1277_v14, %v1857_v51  ;;  %4932 = vmatprep.subr.bf16.mxu1 %v8244_v50  ;;  %4368 = vmatpush1.bf16.msra.mxu0 %v8281_v52  ;;  %v8256_v50 = vld [vmem:[#allocation7 + $0x26c] ss:$16 sps:$4 sm:$0xff]   ;;  %v8290_v52 = vld [vmem:[#allocation7 + $0x540] ss:$16 sps:$4 sm:$0xff]  }
 0x214   :  { %v2114_v32 = vmax.f32 %v1279_v2, %v1858_v36  ;;  %v1282_v26 = vpop.f32.mrb[88].mxu1  ;;  %4369 = vmatprep.subr.bf16.mxu0 %v8289_v49  ;;  %v10389_v51 = vld [vmem:[#allocation20_spill] sm:$0xff] }
 0x215   :  { %v1283_v31 = vadd.f32 %v1282_v26, %v9272_v4  ;;  %v1284_v11 = vpop.f32.mrb[89].mxu1  ;;  %v9382_v12 = vpack.c.bf16 %v2113_v25, %v2105_v9  ;;  %v8254_v9 = vld [vmem:[#allocation7 + $0x268] ss:$16 sps:$4 sm:$0xff]  }
 0x216   :  { %v1285_v54 = vadd.f32 %v1284_v11, %v9276_v57  ;;  %v1286_v37 = vpop.f32.mrb[90].mxu1  ;;  %v9385_v16 = vpack.c.bf16 %v2114_v32, %v2106_v45  ;;  %4933 = vmatpush1.bf16.msra.mxu1 %v8242_v5  ;;  %v8298_v11 = vld [vmem:[#allocation7 + $0x564] ss:$16 sps:$4 sm:$0xff]   ;;  %v8296_v45 = vld [vmem:[#allocation7 + $0x560] ss:$16 sps:$4 sm:$0xff]  }
 0x217   :  { %10388 = vst [vmem:[#allocation14_spill] sm:$0xff] %v9382_v12  ;;  %v1865_v33 = vmul.f32 0.2, %v1283_v31  ;;  %v1287_v56 = vadd.f32 %v1286_v37, %v9272_v4  ;;  %v1288_v14 = vpop.f32.mrb[91].mxu1  ;;  %4934 = vmatprep.subr.bf16.mxu1 %v8250_v23  ;;  %4370 = vmatpush1.bf16.msra.mxu0 %v8287_v62  ;;  %v10390_v5 = vld [vmem:[#allocation23_spill] sm:$0xff] }
 0x218   :  { %v1866_v24 = vmul.f32 0.2, %v1285_v54  ;;  %v1289_v2 = vadd.f32 %v1288_v14, %v9276_v57  ;;  %4240 = vmatprep.mubr.bf16.mxu0 %v9385_v16  ;;  %4371 = vmatprep.subr.bf16.mxu0 %v8292_v40  ;;  %v8262_v62 = vld [vmem:[#allocation7 + $0x28c] ss:$16 sps:$4 sm:$0xff]   ;;  %v8301_v37 = vld [vmem:[#allocation7 + $0x584] ss:$16 sps:$4 sm:$0xff]  }
 0x219   :  { %v1873_v49 = vmul.f32 0.2, %v1287_v56  ;;  %4241 = vmatmul.mubr.bf16.gmra.mrb[84].mxu0 %v9382_v12  ;;  %4780 = vmatmul.mubr.bf16.gmra.mrb[196].mxu1 %v10389_v51  ;;  %v2121_v25 = vmax.f32 %v1283_v31, %v1865_v33  ;;  %v8260_v31 = vld [vmem:[#allocation7 + $0x288] ss:$16 sps:$4 sm:$0xff]  }
 0x21a   :  { %v1874_v36 = vmul.f32 0.2, %v1289_v2  ;;  %4789 = vmatprep.mubr.bf16.mxu1 %v10390_v5  ;;  %4935 = vmatpush1.bf16.msra.mxu1 %v8248_v41  ;;  %v2122_v32 = vmax.f32 %v1285_v54, %v1866_v24 }
 0x21b   :  { %v2129_v23 = vmax.f32 %v1287_v56, %v1873_v49  ;;  %4936 = vmatprep.subr.bf16.mxu1 %v8256_v50  ;;  %4372 = vmatpush1.bf16.msra.mxu0 %v8290_v52  ;;  %v8268_v50 = vld [vmem:[#allocation7 + $0x2ac] ss:$16 sps:$4 sm:$0xff]   ;;  %v8299_v52 = vld [vmem:[#allocation7 + $0x580] ss:$16 sps:$4 sm:$0xff]  }
 0x21c   :  { %v2130_v26 = vmax.f32 %v1289_v2, %v1874_v36  ;;  %v1292_v40 = vpop.f32.mrb[92].mxu1  ;;  %4373 = vmatprep.subr.bf16.mxu0 %v8298_v11  ;;  %v10393_v49 = vld [vmem:[#allocation22_spill] sm:$0xff] }
 0x21d   :  { %v1293_v14 = vadd.f32 %v1292_v40, %v9272_v4  ;;  %v1294_v3 = vpop.f32.mrb[93].mxu1  ;;  %v9394_v51 = vpack.c.bf16 %v2129_v23, %v2121_v25  ;;  %v8266_v25 = vld [vmem:[#allocation7 + $0x2a8] ss:$16 sps:$4 sm:$0xff]  }
 0x21e   :  { %v1295_v5 = vadd.f32 %v1294_v3, %v9276_v57  ;;  %v1296_v41 = vpop.f32.mrb[94].mxu1  ;;  %v9397_v12 = vpack.c.bf16 %v2130_v26, %v2122_v32  ;;  %4937 = vmatpush1.bf16.msra.mxu1 %v8254_v9  ;;  %v8307_v3 = vld [vmem:[#allocation7 + $0x5a4] ss:$16 sps:$4 sm:$0xff]   ;;  %v8305_v32 = vld [vmem:[#allocation7 + $0x5a0] ss:$16 sps:$4 sm:$0xff]  }
 0x21f   :  { %10391 = vst [vmem:[#allocation19_spill] sm:$0xff] %v9394_v51  ;;  %v1881_v33 = vmul.f32 0.2, %v1293_v14  ;;  %v1297_v54 = vadd.f32 %v1296_v41, %v9272_v4  ;;  %v1298_v56 = vpop.f32.mrb[95].mxu1  ;;  %4938 = vmatprep.subr.bf16.mxu1 %v8262_v62  ;;  %4374 = vmatpush1.bf16.msra.mxu0 %v8296_v45  ;;  %v10394_v9 = vld [vmem:[#allocation27_spill] sm:$0xff] }
 0x220   :  { %10392 = vst [vmem:[#allocation18_spill] sm:$0xff] %v9397_v12  ;;  %v1882_v24 = vmul.f32 0.2, %v1295_v5  ;;  %v1299_v2 = vadd.f32 %v1298_v56, %v9276_v57  ;;  %4250 = vmatprep.mubr.bf16.mxu0 %v9397_v12  ;;  %4375 = vmatprep.subr.bf16.mxu0 %v8301_v37  ;;  %v8274_v45 = vld [vmem:[#allocation7 + $0x2cc] ss:$16 sps:$4 sm:$0xff]  }
 0x221   :  { %v1889_v11 = vmul.f32 0.2, %v1297_v54  ;;  %4251 = vmatmul.mubr.bf16.gmra.mrb[88].mxu0 %v9394_v51  ;;  %4790 = vmatmul.mubr.bf16.gmra.mrb[200].mxu1 %v10393_v49  ;;  %v2137_v23 = vmax.f32 %v1293_v14, %v1881_v33  ;;  %v8310_v41 = vld [vmem:[#allocation7 + $0x5c4] ss:$16 sps:$4 sm:$0xff]   ;;  %v8272_v14 = vld [vmem:[#allocation7 + $0x2c8] ss:$16 sps:$4 sm:$0xff]  }
 0x222   :  { %v1890_v36 = vmul.f32 0.2, %v1299_v2  ;;  %4799 = vmatprep.mubr.bf16.mxu1 %v10394_v9  ;;  %4939 = vmatpush1.bf16.msra.mxu1 %v8260_v31  ;;  %v2138_v26 = vmax.f32 %v1295_v5, %v1882_v24 }
 0x223   :  { %v2145_v62 = vmax.f32 %v1297_v54, %v1889_v11  ;;  %4940 = vmatprep.subr.bf16.mxu1 %v8268_v50  ;;  %4376 = vmatpush1.bf16.msra.mxu0 %v8299_v52  ;;  %v8280_v50 = vld [vmem:[#allocation7 + $0x2ec] ss:$16 sps:$4 sm:$0xff]   ;;  %v8308_v52 = vld [vmem:[#allocation7 + $0x5c0] ss:$16 sps:$4 sm:$0xff]  }
 0x224   :  { %v2146_v40 = vmax.f32 %v1299_v2, %v1890_v36  ;;  %v1302_v37 = vpop.f32.mrb[96].mxu1  ;;  %4377 = vmatprep.subr.bf16.mxu0 %v8307_v3  ;;  %v10396_v11 = vld [vmem:[#allocation26_spill] sm:$0xff] }
 0x225   :  { %v1303_v56 = vadd.f32 %v1302_v37, %v9272_v4  ;;  %v1304_v51 = vpop.f32.mrb[97].mxu1  ;;  %v9406_v49 = vpack.c.bf16 %v2145_v62, %v2137_v23 }
 0x226   :  { %v1305_v9 = vadd.f32 %v1304_v51, %v9276_v57  ;;  %v1306_v31 = vpop.f32.mrb[98].mxu1  ;;  %v9409_v12 = vpack.c.bf16 %v2146_v40, %v2138_v26  ;;  %4941 = vmatpush1.bf16.msra.mxu1 %v8266_v25  ;;  %v8316_v51 = vld [vmem:[#allocation7 + $0x5e4] ss:$16 sps:$4 sm:$0xff]   ;;  %v8278_v25 = vld [vmem:[#allocation7 + $0x2e8] ss:$16 sps:$4 sm:$0xff]  }
 0x227   :  { %10395 = vst [vmem:[#allocation21_spill] sm:$0xff] %v9406_v49  ;;  %v1897_v33 = vmul.f32 0.2, %v1303_v56  ;;  %v1307_v5 = vadd.f32 %v1306_v31, %v9272_v4  ;;  %v1308_v54 = vpop.f32.mrb[99].mxu1  ;;  %4942 = vmatprep.subr.bf16.mxu1 %v8274_v45  ;;  %4378 = vmatpush1.bf16.msra.mxu0 %v8305_v32  ;;  %v8286_v45 = vld [vmem:[#allocation7 + $0x30c] ss:$16 sps:$4 sm:$0xff]  }
 0x228   :  { %v1898_v24 = vmul.f32 0.2, %v1305_v9  ;;  %v1309_v2 = vadd.f32 %v1308_v54, %v9276_v57  ;;  %4260 = vmatprep.mubr.bf16.mxu0 %v9409_v12  ;;  %4379 = vmatprep.subr.bf16.mxu0 %v8310_v41  ;;  %v8314_v32 = vld [vmem:[#allocation7 + $0x5e0] ss:$16 sps:$4 sm:$0xff]   ;;  %v8331_v41 = vld [vmem:[#allocation7 + $0x604] ss:$16 sps:$4 sm:$0xff]  }
 0x229   :  { %v1905_v3 = vmul.f32 0.2, %v1307_v5  ;;  %4261 = vmatmul.mubr.bf16.gmra.mrb[92].mxu0 %v9406_v49  ;;  %4800 = vmatmul.mubr.bf16.gmra.mrb[204].mxu1 %v10396_v11  ;;  %v2153_v23 = vmax.f32 %v1303_v56, %v1897_v33  ;;  %v8284_v56 = vld [vmem:[#allocation7 + $0x308] ss:$16 sps:$4 sm:$0xff]  }
 0x22a   :  { %v1906_v36 = vmul.f32 0.2, %v1309_v2  ;;  %4809 = vmatprep.mubr.bf16.mxu1 %v9052_v58  ;;  %4943 = vmatpush1.bf16.msra.mxu1 %v8272_v14  ;;  %v2154_v26 = vmax.f32 %v1305_v9, %v1898_v24 }
 0x22b   :  { %v2161_v62 = vmax.f32 %v1307_v5, %v1905_v3  ;;  %4944 = vmatprep.subr.bf16.mxu1 %v8280_v50  ;;  %4380 = vmatpush1.bf16.msra.mxu0 %v8308_v52  ;;  %v8295_v5 = vld [vmem:[#allocation7 + $0x32c] ss:$16 sps:$4 sm:$0xff]   ;;  %v8293_v3 = vld [vmem:[#allocation7 + $0x328] ss:$16 sps:$4 sm:$0xff]  }
 0x22c   :  { %v2162_v40 = vmax.f32 %v1309_v2, %v1906_v36  ;;  %v1312_v37 = vpop.f32.mrb[100].mxu1  ;;  %4381 = vmatprep.subr.bf16.mxu0 %v8316_v51 }
 0x22d   :  { %v1313_v31 = vadd.f32 %v1312_v37, %v9272_v4  ;;  %v1314_v54 = vpop.f32.mrb[101].mxu1  ;;  %v9418_v11 = vpack.c.bf16 %v2161_v62, %v2153_v23  ;;  %v8304_v23 = vld [vmem:[#allocation7 + $0x34c] ss:$16 sps:$4 sm:$0xff]  }
 0x22e   :  { %v1315_v58 = vadd.f32 %v1314_v54, %v9276_v57  ;;  %v1316_v14 = vpop.f32.mrb[102].mxu1  ;;  %v9421_v49 = vpack.c.bf16 %v2162_v40, %v2154_v26  ;;  %4945 = vmatpush1.bf16.msra.mxu1 %v8278_v25 }
 0x22f   :  { %v1913_v50 = vmul.f32 0.2, %v1313_v31  ;;  %v1317_v33 = vadd.f32 %v1316_v14, %v9272_v4  ;;  %v1318_v9 = vpop.f32.mrb[103].mxu1  ;;  %4946 = vmatprep.subr.bf16.mxu1 %v8286_v45  ;;  %4382 = vmatpush1.bf16.msra.mxu0 %v8314_v32 }
 0x230   :  { %v1914_v52 = vmul.f32 0.2, %v1315_v58  ;;  %v1319_v24 = vadd.f32 %v1318_v9, %v9276_v57  ;;  %4270 = vmatprep.mubr.bf16.mxu0 %v9421_v49  ;;  %4544 = vmatprep.subr.bf16.mxu0 %v8331_v41 }
 0x231   :  { %v1921_v2 = vmul.f32 0.2, %v1317_v33  ;;  %4271 = vmatmul.mubr.bf16.gmra.mrb[96].mxu0 %v9418_v11  ;;  %4810 = vmatmul.mubr.bf16.gmra.mrb[208].mxu1 %v9048_v34  ;;  %v2169_v36 = vmax.f32 %v1313_v31, %v1913_v50 }
 0x232   :  { %v1922_v51 = vmul.f32 0.2, %v1319_v24  ;;  %4819 = vmatprep.mubr.bf16.mxu1 %v9072_v22  ;;  %4947 = vmatpush1.bf16.msra.mxu1 %v8284_v56  ;;  %v2170_v62 = vmax.f32 %v1315_v58, %v1914_v52  ;;  %v8302_v22 = vld [vmem:[#allocation7 + $0x348] ss:$16 sps:$4 sm:$0xff]   ;;  %v8313_v58 = vld [vmem:[#allocation7 + $0x36c] ss:$16 sps:$4 sm:$0xff]  }
 0x233   :  { %v2177_v25 = vmax.f32 %v1317_v33, %v1921_v2  ;;  %4948 = vmatprep.subr.bf16.mxu1 %v8295_v5  ;;  %v8311_v52 = vld [vmem:[#allocation7 + $0x368] ss:$16 sps:$4 sm:$0xff]  }
 0x234   :  { %v2178_v45 = vmax.f32 %v1319_v24, %v1922_v51  ;;  %v1322_v32 = vpop.f32.mrb[104].mxu1  ;;  %v8319_v51 = vld [vmem:[#allocation7 + $0x38c] ss:$16 sps:$4 sm:$0xff]  }
 0x235   :  { %v1323_v26 = vadd.f32 %v1322_v32, %v9272_v4  ;;  %v1324_v40 = vpop.f32.mrb[105].mxu1  ;;  %v9430_v37 = vpack.c.bf16 %v2177_v25, %v2169_v36 }
 0x236   :  { %v1325_v41 = vadd.f32 %v1324_v40, %v9276_v57  ;;  %v1326_v34 = vpop.f32.mrb[106].mxu1  ;;  %v9433_v54 = vpack.c.bf16 %v2178_v45, %v2170_v62  ;;  %4949 = vmatpush1.bf16.msra.mxu1 %v8293_v3 }
 0x237   :  { %v1929_v14 = vmul.f32 0.2, %v1323_v26  ;;  %v1327_v31 = vadd.f32 %v1326_v34, %v9272_v4  ;;  %v1328_v56 = vpop.f32.mrb[107].mxu1  ;;  %4950 = vmatprep.subr.bf16.mxu1 %v8304_v23 }
 0x238   :  { %v1930_v50 = vmul.f32 0.2, %v1325_v41  ;;  %v1329_v33 = vadd.f32 %v1328_v56, %v9276_v57  ;;  %4280 = vmatprep.mubr.bf16.mxu0 %v9433_v54 }
 0x239   :  { %v1937_v9 = vmul.f32 0.2, %v1327_v31  ;;  %4281 = vmatmul.mubr.bf16.gmra.mrb[100].mxu0 %v9430_v37  ;;  %4820 = vmatmul.mubr.bf16.gmra.mrb[212].mxu1 %v9068_v8  ;;  %v2185_v24 = vmax.f32 %v1323_v26, %v1929_v14 }
 0x23a   :  { %v1938_v5 = vmul.f32 0.2, %v1329_v33  ;;  %4829 = vmatprep.mubr.bf16.mxu1 %v9092_v10  ;;  %4951 = vmatpush1.bf16.msra.mxu1 %v8302_v22  ;;  %v2186_v3 = vmax.f32 %v1325_v41, %v1930_v50  ;;  %v8317_v10 = vld [vmem:[#allocation7 + $0x388] ss:$16 sps:$4 sm:$0xff]   ;;  %v8322_v41 = vld [vmem:[#allocation7 + $0x3ac] ss:$16 sps:$4 sm:$0xff]  }
 0x23b   :  { %v2193_v2 = vmax.f32 %v1327_v31, %v1937_v9  ;;  %4952 = vmatprep.subr.bf16.mxu1 %v8313_v58  ;;  %v8320_v50 = vld [vmem:[#allocation7 + $0x3a8] ss:$16 sps:$4 sm:$0xff]  }
 0x23c   :  { %v2194_v36 = vmax.f32 %v1329_v33, %v1938_v5  ;;  %v1332_v25 = vpop.f32.mrb[108].mxu1  ;;  %v8325_v5 = vld [vmem:[#allocation7 + $0x3cc] ss:$16 sps:$4 sm:$0xff]  }
 0x23d   :  { %v1333_v23 = vadd.f32 %v1332_v25, %v9272_v4  ;;  %v1334_v62 = vpop.f32.mrb[109].mxu1  ;;  %v9442_v45 = vpack.c.bf16 %v2193_v2, %v2185_v24 }
 0x23e   :  { %v1335_v32 = vadd.f32 %v1334_v62, %v9276_v57  ;;  %v1336_v8 = vpop.f32.mrb[110].mxu1  ;;  %v9445_v40 = vpack.c.bf16 %v2194_v36, %v2186_v3  ;;  %4953 = vmatpush1.bf16.msra.mxu1 %v8311_v52 }
 0x23f   :  { %v1945_v34 = vmul.f32 0.2, %v1333_v23  ;;  %v1337_v26 = vadd.f32 %v1336_v8, %v9272_v4  ;;  %v1338_v22 = vpop.f32.mrb[111].mxu1  ;;  %4954 = vmatprep.subr.bf16.mxu1 %v8319_v51 }
 0x240   :  { %v1946_v14 = vmul.f32 0.2, %v1335_v32  ;;  %v1339_v31 = vadd.f32 %v1338_v22, %v9276_v57  ;;  %4290 = vmatprep.mubr.bf16.mxu0 %v9445_v40 }
 0x241   :  { %v1953_v56 = vmul.f32 0.2, %v1337_v26  ;;  %4291 = vmatmul.mubr.bf16.gmra.mrb[104].mxu0 %v9442_v45  ;;  %4830 = vmatmul.mubr.bf16.gmra.mrb[216].mxu1 %v9088_v28  ;;  %v2201_v33 = vmax.f32 %v1333_v23, %v1945_v34 }
 0x242   :  { %v1954_v58 = vmul.f32 0.2, %v1339_v31  ;;  %4839 = vmatprep.mubr.bf16.mxu1 %v9112_v21  ;;  %4955 = vmatpush1.bf16.msra.mxu1 %v8317_v10  ;;  %v2202_v52 = vmax.f32 %v1335_v32, %v1946_v14  ;;  %v8323_v21 = vld [vmem:[#allocation7 + $0x3c8] ss:$16 sps:$4 sm:$0xff]   ;;  %v8328_v32 = vld [vmem:[#allocation7 + $0x3ec] ss:$16 sps:$4 sm:$0xff]  }
 0x243   :  { %v2209_v9 = vmax.f32 %v1337_v26, %v1953_v56  ;;  %4956 = vmatprep.subr.bf16.mxu1 %v8322_v41  ;;  %v8326_v14 = vld [vmem:[#allocation7 + $0x3e8] ss:$16 sps:$4 sm:$0xff]  }
 0x244   :  { %v2210_v24 = vmax.f32 %v1339_v31, %v1954_v58  ;;  %v1342_v2 = vpop.f32.mrb[112].mxu1  ;;  %v8334_v58 = vld [vmem:[#allocation7 + $0x40c] ss:$16 sps:$4 sm:$0xff]  }
 0x245   :  { %v1343_v51 = vadd.f32 %v1342_v2, %v9272_v4  ;;  %v1344_v3 = vpop.f32.mrb[113].mxu1  ;;  %v9454_v36 = vpack.c.bf16 %v2209_v9, %v2201_v33 }
 0x246   :  { %v1345_v25 = vadd.f32 %v1344_v3, %v9276_v57  ;;  %v1346_v28 = vpop.f32.mrb[114].mxu1  ;;  %v9457_v62 = vpack.c.bf16 %v2210_v24, %v2202_v52  ;;  %4957 = vmatpush1.bf16.msra.mxu1 %v8320_v50 }
 0x247   :  { %v1961_v8 = vmul.f32 0.2, %v1343_v51  ;;  %v1347_v23 = vadd.f32 %v1346_v28, %v9272_v4  ;;  %v1348_v10 = vpop.f32.mrb[115].mxu1  ;;  %4958 = vmatprep.subr.bf16.mxu1 %v8325_v5 }
 0x248   :  { %v1962_v34 = vmul.f32 0.2, %v1345_v25  ;;  %v1349_v26 = vadd.f32 %v1348_v10, %v9276_v57  ;;  %4300 = vmatprep.mubr.bf16.mxu0 %v9457_v62 }
 0x249   :  { %v1969_v22 = vmul.f32 0.2, %v1347_v23  ;;  %4301 = vmatmul.mubr.bf16.gmra.mrb[108].mxu0 %v9454_v36  ;;  %4840 = vmatmul.mubr.bf16.gmra.mrb[220].mxu1 %v9108_v39  ;;  %v2217_v31 = vmax.f32 %v1343_v51, %v1961_v8 }
 0x24a   :  { %v1970_v41 = vmul.f32 0.2, %v1349_v26  ;;  %4849 = vmatprep.mubr.bf16.mxu1 %v9132_v48  ;;  %4959 = vmatpush1.bf16.msra.mxu1 %v8323_v21  ;;  %v2218_v50 = vmax.f32 %v1345_v25, %v1962_v34 }
 0x24b   :  { %v2225_v56 = vmax.f32 %v1347_v23, %v1969_v22  ;;  %4960 = vmatprep.subr.bf16.mxu1 %v8328_v32 }
 0x24c   :  { %v2226_v33 = vmax.f32 %v1349_v26, %v1970_v41  ;;  %v1352_v9 = vpop.f32.mrb[116].mxu1 }
 0x24d   :  { %v1353_v5 = vadd.f32 %v1352_v9, %v9272_v4  ;;  %v1354_v52 = vpop.f32.mrb[117].mxu1  ;;  %v9466_v24 = vpack.c.bf16 %v2225_v56, %v2217_v31 }
 0x24e   :  { %v1355_v2 = vadd.f32 %v1354_v52, %v9276_v57  ;;  %v1356_v39 = vpop.f32.mrb[118].mxu1  ;;  %v9469_v3 = vpack.c.bf16 %v2226_v33, %v2218_v50  ;;  %4961 = vmatpush1.bf16.msra.mxu1 %v8326_v14 }
 0x24f   :  { %v1977_v48 = vmul.f32 0.2, %v1353_v5  ;;  %v1357_v51 = vadd.f32 %v1356_v39, %v9272_v4  ;;  %v1358_v28 = vpop.f32.mrb[119].mxu1  ;;  %5123 = vmatprep.subr.bf16.mxu1 %v8334_v58 }
 0x250   :  { %v1978_v21 = vmul.f32 0.2, %v1355_v2  ;;  %v1359_v25 = vadd.f32 %v1358_v28, %v9276_v57  ;;  %4310 = vmatprep.mubr.bf16.mxu0 %v9469_v3 }
 0x251   :  { %v1985_v8 = vmul.f32 0.2, %v1357_v51  ;;  %4311 = vmatmul.mubr.bf16.gmra.mrb[112].mxu0 %v9466_v24  ;;  %4850 = vmatmul.mubr.bf16.gmra.mrb[224].mxu1 %v9128_v44  ;;  %v2233_v10 = vmax.f32 %v1353_v5, %v1977_v48 }
 0x252   :  { %v1986_v23 = vmul.f32 0.2, %v1359_v25  ;;  %4859 = vmatprep.mubr.bf16.mxu1 %v9152_v30  ;;  %v2234_v34 = vmax.f32 %v1355_v2, %v1978_v21 }
 0x253   :  { %v2241_v32 = vmax.f32 %v1357_v51, %v1985_v8 }
 0x254   :  { %v2242_v26 = vmax.f32 %v1359_v25, %v1986_v23  ;;  %v1362_v22 = vpop.f32.mrb[120].mxu1 }
 0x255   :  { %v1363_v41 = vadd.f32 %v1362_v22, %v9272_v4  ;;  %v1364_v14 = vpop.f32.mrb[121].mxu1  ;;  %v9478_v31 = vpack.c.bf16 %v2241_v32, %v2233_v10  ;;  %v341_v10 = vsub.s32 6, %v8942_v55 }
 0x256   :  { %v1365_v56 = vadd.f32 %v1364_v14, %v9276_v57  ;;  %v1366_v58 = vpop.f32.mrb[122].mxu1  ;;  %v9481_v50 = vpack.c.bf16 %v2242_v26, %v2234_v34 }
 0x257   :  { %v1993_v33 = vmul.f32 0.2, %v1363_v41  ;;  %v1367_v44 = vadd.f32 %v1366_v58, %v9272_v4  ;;  %v1368_v9 = vpop.f32.mrb[123].mxu1 }
 0x258   :  { %v1994_v30 = vmul.f32 0.2, %v1365_v56  ;;  %v1369_v5 = vadd.f32 %v1368_v9, %v9276_v57  ;;  %4320 = vmatprep.mubr.bf16.mxu0 %v9481_v50 }
 0x259   :  { %v2001_v52 = vmul.f32 0.2, %v1367_v44  ;;  %4321 = vmatmul.mubr.bf16.gmra.mrb[116].mxu0 %v9478_v31  ;;  %4860 = vmatmul.mubr.bf16.gmra.mrb[228].mxu1 %v9148_v27  ;;  %v2249_v39 = vmax.f32 %v1363_v41, %v1993_v33  ;;  %v345_v27 = vsub.s32 7, %v8942_v55  ;;  %v8570_v33 = vld [vmem:[%s10274_s2] sm:$0xff] }
 0x25a   :  { %v2002_v2 = vmul.f32 0.2, %v1369_v5  ;;  %4869 = vmatprep.mubr.bf16.mxu1 %v9172_v13  ;;  %v2250_v51 = vmax.f32 %v1365_v56, %v1994_v30 }
 0x25b   :  { %v2257_v48 = vmax.f32 %v1367_v44, %v2001_v52  ;;  %v9505_v44 = vrot.slane %v8570_v33, %v341_v10 }
 0x25c   :  { %v2258_v28 = vmax.f32 %v1369_v5, %v2002_v2  ;;  %v1372_v21 = vpop.f32.mrb[124].mxu1 }
 0x25d   :  { %v1373_v25 = vadd.f32 %v1372_v21, %v9272_v4  ;;  %v1374_v8 = vpop.f32.mrb[125].mxu1  ;;  %v9490_v23 = vpack.c.bf16 %v2257_v48, %v2249_v39 }
 0x25e   :  { %v1375_v32 = vadd.f32 %v1374_v8, %v9276_v57  ;;  %v1376_v34 = vpop.f32.mrb[126].mxu1  ;;  %v9494_v26 = vpack.c.bf16 %v2258_v28, %v2250_v51 }
 0x25f   :  { %v2009_v13 = vmul.f32 0.2, %v1373_v25  ;;  %v1377_v22 = vadd.f32 %v1376_v34, %v9272_v4  ;;  %v1378_v41 = vpop.f32.mrb[127].mxu1  ;;  %v9508_v4 = vrot.slane %v8570_v33, %v345_v27 }
 0x260   :  { %v2010_v14 = vmul.f32 0.2, %v1375_v32  ;;  %v1379_v56 = vadd.f32 %v1378_v41, %v9276_v57  ;;  %4330 = vmatprep.mubr.bf16.mxu0 %v9494_v26 }
 0x261   :  { %v2017_v58 = vmul.f32 0.2, %v1377_v22  ;;  %4331 = vmatmul.mubr.bf16.gmra.mrb[120].mxu0 %v9490_v23  ;;  %4870 = vmatmul.mubr.bf16.gmra.mrb[232].mxu1 %v9168_v46  ;;  %v2265_v30 = vmax.f32 %v1373_v25, %v2009_v13  ;;  %v10397_v13 = vld [vmem:[#allocation25_spill] sm:$0xff] }
 0x262   :  { %v2018_v9 = vmul.f32 0.2, %v1379_v56  ;;  %4879 = vmatprep.mubr.bf16.mxu1 %v9192_v17  ;;  %v2266_v5 = vmax.f32 %v1375_v32, %v2010_v14 }
 0x263   :  { %v2273_v57 = vmax.f32 %v1377_v22, %v2017_v58 }
 0x264   :  { %v2274_v52 = vmax.f32 %v1379_v56, %v2018_v9  ;;  %v1608_v2 = vpop.f32.mrb[128].mxu1 }
 0x265   :  { %v1609_v39 = vadd.f32 %v1608_v2, %v9505_v44  ;;  %v1610_v48 = vpop.f32.mrb[129].mxu1  ;;  %v9511_v46 = vpack.c.bf16 %v2273_v57, %v2265_v30 }
 0x266   :  { %v1611_v51 = vadd.f32 %v1610_v48, %v9508_v4  ;;  %v1612_v28 = vpop.f32.mrb[130].mxu1  ;;  %v9514_v21 = vpack.c.bf16 %v2274_v52, %v2266_v5 }
 0x267   :  { %v1773_v8 = vmul.f32 0.2, %v1609_v39  ;;  %v1613_v17 = vadd.f32 %v1612_v28, %v9505_v44  ;;  %v1614_v10 = vpop.f32.mrb[131].mxu1  ;;  %v8337_v28 = vld [vmem:[#allocation7 + $0x624] ss:$16 sps:$4 sm:$0xff]  }
 0x268   :  { %v1774_v34 = vmul.f32 0.2, %v1611_v51  ;;  %v1615_v25 = vadd.f32 %v1614_v10, %v9508_v4  ;;  %4340 = vmatprep.mubr.bf16.mxu0 %v9514_v21 }
 0x269   :  { %v1781_v32 = vmul.f32 0.2, %v1613_v17  ;;  %4341 = vmatmul.mubr.bf16.gmra.mrb[124].mxu0 %v9511_v46  ;;  %4880 = vmatmul.mubr.bf16.gmra.mrb[236].mxu1 %v9188_v35  ;;  %v2029_v22 = vmax.f32 %v1609_v39, %v1773_v8 }
 0x26a   :  { %v1782_v27 = vmul.f32 0.2, %v1615_v25  ;;  %4383 = vmatprep.mubr.bf16.mxu0 %v10397_v13  ;;  %4889 = vmatprep.mubr.bf16.mxu1 %v9212_v29  ;;  %v2030_v14 = vmax.f32 %v1611_v51, %v1774_v34  ;;  %v8329_v29 = vld [vmem:[#allocation7 + $0x600] ss:$16 sps:$4 sm:$0xff]  }
 0x26b   :  { %v2037_v41 = vmax.f32 %v1613_v17, %v1781_v32  ;;  %v10398_v17 = vld [vmem:[#allocation24_spill] sm:$0xff]  ;;  %v10399_v34 = vld [vmem:[#allocation29_spill] sm:$0xff] }
 0x26c   :  { %v2038_v56 = vmax.f32 %v1615_v25, %v1782_v27  ;;  %v1618_v58 = vpop.f32.mrb[132].mxu1  ;;  %v8335_v27 = vld [vmem:[#allocation7 + $0x620] ss:$16 sps:$4 sm:$0xff]  }
 0x26d   :  { %v9523_v33 = vpack.c.bf16 %v2037_v41, %v2029_v22  ;;  %v1619_v9 = vadd.f32 %v1618_v58, %v9505_v44  ;;  %v1620_v30 = vpop.f32.mrb[133].mxu1 }
 0x26e   :  { %v1621_v57 = vadd.f32 %v1620_v30, %v9508_v4  ;;  %v1622_v5 = vpop.f32.mrb[134].mxu1  ;;  %v9527_v52 = vpack.c.bf16 %v2038_v56, %v2030_v14  ;;  %v8343_v56 = vld [vmem:[#allocation7 + $0x644] ss:$16 sps:$4 sm:$0xff]  }
 0x26f   :  { %v1789_v35 = vmul.f32 0.2, %v1619_v9  ;;  %v1623_v2 = vadd.f32 %v1622_v5, %v9505_v44  ;;  %v1624_v48 = vpop.f32.mrb[135].mxu1 }
 0x270   :  { %v1790_v39 = vmul.f32 0.2, %v1621_v57  ;;  %v1625_v51 = vadd.f32 %v1624_v48, %v9508_v4 }
 0x271   :  { %v1797_v8 = vmul.f32 0.2, %v1623_v2  ;;  %4384 = vmatmul.mubr.bf16.vlgmr.msra.gmra.mrb[64].mxu0 %v10398_v17  ;;  %4890 = vmatmul.mubr.bf16.gmra.mrb[240].mxu1 %v9208_v59  ;;  %v2045_v25 = vmax.f32 %v1619_v9, %v1789_v35 }
 0x272   :  { %v1798_v10 = vmul.f32 0.2, %v1625_v51  ;;  %4393 = vmatprep.mubr.bf16.mxu0 %v10399_v34  ;;  %4899 = vmatprep.mubr.bf16.mxu1 %v9232_v43  ;;  %v2046_v22 = vmax.f32 %v1621_v57, %v1790_v39  ;;  %v8341_v57 = vld [vmem:[#allocation7 + $0x640] ss:$16 sps:$4 sm:$0xff]   ;;  %v8349_v39 = vld [vmem:[#allocation7 + $0x664] ss:$16 sps:$4 sm:$0xff]  }
 0x273   :  { %v2053_v32 = vmax.f32 %v1623_v2, %v1797_v8  ;;  %4545 = vmatpush1.bf16.msra.mxu0 %v8329_v29 }
 0x274   :  { %v2054_v41 = vmax.f32 %v1625_v51, %v1798_v10  ;;  %v1628_v14 = vpop.f32.mrb[136].mxu1  ;;  %4546 = vmatprep.subr.bf16.mxu0 %v8337_v28  ;;  %v10400_v28 = vld [vmem:[#allocation28_spill] sm:$0xff]  ;;  %v10401_v10 = vld [vmem:[#allocation31_spill] sm:$0xff] }
 0x275   :  { %v1629_v58 = vadd.f32 %v1628_v14, %v9505_v44  ;;  %v1630_v30 = vpop.f32.mrb[137].mxu1  ;;  %v9536_v5 = vpack.c.bf16 %v2053_v32, %v2045_v25 }
 0x276   :  { %v1631_v59 = vadd.f32 %v1630_v30, %v9508_v4  ;;  %v1632_v48 = vpop.f32.mrb[138].mxu1  ;;  %v9539_v55 = vpack.c.bf16 %v2054_v41, %v2046_v22 }
 0x277   :  { %v1805_v43 = vmul.f32 0.2, %v1629_v58  ;;  %v1633_v9 = vadd.f32 %v1632_v48, %v9505_v44  ;;  %v1634_v35 = vpop.f32.mrb[139].mxu1  ;;  %4547 = vmatpush1.bf16.msra.mxu0 %v8335_v27  ;;  %v8347_v27 = vld [vmem:[#allocation7 + $0x660] ss:$16 sps:$4 sm:$0xff]  }
 0x278   :  { %v1806_v2 = vmul.f32 0.2, %v1631_v59  ;;  %v1635_v29 = vadd.f32 %v1634_v35, %v9508_v4  ;;  %4548 = vmatprep.subr.bf16.mxu0 %v8343_v56  ;;  %v8355_v56 = vld [vmem:[#allocation7 + $0x684] ss:$16 sps:$4 sm:$0xff]  }
 0x279   :  { %v1813_v51 = vmul.f32 0.2, %v1633_v9  ;;  %4394 = vmatmul.mubr.bf16.gmra.mrb[68].mxu0 %v10400_v28  ;;  %4900 = vmatmul.mubr.bf16.gmra.mrb[244].mxu1 %v9228_v61  ;;  %v2061_v25 = vmax.f32 %v1629_v58, %v1805_v43 }
 0x27a   :  { %v1814_v8 = vmul.f32 0.2, %v1635_v29  ;;  %4403 = vmatprep.mubr.bf16.mxu0 %v10401_v10  ;;  %4909 = vmatprep.mubr.bf16.mxu1 %v9258_v47  ;;  %v2062_v22 = vmax.f32 %v1631_v59, %v1806_v2  ;;  %v8353_v59 = vld [vmem:[#allocation7 + $0x680] ss:$16 sps:$4 sm:$0xff]   ;;  %v8361_v2 = vld [vmem:[#allocation7 + $0x6a4] ss:$16 sps:$4 sm:$0xff]  }
 0x27b   :  { %v2069_v32 = vmax.f32 %v1633_v9, %v1813_v51  ;;  %4549 = vmatpush1.bf16.msra.mxu0 %v8341_v57 }
 0x27c   :  { %v2070_v41 = vmax.f32 %v1635_v29, %v1814_v8  ;;  %v1638_v14 = vpop.f32.mrb[140].mxu1  ;;  %4550 = vmatprep.subr.bf16.mxu0 %v8349_v39  ;;  %v10402_v39 = vld [vmem:[#allocation30_spill] sm:$0xff]  ;;  %v10403_v8 = vld [vmem:[#allocation33_spill] sm:$0xff] }
 0x27d   :  { %v1639_v30 = vadd.f32 %v1638_v14, %v9505_v44  ;;  %v1640_v48 = vpop.f32.mrb[141].mxu1  ;;  %v9548_v35 = vpack.c.bf16 %v2069_v32, %v2061_v25  ;;  %v8359_v32 = vld [vmem:[#allocation7 + $0x6a0] ss:$16 sps:$4 sm:$0xff]   ;;  %v8367_v14 = vld [vmem:[#allocation7 + $0x6c4] ss:$16 sps:$4 sm:$0xff]  }
 0x27e   :  { %v1641_v61 = vadd.f32 %v1640_v48, %v9508_v4  ;;  %v1642_v28 = vpop.f32.mrb[142].mxu1  ;;  %v9551_v10 = vpack.c.bf16 %v2070_v41, %v2062_v22 }
 0x27f   :  { %v1821_v47 = vmul.f32 0.2, %v1639_v30  ;;  %v1643_v58 = vadd.f32 %v1642_v28, %v9505_v44  ;;  %v1644_v43 = vpop.f32.mrb[143].mxu1  ;;  %4551 = vmatpush1.bf16.msra.mxu0 %v8347_v27 }
 0x280   :  { %v1822_v9 = vmul.f32 0.2, %v1641_v61  ;;  %v1645_v57 = vadd.f32 %v1644_v43, %v9508_v4  ;;  %4552 = vmatprep.subr.bf16.mxu0 %v8355_v56 }
 0x281   :  { %v1829_v29 = vmul.f32 0.2, %v1643_v58  ;;  %4404 = vmatmul.mubr.bf16.gmra.mrb[72].mxu0 %v10402_v39  ;;  %4910 = vmatmul.mubr.bf16.gmra.mrb[248].mxu1 %v9254_v20  ;;  %v2077_v25 = vmax.f32 %v1639_v30, %v1821_v47 }
 0x282   :  { %v1830_v51 = vmul.f32 0.2, %v1645_v57  ;;  %4413 = vmatprep.mubr.bf16.mxu0 %v10403_v8  ;;  %4919 = vmatprep.mubr.bf16.mxu1 %v9291_v1  ;;  %v2078_v27 = vmax.f32 %v1641_v61, %v1822_v9  ;;  %v8365_v61 = vld [vmem:[#allocation7 + $0x6c0] ss:$16 sps:$4 sm:$0xff]   ;;  %v8373_v9 = vld [vmem:[#allocation7 + $0x6e4] ss:$16 sps:$4 sm:$0xff]  }
 0x283   :  { %v2085_v28 = vmax.f32 %v1643_v58, %v1829_v29  ;;  %4553 = vmatpush1.bf16.msra.mxu0 %v8353_v59 }
 0x284   :  { %v2086_v22 = vmax.f32 %v1645_v57, %v1830_v51  ;;  %v1648_v41 = vpop.f32.mrb[144].mxu1  ;;  %4554 = vmatprep.subr.bf16.mxu0 %v8361_v2  ;;  %v10404_v2 = vld [vmem:[#allocation32_spill] sm:$0xff]  ;;  %v10405_v51 = vld [vmem:[#allocation35_spill] sm:$0xff] }
 0x285   :  { %v1649_v56 = vadd.f32 %v1648_v41, %v9505_v44  ;;  %v1650_v48 = vpop.f32.mrb[145].mxu1  ;;  %v9560_v43 = vpack.c.bf16 %v2085_v28, %v2077_v25  ;;  %v8371_v28 = vld [vmem:[#allocation7 + $0x6e0] ss:$16 sps:$4 sm:$0xff]   ;;  %v8379_v41 = vld [vmem:[#allocation7 + $0x704] ss:$16 sps:$4 sm:$0xff]  }
 0x286   :  { %v1651_v20 = vadd.f32 %v1650_v48, %v9508_v4  ;;  %v1652_v39 = vpop.f32.mrb[146].mxu1  ;;  %v9563_v8 = vpack.c.bf16 %v2086_v22, %v2078_v27 }
 0x287   :  { %v1837_v1 = vmul.f32 0.2, %v1649_v56  ;;  %v1653_v30 = vadd.f32 %v1652_v39, %v9505_v44  ;;  %v1654_v47 = vpop.f32.mrb[147].mxu1  ;;  %4555 = vmatpush1.bf16.msra.mxu0 %v8359_v32 }
 0x288   :  { %v1838_v58 = vmul.f32 0.2, %v1651_v20  ;;  %v1655_v59 = vadd.f32 %v1654_v47, %v9508_v4  ;;  %4556 = vmatprep.subr.bf16.mxu0 %v8367_v14 }
 0x289   :  { %v1845_v57 = vmul.f32 0.2, %v1653_v30  ;;  %4414 = vmatmul.mubr.bf16.gmra.mrb[76].mxu0 %v10404_v2  ;;  %4920 = vmatmul.mubr.bf16.gmra.mrb[252].mxu1 %v9287_v19  ;;  %v2093_v25 = vmax.f32 %v1649_v56, %v1837_v1 }
 0x28a   :  { %v1846_v29 = vmul.f32 0.2, %v1655_v59  ;;  %4423 = vmatprep.mubr.bf16.mxu0 %v10405_v51  ;;  %4962 = vmatprep.mubr.bf16.mxu1 %v9313_v38  ;;  %v2094_v32 = vmax.f32 %v1651_v20, %v1838_v58  ;;  %v8332_v51 = vld [vmem:[#allocation7 + $0x408] ss:$16 sps:$4 sm:$0xff]   ;;  %v8377_v20 = vld [vmem:[#allocation7 + $0x700] ss:$16 sps:$4 sm:$0xff]  }
 0x28b   :  { %v2101_v39 = vmax.f32 %v1653_v30, %v1845_v57  ;;  %4557 = vmatpush1.bf16.msra.mxu0 %v8365_v61  ;;  %v8340_v58 = vld [vmem:[#allocation7 + $0x42c] ss:$16 sps:$4 sm:$0xff]  }
 0x28c   :  { %v2102_v27 = vmax.f32 %v1655_v59, %v1846_v29  ;;  %v1658_v22 = vpop.f32.mrb[148].mxu1  ;;  %4558 = vmatprep.subr.bf16.mxu0 %v8373_v9  ;;  %v8385_v59 = vld [vmem:[#allocation7 + $0x724] ss:$16 sps:$4 sm:$0xff]   ;;  %v10406_v57 = vld [vmem:[#allocation34_spill] sm:$0xff] }
 0x28d   :  { %v1659_v14 = vadd.f32 %v1658_v22, %v9505_v44  ;;  %v1660_v48 = vpop.f32.mrb[149].mxu1  ;;  %v9572_v47 = vpack.c.bf16 %v2101_v39, %v2093_v25  ;;  %v10407_v25 = vld [vmem:[#allocation37_spill] sm:$0xff] }
 0x28e   :  { %v1661_v19 = vadd.f32 %v1660_v48, %v9508_v4  ;;  %v1662_v2 = vpop.f32.mrb[150].mxu1  ;;  %v9575_v34 = vpack.c.bf16 %v2102_v27, %v2094_v32  ;;  %v8383_v32 = vld [vmem:[#allocation7 + $0x720] ss:$16 sps:$4 sm:$0xff]   ;;  %v8346_v48 = vld [vmem:[#allocation7 + $0x44c] ss:$16 sps:$4 sm:$0xff]  }
 0x28f   :  { %v1853_v38 = vmul.f32 0.2, %v1659_v14  ;;  %v1663_v56 = vadd.f32 %v1662_v2, %v9505_v44  ;;  %v1664_v1 = vpop.f32.mrb[151].mxu1  ;;  %4559 = vmatpush1.bf16.msra.mxu0 %v8371_v28  ;;  %v8338_v28 = vld [vmem:[#allocation7 + $0x428] ss:$16 sps:$4 sm:$0xff]  }
 0x290   :  { %v1854_v30 = vmul.f32 0.2, %v1661_v19  ;;  %v1665_v61 = vadd.f32 %v1664_v1, %v9508_v4  ;;  %4560 = vmatprep.subr.bf16.mxu0 %v8379_v41  ;;  %v8388_v1 = vld [vmem:[#allocation7 + $0x744] ss:$16 sps:$4 sm:$0xff]  }
 0x291   :  { %v1861_v9 = vmul.f32 0.2, %v1663_v56  ;;  %4424 = vmatmul.mubr.bf16.gmra.mrb[80].mxu0 %v10406_v57  ;;  %4963 = vmatmul.mubr.bf16.vlgmr.msra.gmra.mrb[192].mxu1 %v9308_v15  ;;  %v2109_v2 = vmax.f32 %v1659_v14, %v1853_v38  ;;  %v8344_v38 = vld [vmem:[#allocation7 + $0x448] ss:$16 sps:$4 sm:$0xff]  }
 0x292   :  { %v1862_v29 = vmul.f32 0.2, %v1665_v61  ;;  %4433 = vmatprep.mubr.bf16.mxu0 %v10407_v25  ;;  %4972 = vmatprep.mubr.bf16.mxu1 %v9333_v53  ;;  %v2110_v27 = vmax.f32 %v1661_v19, %v1854_v30  ;;  %v8386_v30 = vld [vmem:[#allocation7 + $0x740] ss:$16 sps:$4 sm:$0xff]  }
 0x293   :  { %v2117_v39 = vmax.f32 %v1663_v56, %v1861_v9  ;;  %5124 = vmatpush1.bf16.msra.mxu1 %v8332_v51  ;;  %4561 = vmatpush1.bf16.msra.mxu0 %v8377_v20  ;;  %v8394_v9 = vld [vmem:[#allocation7 + $0x764] ss:$16 sps:$4 sm:$0xff]  }
 0x294   :  { %v2118_v22 = vmax.f32 %v1665_v61, %v1862_v29  ;;  %v1668_v41 = vpop.f32.mrb[152].mxu1  ;;  %5125 = vmatprep.subr.bf16.mxu1 %v8340_v58  ;;  %4562 = vmatprep.subr.bf16.mxu0 %v8385_v59  ;;  %v8352_v59 = vld [vmem:[#allocation7 + $0x46c] ss:$16 sps:$4 sm:$0xff]  }
 0x295   :  { %v1669_v15 = vadd.f32 %v1668_v41, %v9505_v44  ;;  %v1670_v57 = vpop.f32.mrb[153].mxu1  ;;  %v9584_v17 = vpack.c.bf16 %v2117_v39, %v2109_v2  ;;  %v10409_v39 = vld [vmem:[#allocation39_spill] sm:$0xff] }
 0x296   :  { %v1671_v53 = vadd.f32 %v1670_v57, %v9508_v4  ;;  %v1672_v14 = vpop.f32.mrb[154].mxu1  ;;  %v9587_v51 = vpack.c.bf16 %v2118_v22, %v2110_v27  ;;  %v10408_v57 = vld [vmem:[#allocation36_spill] sm:$0xff]  ;;  %v8392_v22 = vld [vmem:[#allocation7 + $0x760] ss:$16 sps:$4 sm:$0xff]  }
 0x297   :  { %v1869_v56 = vmul.f32 0.2, %v1669_v15  ;;  %v1673_v19 = vadd.f32 %v1672_v14, %v9505_v44  ;;  %v1674_v20 = vpop.f32.mrb[155].mxu1  ;;  %5126 = vmatpush1.bf16.msra.mxu1 %v8338_v28  ;;  %4563 = vmatpush1.bf16.msra.mxu0 %v8383_v32  ;;  %v8350_v27 = vld [vmem:[#allocation7 + $0x468] ss:$16 sps:$4 sm:$0xff]  }
 0x298   :  { %v1870_v61 = vmul.f32 0.2, %v1671_v53  ;;  %v1675_v58 = vadd.f32 %v1674_v20, %v9508_v4  ;;  %5127 = vmatprep.subr.bf16.mxu1 %v8346_v48  ;;  %4564 = vmatprep.subr.bf16.mxu0 %v8388_v1  ;;  %v8358_v14 = vld [vmem:[#allocation7 + $0x48c] ss:$16 sps:$4 sm:$0xff]   ;;  %v8397_v20 = vld [vmem:[#allocation7 + $0x784] ss:$16 sps:$4 sm:$0xff]  }
 0x299   :  { %v1877_v29 = vmul.f32 0.2, %v1673_v19  ;;  %4434 = vmatmul.mubr.bf16.gmra.mrb[84].mxu0 %v10408_v57  ;;  %4973 = vmatmul.mubr.bf16.gmra.mrb[196].mxu1 %v9329_v6  ;;  %v2125_v28 = vmax.f32 %v1669_v15, %v1869_v56  ;;  %v8356_v56 = vld [vmem:[#allocation7 + $0x488] ss:$16 sps:$4 sm:$0xff]  }
 0x29a   :  { %v1878_v2 = vmul.f32 0.2, %v1675_v58  ;;  %4443 = vmatprep.mubr.bf16.mxu0 %v10409_v39  ;;  %4982 = vmatprep.mubr.bf16.mxu1 %v9349_v63  ;;  %v2126_v41 = vmax.f32 %v1671_v53, %v1870_v61  ;;  %v8395_v61 = vld [vmem:[#allocation7 + $0x780] ss:$16 sps:$4 sm:$0xff]  }
 0x29b   :  { %v2133_v32 = vmax.f32 %v1673_v19, %v1877_v29  ;;  %5128 = vmatpush1.bf16.msra.mxu1 %v8344_v38  ;;  %4565 = vmatpush1.bf16.msra.mxu0 %v8386_v30  ;;  %v8403_v29 = vld [vmem:[#allocation7 + $0x7a4] ss:$16 sps:$4 sm:$0xff]  }
 0x29c   :  { %v2134_v48 = vmax.f32 %v1675_v58, %v1878_v2  ;;  %v1678_v1 = vpop.f32.mrb[156].mxu1  ;;  %5129 = vmatprep.subr.bf16.mxu1 %v8352_v59  ;;  %4566 = vmatprep.subr.bf16.mxu0 %v8394_v9  ;;  %v8364_v9 = vld [vmem:[#allocation7 + $0x4ac] ss:$16 sps:$4 sm:$0xff]  }
 0x29d   :  { %v1679_v6 = vadd.f32 %v1678_v1, %v9505_v44  ;;  %v1680_v57 = vpop.f32.mrb[157].mxu1  ;;  %v9596_v25 = vpack.c.bf16 %v2133_v32, %v2125_v28  ;;  %v10411_v32 = vld [vmem:[#allocation41_spill] sm:$0xff] }
 0x29e   :  { %v1681_v63 = vadd.f32 %v1680_v57, %v9508_v4  ;;  %v1682_v15 = vpop.f32.mrb[158].mxu1  ;;  %v9599_v38 = vpack.c.bf16 %v2134_v48, %v2126_v41  ;;  %v10410_v57 = vld [vmem:[#allocation38_spill] sm:$0xff]  ;;  %v8401_v48 = vld [vmem:[#allocation7 + $0x7a0] ss:$16 sps:$4 sm:$0xff]  }
 0x29f   :  { %v1885_v19 = vmul.f32 0.2, %v1679_v6  ;;  %v1683_v53 = vadd.f32 %v1682_v15, %v9505_v44  ;;  %v1684_v30 = vpop.f32.mrb[159].mxu1  ;;  %5130 = vmatpush1.bf16.msra.mxu1 %v8350_v27  ;;  %4567 = vmatpush1.bf16.msra.mxu0 %v8392_v22  ;;  %v8362_v41 = vld [vmem:[#allocation7 + $0x4a8] ss:$16 sps:$4 sm:$0xff]  }
 0x2a0   :  { %v1886_v58 = vmul.f32 0.2, %v1681_v63  ;;  %v1685_v59 = vadd.f32 %v1684_v30, %v9508_v4  ;;  %5131 = vmatprep.subr.bf16.mxu1 %v8358_v14  ;;  %4568 = vmatprep.subr.bf16.mxu0 %v8397_v20  ;;  %v8370_v15 = vld [vmem:[#allocation7 + $0x4cc] ss:$16 sps:$4 sm:$0xff]   ;;  %v8406_v30 = vld [vmem:[#allocation7 + $0x7c4] ss:$16 sps:$4 sm:$0xff]  }
 0x2a1   :  { %v1893_v2 = vmul.f32 0.2, %v1683_v53  ;;  %4444 = vmatmul.mubr.bf16.gmra.mrb[88].mxu0 %v10410_v57  ;;  %4983 = vmatmul.mubr.bf16.gmra.mrb[200].mxu1 %v9346_v0  ;;  %v2141_v27 = vmax.f32 %v1679_v6, %v1885_v19  ;;  %v8368_v19 = vld [vmem:[#allocation7 + $0x4c8] ss:$16 sps:$4 sm:$0xff]  }
 0x2a2   :  { %v1894_v28 = vmul.f32 0.2, %v1685_v59  ;;  %4453 = vmatprep.mubr.bf16.mxu0 %v10411_v32  ;;  %4992 = vmatprep.mubr.bf16.mxu1 %v9361_v60  ;;  %v2142_v1 = vmax.f32 %v1681_v63, %v1886_v58  ;;  %v8404_v58 = vld [vmem:[#allocation7 + $0x7c0] ss:$16 sps:$4 sm:$0xff]  }
 0x2a3   :  { %v2149_v22 = vmax.f32 %v1683_v53, %v1893_v2  ;;  %5132 = vmatpush1.bf16.msra.mxu1 %v8356_v56  ;;  %4569 = vmatpush1.bf16.msra.mxu0 %v8395_v61  ;;  %v8412_v2 = vld [vmem:[#allocation7 + $0x7e4] ss:$16 sps:$4 sm:$0xff]  }
 0x2a4   :  { %v2150_v14 = vmax.f32 %v1685_v59, %v1894_v28  ;;  %v1688_v20 = vpop.f32.mrb[160].mxu1  ;;  %5133 = vmatprep.subr.bf16.mxu1 %v8364_v9  ;;  %4570 = vmatprep.subr.bf16.mxu0 %v8403_v29  ;;  %v8376_v29 = vld [vmem:[#allocation7 + $0x4ec] ss:$16 sps:$4 sm:$0xff]  }
 0x2a5   :  { %v1689_v0 = vadd.f32 %v1688_v20, %v9505_v44  ;;  %v1690_v57 = vpop.f32.mrb[161].mxu1  ;;  %v9608_v39 = vpack.c.bf16 %v2149_v22, %v2141_v27  ;;  %v10413_v22 = vld [vmem:[#allocation43_spill] sm:$0xff] }
 0x2a6   :  { %v1691_v60 = vadd.f32 %v1690_v57, %v9508_v4  ;;  %v1692_v6 = vpop.f32.mrb[162].mxu1  ;;  %v9611_v56 = vpack.c.bf16 %v2150_v14, %v2142_v1  ;;  %v10412_v57 = vld [vmem:[#allocation40_spill] sm:$0xff]  ;;  %v8410_v14 = vld [vmem:[#allocation7 + $0x7e0] ss:$16 sps:$4 sm:$0xff]  }
 0x2a7   :  { %v1901_v53 = vmul.f32 0.2, %v1689_v0  ;;  %v1693_v63 = vadd.f32 %v1692_v6, %v9505_v44  ;;  %v1694_v61 = vpop.f32.mrb[163].mxu1  ;;  %5134 = vmatpush1.bf16.msra.mxu1 %v8362_v41  ;;  %4571 = vmatpush1.bf16.msra.mxu0 %v8401_v48  ;;  %v8374_v1 = vld [vmem:[#allocation7 + $0x4e8] ss:$16 sps:$4 sm:$0xff]  }
 0x2a8   :  { %v1902_v59 = vmul.f32 0.2, %v1691_v60  ;;  %v1695_v9 = vadd.f32 %v1694_v61, %v9508_v4  ;;  %5135 = vmatprep.subr.bf16.mxu1 %v8370_v15  ;;  %4572 = vmatprep.subr.bf16.mxu0 %v8406_v30  ;;  %v8382_v6 = vld [vmem:[#allocation7 + $0x50c] ss:$16 sps:$4 sm:$0xff]  }
 0x2a9   :  { %v1909_v28 = vmul.f32 0.2, %v1693_v63  ;;  %4454 = vmatmul.mubr.bf16.gmra.mrb[92].mxu0 %v10412_v57  ;;  %4993 = vmatmul.mubr.bf16.gmra.mrb[204].mxu1 %v9358_v7  ;;  %v2157_v41 = vmax.f32 %v1689_v0, %v1901_v53 }
 0x2aa   :  { %v1910_v27 = vmul.f32 0.2, %v1695_v9  ;;  %4463 = vmatprep.mubr.bf16.mxu0 %v10413_v22  ;;  %5002 = vmatprep.mubr.bf16.mxu1 %v9373_v42  ;;  %v2158_v20 = vmax.f32 %v1691_v60, %v1902_v59  ;;  %v8380_v60 = vld [vmem:[#allocation7 + $0x508] ss:$16 sps:$4 sm:$0xff]  }
 0x2ab   :  { %v2165_v48 = vmax.f32 %v1693_v63, %v1909_v28  ;;  %5136 = vmatpush1.bf16.msra.mxu1 %v8368_v19  ;;  %4573 = vmatpush1.bf16.msra.mxu0 %v8404_v58 }
 0x2ac   :  { %v2166_v15 = vmax.f32 %v1695_v9, %v1910_v27  ;;  %v1698_v30 = vpop.f32.mrb[164].mxu1  ;;  %5137 = vmatprep.subr.bf16.mxu1 %v8376_v29  ;;  %4574 = vmatprep.subr.bf16.mxu0 %v8412_v2  ;;  %v8391_v9 = vld [vmem:[#allocation7 + $0x52c] ss:$16 sps:$4 sm:$0xff]   ;;  %v10415_v27 = vld [vmem:[#allocation45_spill] sm:$0xff] }
 0x2ad   :  { %v1699_v61 = vadd.f32 %v1698_v30, %v9505_v44  ;;  %v1700_v7 = vpop.f32.mrb[165].mxu1  ;;  %v9620_v57 = vpack.c.bf16 %v2165_v48, %v2157_v41  ;;  %v10414_v2 = vld [vmem:[#allocation42_spill] sm:$0xff] }
 0x2ae   :  { %v1701_v22 = vadd.f32 %v1700_v7, %v9508_v4  ;;  %v1702_v42 = vpop.f32.mrb[166].mxu1  ;;  %v9623_v0 = vpack.c.bf16 %v2166_v15, %v2158_v20  ;;  %v8400_v30 = vld [vmem:[#allocation7 + $0x54c] ss:$16 sps:$4 sm:$0xff]  }
 0x2af   :  { %v1917_v19 = vmul.f32 0.2, %v1699_v61  ;;  %v1703_v53 = vadd.f32 %v1702_v42, %v9505_v44  ;;  %v1704_v63 = vpop.f32.mrb[167].mxu1  ;;  %5138 = vmatpush1.bf16.msra.mxu1 %v8374_v1  ;;  %4575 = vmatpush1.bf16.msra.mxu0 %v8410_v14  ;;  %v8389_v1 = vld [vmem:[#allocation7 + $0x528] ss:$16 sps:$4 sm:$0xff]  }
 0x2b0   :  { %v1918_v58 = vmul.f32 0.2, %v1701_v22  ;;  %v1705_v59 = vadd.f32 %v1704_v63, %v9508_v4  ;;  %5139 = vmatprep.subr.bf16.mxu1 %v8382_v6 }
 0x2b1   :  { %v1925_v29 = vmul.f32 0.2, %v1703_v53  ;;  %4464 = vmatmul.mubr.bf16.gmra.mrb[96].mxu0 %v10414_v2  ;;  %5003 = vmatmul.mubr.bf16.gmra.mrb[208].mxu1 %v9370_v18  ;;  %v2173_v41 = vmax.f32 %v1699_v61, %v1917_v19 }
 0x2b2   :  { %v1926_v28 = vmul.f32 0.2, %v1705_v59  ;;  %4473 = vmatprep.mubr.bf16.mxu0 %v10415_v27  ;;  %5012 = vmatprep.mubr.bf16.mxu1 %v9385_v16  ;;  %v2174_v14 = vmax.f32 %v1701_v22, %v1918_v58  ;;  %v8398_v22 = vld [vmem:[#allocation7 + $0x548] ss:$16 sps:$4 sm:$0xff]   ;;  %v8409_v58 = vld [vmem:[#allocation7 + $0x56c] ss:$16 sps:$4 sm:$0xff]  }
 0x2b3   :  { %v2181_v48 = vmax.f32 %v1703_v53, %v1925_v29  ;;  %5140 = vmatpush1.bf16.msra.mxu1 %v8380_v60  ;;  %v10417_v29 = vld [vmem:[#allocation14_spill] sm:$0xff] }
 0x2b4   :  { %v2182_v20 = vmax.f32 %v1705_v59, %v1926_v28  ;;  %v1708_v15 = vpop.f32.mrb[168].mxu1  ;;  %5141 = vmatprep.subr.bf16.mxu1 %v8391_v9  ;;  %v10416_v9 = vld [vmem:[#allocation44_spill] sm:$0xff] }
 0x2b5   :  { %v1709_v6 = vadd.f32 %v1708_v15, %v9505_v44  ;;  %v1710_v7 = vpop.f32.mrb[169].mxu1  ;;  %v9632_v42 = vpack.c.bf16 %v2181_v48, %v2173_v41  ;;  %v10418_v41 = vld [vmem:[#allocation47_spill] sm:$0xff]  ;;  %v10419_v48 = vld [vmem:[#allocation18_spill] sm:$0xff] }
 0x2b6   :  { %v1711_v18 = vadd.f32 %v1710_v7, %v9508_v4  ;;  %v1712_v63 = vpop.f32.mrb[170].mxu1  ;;  %v9635_v27 = vpack.c.bf16 %v2182_v20, %v2174_v14 }
 0x2b7   :  { %v1933_v16 = vmul.f32 0.2, %v1709_v6  ;;  %v1713_v61 = vadd.f32 %v1712_v63, %v9505_v44  ;;  %v1714_v19 = vpop.f32.mrb[171].mxu1  ;;  %5142 = vmatpush1.bf16.msra.mxu1 %v8389_v1  ;;  %v8407_v1 = vld [vmem:[#allocation7 + $0x568] ss:$16 sps:$4 sm:$0xff]  }
 0x2b8   :  { %v1934_v53 = vmul.f32 0.2, %v1711_v18  ;;  %v1715_v60 = vadd.f32 %v1714_v19, %v9508_v4  ;;  %5143 = vmatprep.subr.bf16.mxu1 %v8400_v30  ;;  %v8415_v30 = vld [vmem:[#allocation7 + $0x58c] ss:$16 sps:$4 sm:$0xff]  }
 0x2b9   :  { %v1941_v59 = vmul.f32 0.2, %v1713_v61  ;;  %4474 = vmatmul.mubr.bf16.gmra.mrb[100].mxu0 %v10416_v9  ;;  %5013 = vmatmul.mubr.bf16.gmra.mrb[212].mxu1 %v10417_v29  ;;  %v2189_v14 = vmax.f32 %v1709_v6, %v1933_v16 }
 0x2ba   :  { %v1942_v28 = vmul.f32 0.2, %v1715_v60  ;;  %4483 = vmatprep.mubr.bf16.mxu0 %v10418_v41  ;;  %5022 = vmatprep.mubr.bf16.mxu1 %v10419_v48  ;;  %v2190_v15 = vmax.f32 %v1711_v18, %v1934_v53  ;;  %v8413_v18 = vld [vmem:[#allocation7 + $0x588] ss:$16 sps:$4 sm:$0xff]   ;;  %v8418_v53 = vld [vmem:[#allocation7 + $0x5ac] ss:$16 sps:$4 sm:$0xff]  }
 0x2bb   :  { %v2197_v20 = vmax.f32 %v1713_v61, %v1941_v59  ;;  %5144 = vmatpush1.bf16.msra.mxu1 %v8398_v22  ;;  %v10422_v59 = vld [vmem:[#allocation19_spill] sm:$0xff] }
 0x2bc   :  { %v2198_v7 = vmax.f32 %v1715_v60, %v1942_v28  ;;  %v1718_v63 = vpop.f32.mrb[172].mxu1  ;;  %5145 = vmatprep.subr.bf16.mxu1 %v8409_v58  ;;  %v10421_v58 = vld [vmem:[#allocation46_spill] sm:$0xff]  ;;  %v10423_v28 = vld [vmem:[#allocation49_spill] sm:$0xff] }
 0x2bd   :  { %v1719_v19 = vadd.f32 %v1718_v63, %v9505_v44  ;;  %v1720_v2 = vpop.f32.mrb[173].mxu1  ;;  %v9644_v9 = vpack.c.bf16 %v2197_v20, %v2189_v14  ;;  %v8416_v20 = vld [vmem:[#allocation7 + $0x5a8] ss:$16 sps:$4 sm:$0xff]   ;;  %v8421_v63 = vld [vmem:[#allocation7 + $0x5cc] ss:$16 sps:$4 sm:$0xff]  }
 0x2be   :  { %v1721_v29 = vadd.f32 %v1720_v2, %v9508_v4  ;;  %v1722_v32 = vpop.f32.mrb[174].mxu1  ;;  %v9647_v41 = vpack.c.bf16 %v2198_v7, %v2190_v15 }
 0x2bf   :  { %10420 = vst [vmem:[#allocation20_spill] sm:$0xff] %v9644_v9  ;;  %v1949_v48 = vmul.f32 0.2, %v1719_v19  ;;  %v1723_v6 = vadd.f32 %v1722_v32, %v9505_v44  ;;  %v1724_v16 = vpop.f32.mrb[175].mxu1  ;;  %5146 = vmatpush1.bf16.msra.mxu1 %v8407_v1 }
 0x2c0   :  { %v1950_v61 = vmul.f32 0.2, %v1721_v29  ;;  %v1725_v22 = vadd.f32 %v1724_v16, %v9508_v4  ;;  %5147 = vmatprep.subr.bf16.mxu1 %v8415_v30 }
 0x2c1   :  { %v1957_v60 = vmul.f32 0.2, %v1723_v6  ;;  %4484 = vmatmul.mubr.bf16.gmra.mrb[104].mxu0 %v10421_v58  ;;  %5023 = vmatmul.mubr.bf16.gmra.mrb[216].mxu1 %v10422_v59  ;;  %v2205_v14 = vmax.f32 %v1719_v19, %v1949_v48 }
 0x2c2   :  { %v1958_v2 = vmul.f32 0.2, %v1725_v22  ;;  %4493 = vmatprep.mubr.bf16.mxu0 %v10423_v28  ;;  %5032 = vmatprep.mubr.bf16.mxu1 %v9409_v12  ;;  %v2206_v1 = vmax.f32 %v1721_v29, %v1950_v61  ;;  %v8419_v29 = vld [vmem:[#allocation7 + $0x5c8] ss:$16 sps:$4 sm:$0xff]   ;;  %v8424_v61 = vld [vmem:[#allocation7 + $0x5ec] ss:$16 sps:$4 sm:$0xff]  }
 0x2c3   :  { %v2213_v32 = vmax.f32 %v1723_v6, %v1957_v60  ;;  %5148 = vmatpush1.bf16.msra.mxu1 %v8413_v18  ;;  %v10426_v60 = vld [vmem:[#allocation21_spill] sm:$0xff] }
 0x2c4   :  { %v2214_v15 = vmax.f32 %v1725_v22, %v1958_v2  ;;  %v1728_v7 = vpop.f32.mrb[176].mxu1  ;;  %5149 = vmatprep.subr.bf16.mxu1 %v8418_v53  ;;  %v10425_v53 = vld [vmem:[#allocation48_spill] sm:$0xff] }
 0x2c5   :  { %v1729_v30 = vadd.f32 %v1728_v7, %v9505_v44  ;;  %v1730_v16 = vpop.f32.mrb[177].mxu1  ;;  %v9656_v58 = vpack.c.bf16 %v2213_v32, %v2205_v14  ;;  %v10427_v14 = vld [vmem:[#allocation50_spill] sm:$0xff] }
 0x2c6   :  { %v1731_v59 = vadd.f32 %v1730_v16, %v9508_v4  ;;  %v1732_v9 = vpop.f32.mrb[178].mxu1  ;;  %v9659_v28 = vpack.c.bf16 %v2214_v15, %v2206_v1 }
 0x2c7   :  { %10424 = vst [vmem:[#allocation23_spill] sm:$0xff] %v9656_v58  ;;  %v1965_v12 = vmul.f32 0.2, %v1729_v30  ;;  %v1733_v19 = vadd.f32 %v1732_v9, %v9505_v44  ;;  %v1734_v48 = vpop.f32.mrb[179].mxu1  ;;  %5150 = vmatpush1.bf16.msra.mxu1 %v8416_v20  ;;  %v8422_v20 = vld [vmem:[#allocation7 + $0x5e8] ss:$16 sps:$4 sm:$0xff]  }
 0x2c8   :  { %v1966_v6 = vmul.f32 0.2, %v1731_v59  ;;  %v1735_v18 = vadd.f32 %v1734_v48, %v9508_v4  ;;  %5151 = vmatprep.subr.bf16.mxu1 %v8421_v63  ;;  %v8427_v63 = vld [vmem:[#allocation7 + $0x60c] ss:$16 sps:$4 sm:$0xff]  }
 0x2c9   :  { %v1973_v22 = vmul.f32 0.2, %v1733_v19  ;;  %4494 = vmatmul.mubr.bf16.gmra.mrb[108].mxu0 %v10425_v53  ;;  %5033 = vmatmul.mubr.bf16.gmra.mrb[220].mxu1 %v10426_v60  ;;  %v2221_v32 = vmax.f32 %v1729_v30, %v1965_v12 }
 0x2ca   :  { %v1974_v2 = vmul.f32 0.2, %v1735_v18  ;;  %4503 = vmatprep.mubr.bf16.mxu0 %v10427_v14  ;;  %5042 = vmatprep.mubr.bf16.mxu1 %v9421_v49  ;;  %v2222_v1 = vmax.f32 %v1731_v59, %v1966_v6  ;;  %v10428_v6 = vld [vmem:[#allocation51_spill] sm:$0xff] }
 0x2cb   :  { %v2229_v9 = vmax.f32 %v1733_v19, %v1973_v22  ;;  %5152 = vmatpush1.bf16.msra.mxu1 %v8419_v29 }
 0x2cc   :  { %v2230_v15 = vmax.f32 %v1735_v18, %v1974_v2  ;;  %v1738_v7 = vpop.f32.mrb[180].mxu1  ;;  %5153 = vmatprep.subr.bf16.mxu1 %v8424_v61  ;;  %v10429_v61 = vld [vmem:[#allocation53_spill] sm:$0xff] }
 0x2cd   :  { %v1739_v16 = vadd.f32 %v1738_v7, %v9505_v44  ;;  %v1740_v48 = vpop.f32.mrb[181].mxu1  ;;  %v9668_v53 = vpack.c.bf16 %v2229_v9, %v2221_v32 }
 0x2ce   :  { %v1741_v60 = vadd.f32 %v1740_v48, %v9508_v4  ;;  %v1742_v58 = vpop.f32.mrb[182].mxu1  ;;  %v9671_v14 = vpack.c.bf16 %v2230_v15, %v2222_v1 }
 0x2cf   :  { %v1981_v49 = vmul.f32 0.2, %v1739_v16  ;;  %v1743_v30 = vadd.f32 %v1742_v58, %v9505_v44  ;;  %v1744_v12 = vpop.f32.mrb[183].mxu1  ;;  %5154 = vmatpush1.bf16.msra.mxu1 %v8422_v20 }
 0x2d0   :  { %v1982_v59 = vmul.f32 0.2, %v1741_v60  ;;  %v1745_v19 = vadd.f32 %v1744_v12, %v9508_v4  ;;  %5316 = vmatprep.subr.bf16.mxu1 %v8427_v63 }
 0x2d1   :  { %v1989_v29 = vmul.f32 0.2, %v1743_v30  ;;  %4504 = vmatmul.mubr.bf16.gmra.mrb[112].mxu0 %v10428_v6  ;;  %5043 = vmatmul.mubr.bf16.gmra.mrb[224].mxu1 %v9418_v11  ;;  %v2237_v22 = vmax.f32 %v1739_v16, %v1981_v49  ;;  %v10430_v49 = vld [vmem:[#allocation52_spill] sm:$0xff] }
 0x2d2   :  { %v1990_v18 = vmul.f32 0.2, %v1745_v19  ;;  %4513 = vmatprep.mubr.bf16.mxu0 %v10429_v61  ;;  %5052 = vmatprep.mubr.bf16.mxu1 %v9433_v54  ;;  %v2238_v32 = vmax.f32 %v1741_v60, %v1982_v59  ;;  %v10431_v59 = vld [vmem:[#allocation55_spill] sm:$0xff] }
 0x2d3   :  { %v2245_v2 = vmax.f32 %v1743_v30, %v1989_v29 }
 0x2d4   :  { %v2246_v58 = vmax.f32 %v1745_v19, %v1990_v18  ;;  %v1748_v9 = vpop.f32.mrb[184].mxu1 }
 0x2d5   :  { %v1749_v20 = vadd.f32 %v1748_v9, %v9505_v44  ;;  %v1750_v1 = vpop.f32.mrb[185].mxu1  ;;  %v9680_v15 = vpack.c.bf16 %v2245_v2, %v2237_v22 }
 0x2d6   :  { %v1751_v7 = vadd.f32 %v1750_v1, %v9508_v4  ;;  %v1752_v63 = vpop.f32.mrb[186].mxu1  ;;  %v9683_v48 = vpack.c.bf16 %v2246_v58, %v2238_v32 }
 0x2d7   :  { %v1997_v11 = vmul.f32 0.2, %v1749_v20  ;;  %v1753_v12 = vadd.f32 %v1752_v63, %v9505_v44  ;;  %v1754_v61 = vpop.f32.mrb[187].mxu1 }
 0x2d8   :  { %v1998_v54 = vmul.f32 0.2, %v1751_v7  ;;  %v1755_v16 = vadd.f32 %v1754_v61, %v9508_v4 }
 0x2d9   :  { %v2005_v60 = vmul.f32 0.2, %v1753_v12  ;;  %4514 = vmatmul.mubr.bf16.gmra.mrb[116].mxu0 %v10430_v49  ;;  %5053 = vmatmul.mubr.bf16.gmra.mrb[228].mxu1 %v9430_v37  ;;  %v2253_v19 = vmax.f32 %v1749_v20, %v1997_v11  ;;  %v10432_v11 = vld [vmem:[#allocation54_spill] sm:$0xff] }
 0x2da   :  { %v2006_v30 = vmul.f32 0.2, %v1755_v16  ;;  %4523 = vmatprep.mubr.bf16.mxu0 %v10431_v59  ;;  %5062 = vmatprep.mubr.bf16.mxu1 %v9445_v40  ;;  %v2254_v18 = vmax.f32 %v1751_v7, %v1998_v54  ;;  %v10433_v54 = vld [vmem:[#allocation56_spill] sm:$0xff] }
 0x2db   :  { %v2261_v29 = vmax.f32 %v1753_v12, %v2005_v60 }
 0x2dc   :  { %v2262_v22 = vmax.f32 %v1755_v16, %v2006_v30  ;;  %v1758_v2 = vpop.f32.mrb[188].mxu1 }
 0x2dd   :  { %v1759_v32 = vadd.f32 %v1758_v2, %v9505_v44  ;;  %v1760_v58 = vpop.f32.mrb[189].mxu1  ;;  %v9692_v9 = vpack.c.bf16 %v2261_v29, %v2253_v19  ;;  %v8431_v2 = vld [vmem:[#allocation7 + $0x648] ss:$16 sps:$4 sm:$0xff]  }
 0x2de   :  { %v1761_v61 = vadd.f32 %v1760_v58, %v9508_v4  ;;  %v1762_v1 = vpop.f32.mrb[190].mxu1  ;;  %v9695_v63 = vpack.c.bf16 %v2262_v22, %v2254_v18  ;;  %v10434_v18 = vld [vmem:[#allocation13_spill] sm:$0xff]  ;;  %v10437_v58 = vld [vmem:[#allocation28_spill] sm:$0xff] }
 0x2df   :  { %v2013_v37 = vmul.f32 0.2, %v1759_v32  ;;  %v1763_v59 = vadd.f32 %v1762_v1, %v9505_v44  ;;  %v1764_v49 = vpop.f32.mrb[191].mxu1  ;;  %v10436_v22 = vld [vmem:[#allocation29_spill] sm:$0xff]  ;;  %v8490_v1 = vld [vmem:[#allocation8 + $0x54] ss:$8 sps:$4 sm:$0xff]  }
 0x2e0   :  { %v2014_v40 = vmul.f32 0.2, %v1761_v61  ;;  %v1765_v20 = vadd.f32 %v1764_v49, %v9508_v4  ;;  %v8430_v4 = vld [vmem:[#allocation7 + $0x62c] ss:$16 sps:$4 sm:$0xff]   ;;  %v8485_v49 = vld [vmem:[#allocation8 + $0x40] ss:$8 sps:$4 sm:$0xff]  }
 0x2e1   :  { %v2021_v7 = vmul.f32 0.2, %v1763_v59  ;;  %4524 = vmatmul.mubr.bf16.gmra.mrb[120].mxu0 %v10432_v11  ;;  %5063 = vmatmul.mubr.bf16.gmra.mrb[232].mxu1 %v9442_v45  ;;  %v2269_v16 = vmax.f32 %v1759_v32, %v2013_v37  ;;  %v8464_v45 = vld [vmem:[#allocation8] ss:$8 sps:$4 sm:$0xff]   ;;  %v8436_v32 = vld [vmem:[#allocation7 + $0x66c] ss:$16 sps:$4 sm:$0xff]  }
 0x2e2   :  { %v2022_v12 = vmul.f32 0.2, %v1765_v20  ;;  %4533 = vmatprep.mubr.bf16.mxu0 %v10433_v54  ;;  %5072 = vmatprep.mubr.bf16.mxu1 %v9457_v62  ;;  %v2270_v30 = vmax.f32 %v1761_v61, %v2014_v40  ;;  %v8466_v62 = vld [vmem:[#allocation8 + $0x4] ss:$8 sps:$4 sm:$0xff]   ;;  %v8488_v61 = vld [vmem:[#allocation8 + $0x50] ss:$8 sps:$4 sm:$0xff]  }
 0x2e3   :  { %v2277_v60 = vmax.f32 %v1763_v59, %v2021_v7  ;;  %6225 = vmatprep.subr.bf16.mxu0 %v8466_v62  ;;  %v8487_v59 = vld [vmem:[#allocation8 + $0x44] ss:$8 sps:$4 sm:$0xff]   ;;  %v10438_v37 = vld [vmem:[#allocation31_spill] sm:$0xff]  ;;  %v8434_v40 = vld [vmem:[#allocation7 + $0x668] ss:$16 sps:$4 sm:$0xff]  }
 0x2e4   :  { %v2278_v19 = vmax.f32 %v1765_v20, %v2022_v12  ;;  %v8439_v20 = vld [vmem:[#allocation7 + $0x68c] ss:$16 sps:$4 sm:$0xff]   ;;  %v8437_v7 = vld [vmem:[#allocation7 + $0x688] ss:$16 sps:$4 sm:$0xff]  }
 0x2e5   :  { %v9703_v29 = vpack.c.bf16 %v2277_v60, %v2269_v16  ;;  %v8442_v12 = vld [vmem:[#allocation7 + $0x6ac] ss:$16 sps:$4 sm:$0xff]   ;;  %v8491_v60 = vld [vmem:[#allocation8 + $0x60] ss:$8 sps:$4 sm:$0xff]  }
 0x2e6   :  { %v9705_v44 = vpack.c.bf16 %v2278_v19, %v2270_v30  ;;  %v10439_v16 = vld [vmem:[#allocation30_spill] sm:$0xff]  ;;  %v10440_v19 = vld [vmem:[#allocation33_spill] sm:$0xff] }
 0x2e7   :  { %v8493_v30 = vld [vmem:[#allocation8 + $0x64] ss:$8 sps:$4 sm:$0xff]  }
 0x2e8   :  { %v8445_v62 = vld [vmem:[#allocation7 + $0x6cc] ss:$16 sps:$4 sm:$0xff]  }
 0x2e9   :  { %4534 = vmatmul.mubr.bf16.gmra.mrb[124].mxu0 %v10434_v18  ;;  %5073 = vmatmul.mubr.bf16.gmra.mrb[236].mxu1 %v9454_v36  ;;  %v8470_v36 = vld [vmem:[#allocation8 + $0x10] ss:$8 sps:$4 sm:$0xff]  }
 0x2ea   :  { %4576 = vmatprep.mubr.bf16.mxu0 %v9527_v52  ;;  %5082 = vmatprep.mubr.bf16.mxu1 %v9469_v3  ;;  %v8472_v3 = vld [vmem:[#allocation8 + $0x14] ss:$8 sps:$4 sm:$0xff]  }
 0x2f1   :  { %4577 = vmatmul.mubr.bf16.vlgmr.msra.gmra.mrb[64].mxu0 %v9523_v33  ;;  %5083 = vmatmul.mubr.bf16.gmra.mrb[240].mxu1 %v9466_v24  ;;  %v8476_v24 = vld [vmem:[#allocation8 + $0x20] ss:$8 sps:$4 sm:$0xff]  }
 0x2f2   :  { %4586 = vmatprep.mubr.bf16.mxu0 %v9539_v55  ;;  %5092 = vmatprep.mubr.bf16.mxu1 %v9481_v50  ;;  %v8478_v50 = vld [vmem:[#allocation8 + $0x24] ss:$8 sps:$4 sm:$0xff]  }
 0x2f3   :  { %6226 = vmatpush1.bf16.msra.mxu0 %v8464_v45  ;;  %v8440_v45 = vld [vmem:[#allocation7 + $0x6a8] ss:$16 sps:$4 sm:$0xff]  }
 0x2f4   :  { %6227 = vmatprep.subr.bf16.mxu0 %v8472_v3  ;;  %v8448_v3 = vld [vmem:[#allocation7 + $0x6ec] ss:$16 sps:$4 sm:$0xff]  }
 0x2f7   :  { %6228 = vmatpush1.bf16.msra.mxu0 %v8470_v36  ;;  %v8443_v36 = vld [vmem:[#allocation7 + $0x6c8] ss:$16 sps:$4 sm:$0xff]  }
 0x2f8   :  { %6229 = vmatprep.subr.bf16.mxu0 %v8478_v50  ;;  %v8494_v50 = vld [vmem:[#allocation8 + $0x70] ss:$8 sps:$4 sm:$0xff]  }
 0x2f9   :  { %4587 = vmatmul.mubr.bf16.gmra.mrb[68].mxu0 %v9536_v5  ;;  %5093 = vmatmul.mubr.bf16.gmra.mrb[244].mxu1 %v9478_v31  ;;  %v8482_v31 = vld [vmem:[#allocation8 + $0x30] ss:$8 sps:$4 sm:$0xff]  }
 0x2fa   :  { %4596 = vmatprep.mubr.bf16.mxu0 %v9551_v10  ;;  %5102 = vmatprep.mubr.bf16.mxu1 %v9494_v26  ;;  %v8484_v26 = vld [vmem:[#allocation8 + $0x34] ss:$8 sps:$4 sm:$0xff]  }
 0x2fb   :  { %6230 = vmatpush1.bf16.msra.mxu0 %v8476_v24  ;;  %v10441_v24 = vld [vmem:[#allocation32_spill] sm:$0xff] }
 0x2fc   :  { %6231 = vmatprep.subr.bf16.mxu0 %v8484_v26  ;;  %v10442_v26 = vld [vmem:[#allocation35_spill] sm:$0xff] }
 0x2ff   :  { %6232 = vmatpush1.bf16.msra.mxu0 %v8482_v31  ;;  %v8496_v31 = vld [vmem:[#allocation8 + $0x74] ss:$8 sps:$4 sm:$0xff]  }
 0x300   :  { %6233 = vmatprep.subr.bf16.mxu0 %v8487_v59  ;;  %v8454_v59 = vld [vmem:[#allocation7 + $0x72c] ss:$16 sps:$4 sm:$0xff]  }
 0x301   :  { %4597 = vmatmul.mubr.bf16.gmra.mrb[72].mxu0 %v9548_v35  ;;  %5103 = vmatmul.mubr.bf16.gmra.mrb[248].mxu1 %v9490_v23  ;;  %v8425_v23 = vld [vmem:[#allocation7 + $0x608] ss:$16 sps:$4 sm:$0xff]  }
 0x302   :  { %4606 = vmatprep.mubr.bf16.mxu0 %v9563_v8  ;;  %5112 = vmatprep.mubr.bf16.mxu1 %v9514_v21  ;;  %v10435_v21 = vld [vmem:[#allocation24_spill] sm:$0xff] }
 0x303   :  { %6234 = vmatpush1.bf16.msra.mxu0 %v8485_v49  ;;  %v8499_v49 = vld [vmem:[#allocation8 + $0x84] ss:$8 sps:$4 sm:$0xff]  }
 0x304   :  { %6235 = vmatprep.subr.bf16.mxu0 %v8490_v1  ;;  %v8455_v1 = vld [vmem:[#allocation7 + $0x748] ss:$16 sps:$4 sm:$0xff]  }
 0x307   :  { %6236 = vmatpush1.bf16.msra.mxu0 %v8488_v61  ;;  %v8500_v61 = vld [vmem:[#allocation8 + $0x90] ss:$8 sps:$4 sm:$0xff]  }
 0x308   :  { %6237 = vmatprep.subr.bf16.mxu0 %v8493_v30  ;;  %v8463_v30 = vld [vmem:[#allocation7 + $0x78c] ss:$16 sps:$4 sm:$0xff]  }
 0x309   :  { %4607 = vmatmul.mubr.bf16.gmra.mrb[76].mxu0 %v9560_v43  ;;  %5113 = vmatmul.mubr.bf16.gmra.mrb[252].mxu1 %v9511_v46  ;;  %v8428_v46 = vld [vmem:[#allocation7 + $0x628] ss:$16 sps:$4 sm:$0xff]  }
 0x30a   :  { %4616 = vmatprep.mubr.bf16.mxu0 %v9575_v34  ;;  %5155 = vmatprep.mubr.bf16.mxu1 %v10397_v13  ;;  %v8433_v13 = vld [vmem:[#allocation7 + $0x64c] ss:$16 sps:$4 sm:$0xff]  }
 0x30b   :  { %6238 = vmatpush1.bf16.msra.mxu0 %v8491_v60  ;;  %v8458_v60 = vld [vmem:[#allocation7 + $0x768] ss:$16 sps:$4 sm:$0xff]  }
 0x30c   :  { %6239 = vmatprep.subr.bf16.mxu0 %v8496_v31  ;;  %v10449_v31 = vld [vmem:[#allocation41_spill] sm:$0xff] }
 0x30f   :  { %6240 = vmatpush1.bf16.msra.mxu0 %v8494_v50  ;;  %v10448_v50 = vld [vmem:[#allocation38_spill] sm:$0xff] }
 0x310   :  { %6241 = vmatprep.subr.bf16.mxu0 %v8499_v49  ;;  %v8473_v49 = vld [vmem:[#allocation7 + $0x7c8] ss:$16 sps:$4 sm:$0xff]  }
 0x311   :  { %4617 = vmatmul.mubr.bf16.gmra.mrb[80].mxu0 %v9572_v47  ;;  %5156 = vmatmul.mubr.bf16.vlgmr.msra.gmra.mrb[192].mxu1 %v10435_v21  ;;  %v8449_v21 = vld [vmem:[#allocation7 + $0x708] ss:$16 sps:$4 sm:$0xff]  }
 0x312   :  { %4626 = vmatprep.mubr.bf16.mxu0 %v9587_v51  ;;  %5165 = vmatprep.mubr.bf16.mxu1 %v10436_v22  ;;  %v8497_v22 = vld [vmem:[#allocation8 + $0x80] ss:$8 sps:$4 sm:$0xff]  }
 0x313   :  { %5317 = vmatpush1.bf16.msra.mxu1 %v8425_v23  ;;  %v8446_v23 = vld [vmem:[#allocation7 + $0x6e8] ss:$16 sps:$4 sm:$0xff]   ;;  %6242 = vmatpush1.bf16.msra.mxu0 %v8497_v22  ;;  %v8481_v22 = vld [vmem:[#allocation7 + $0x7ec] ss:$16 sps:$4 sm:$0xff]  }
 0x314   :  { %5318 = vmatprep.subr.bf16.mxu1 %v8430_v4  ;;  %v8451_v4 = vld [vmem:[#allocation7 + $0x70c] ss:$16 sps:$4 sm:$0xff]  }
 0x317   :  { %5319 = vmatpush1.bf16.msra.mxu1 %v8428_v46  ;;  %v10443_v46 = vld [vmem:[#allocation34_spill] sm:$0xff] }
 0x318   :  { %5320 = vmatprep.subr.bf16.mxu1 %v8433_v13  ;;  %v10444_v13 = vld [vmem:[#allocation37_spill] sm:$0xff] }
 0x319   :  { %4627 = vmatmul.mubr.bf16.gmra.mrb[84].mxu0 %v9584_v17  ;;  %5166 = vmatmul.mubr.bf16.gmra.mrb[196].mxu1 %v10437_v58  ;;  %v8457_v58 = vld [vmem:[#allocation7 + $0x74c] ss:$16 sps:$4 sm:$0xff]  }
 0x31a   :  { %4636 = vmatprep.mubr.bf16.mxu0 %v9599_v38  ;;  %5175 = vmatprep.mubr.bf16.mxu1 %v10438_v37  ;;  %v8505_v37 = vld [vmem:[#allocation8 + $0xa4] ss:$8 sps:$4 sm:$0xff]  }
 0x31b   :  { %5321 = vmatpush1.bf16.msra.mxu1 %v8431_v2  ;;  %v8502_v2 = vld [vmem:[#allocation8 + $0x94] ss:$8 sps:$4 sm:$0xff]  }
 0x31c   :  { %5322 = vmatprep.subr.bf16.mxu1 %v8436_v32  ;;  %v8452_v32 = vld [vmem:[#allocation7 + $0x728] ss:$16 sps:$4 sm:$0xff]   ;;  %6243 = vmatprep.subr.bf16.mxu0 %v8502_v2 }
 0x31d   :  { %6244 = vmatpush1.bf16.msra.mxu0 %v8500_v61  ;;  %v10451_v2 = vld [vmem:[#allocation40_spill] sm:$0xff] }
 0x31e   :  { %6245 = vmatprep.subr.bf16.mxu0 %v8505_v37  ;;  %v8520_v61 = vld [vmem:[#allocation8 + $0xf4] ss:$8 sps:$4 sm:$0xff]   ;;  %v10453_v37 = vld [vmem:[#allocation42_spill] sm:$0xff] }
 0x31f   :  { %5323 = vmatpush1.bf16.msra.mxu1 %v8434_v40  ;;  %v8460_v40 = vld [vmem:[#allocation7 + $0x76c] ss:$16 sps:$4 sm:$0xff]  }
 0x320   :  { %5324 = vmatprep.subr.bf16.mxu1 %v8439_v20  ;;  %v8503_v20 = vld [vmem:[#allocation8 + $0xa0] ss:$8 sps:$4 sm:$0xff]  }
 0x321   :  { %4637 = vmatmul.mubr.bf16.gmra.mrb[88].mxu0 %v9596_v25  ;;  %5176 = vmatmul.mubr.bf16.gmra.mrb[200].mxu1 %v10439_v16  ;;  %v8508_v16 = vld [vmem:[#allocation8 + $0xb4] ss:$8 sps:$4 sm:$0xff]  }
 0x322   :  { %4646 = vmatprep.mubr.bf16.mxu0 %v9611_v56  ;;  %5185 = vmatprep.mubr.bf16.mxu1 %v10440_v19  ;;  %v8506_v19 = vld [vmem:[#allocation8 + $0xb0] ss:$8 sps:$4 sm:$0xff]  }
 0x323   :  { %5325 = vmatpush1.bf16.msra.mxu1 %v8437_v7  ;;  %v10445_v7 = vld [vmem:[#allocation36_spill] sm:$0xff]  ;;  %6246 = vmatpush1.bf16.msra.mxu0 %v8503_v20 }
 0x324   :  { %5326 = vmatprep.subr.bf16.mxu1 %v8442_v12  ;;  %v10446_v12 = vld [vmem:[#allocation39_spill] sm:$0xff]  ;;  %6247 = vmatprep.subr.bf16.mxu0 %v8508_v16  ;;  %v10455_v20 = vld [vmem:[#allocation44_spill] sm:$0xff]  ;;  %v10458_v16 = vld [vmem:[#allocation49_spill] sm:$0xff] }
 0x327   :  { %5327 = vmatpush1.bf16.msra.mxu1 %v8440_v45  ;;  %v8461_v45 = vld [vmem:[#allocation7 + $0x788] ss:$16 sps:$4 sm:$0xff]   ;;  %6248 = vmatpush1.bf16.msra.mxu0 %v8506_v19  ;;  %v10461_v19 = vld [vmem:[#allocation53_spill] sm:$0xff] }
 0x328   :  { %5328 = vmatprep.subr.bf16.mxu1 %v8445_v62  ;;  %v8511_v62 = vld [vmem:[#allocation8 + $0xc4] ss:$8 sps:$4 sm:$0xff]  }
 0x329   :  { %4647 = vmatmul.mubr.bf16.gmra.mrb[92].mxu0 %v9608_v39  ;;  %5186 = vmatmul.mubr.bf16.gmra.mrb[204].mxu1 %v10441_v24  ;;  %v10447_v24 = vld [vmem:[#allocation20_spill] sm:$0xff] }
 0x32a   :  { %4656 = vmatprep.mubr.bf16.mxu0 %v9623_v0  ;;  %5195 = vmatprep.mubr.bf16.mxu1 %v10442_v26  ;;  %v8467_v26 = vld [vmem:[#allocation7 + $0x7a8] ss:$16 sps:$4 sm:$0xff]  }
 0x32b   :  { %5329 = vmatpush1.bf16.msra.mxu1 %v8443_v36  ;;  %v8469_v36 = vld [vmem:[#allocation7 + $0x7ac] ss:$16 sps:$4 sm:$0xff]   ;;  %6249 = vmatprep.subr.bf16.mxu0 %v8511_v62 }
 0x32c   :  { %5330 = vmatprep.subr.bf16.mxu1 %v8448_v3  ;;  %v8509_v3 = vld [vmem:[#allocation8 + $0xc0] ss:$8 sps:$4 sm:$0xff]   ;;  %v10462_v62 = vld [vmem:[#allocation52_spill] sm:$0xff] }
 0x32d   :  { %6250 = vmatpush1.bf16.msra.mxu0 %v8509_v3 }
 0x32f   :  { %5331 = vmatpush1.bf16.msra.mxu1 %v8446_v23  ;;  %v8514_v23 = vld [vmem:[#allocation8 + $0xd4] ss:$8 sps:$4 sm:$0xff]  }
 0x330   :  { %5332 = vmatprep.subr.bf16.mxu1 %v8451_v4  ;;  %v8475_v4 = vld [vmem:[#allocation7 + $0x7cc] ss:$16 sps:$4 sm:$0xff]   ;;  %6251 = vmatprep.subr.bf16.mxu0 %v8514_v23 }
 0x331   :  { %4657 = vmatmul.mubr.bf16.gmra.mrb[96].mxu0 %v9620_v57  ;;  %5196 = vmatmul.mubr.bf16.gmra.mrb[208].mxu1 %v10443_v46  ;;  %v8515_v46 = vld [vmem:[#allocation8 + $0xe0] ss:$8 sps:$4 sm:$0xff]  }
 0x332   :  { %4666 = vmatprep.mubr.bf16.mxu0 %v9635_v27  ;;  %5205 = vmatprep.mubr.bf16.mxu1 %v10444_v13  ;;  %v10450_v13 = vld [vmem:[#allocation23_spill] sm:$0xff] }
 0x333   :  { %5333 = vmatpush1.bf16.msra.mxu1 %v8449_v21  ;;  %v8512_v21 = vld [vmem:[#allocation8 + $0xd0] ss:$8 sps:$4 sm:$0xff]  }
 0x334   :  { %5334 = vmatprep.subr.bf16.mxu1 %v8454_v59  ;;  %v8517_v59 = vld [vmem:[#allocation8 + $0xe4] ss:$8 sps:$4 sm:$0xff]   ;;  %6252 = vmatpush1.bf16.msra.mxu0 %v8512_v21 }
 0x335   :  { %6253 = vmatprep.subr.bf16.mxu0 %v8517_v59 }
 0x337   :  { %5335 = vmatpush1.bf16.msra.mxu1 %v8452_v32  ;;  %v10452_v32 = vld [vmem:[#allocation43_spill] sm:$0xff] }
 0x338   :  { %5336 = vmatprep.subr.bf16.mxu1 %v8457_v58  ;;  %v8479_v58 = vld [vmem:[#allocation7 + $0x7e8] ss:$16 sps:$4 sm:$0xff]   ;;  %6254 = vmatpush1.bf16.msra.mxu0 %v8515_v46 }
 0x339   :  { %4667 = vmatmul.mubr.bf16.gmra.mrb[100].mxu0 %v9632_v42  ;;  %5206 = vmatmul.mubr.bf16.gmra.mrb[212].mxu1 %v10445_v7  ;;  %v10456_v7 = vld [vmem:[#allocation47_spill] sm:$0xff] }
 0x33a   :  { %4676 = vmatprep.mubr.bf16.mxu0 %v9647_v41  ;;  %5215 = vmatprep.mubr.bf16.mxu1 %v10446_v12  ;;  %v10457_v12 = vld [vmem:[#allocation46_spill] sm:$0xff] }
 0x33b   :  { %5337 = vmatpush1.bf16.msra.mxu1 %v8455_v1  ;;  %v8518_v1 = vld [vmem:[#allocation8 + $0xf0] ss:$8 sps:$4 sm:$0xff]   ;;  %6255 = vmatprep.subr.bf16.mxu0 %v8520_v61 }
 0x33c   :  { %5338 = vmatprep.subr.bf16.mxu1 %v8460_v40  ;;  %6256 = vmatpush1.bf16.msra.mxu0 %v8518_v1  ;;  %v10454_v40 = vld [vmem:[#allocation45_spill] sm:$0xff] }
 0x33f   :  { %5339 = vmatpush1.bf16.msra.mxu1 %v8458_v60  ;;  %v10459_v60 = vld [vmem:[#allocation48_spill] sm:$0xff] }
 0x340   :  { %5340 = vmatprep.subr.bf16.mxu1 %v8463_v30  ;;  %v10460_v30 = vld [vmem:[#allocation50_spill] sm:$0xff] }
 0x341   :  { %4677 = vmatmul.mubr.bf16.gmra.mrb[104].mxu0 %v10447_v24  ;;  %5216 = vmatmul.mubr.bf16.gmra.mrb[216].mxu1 %v10448_v50 }
 0x342   :  { %4686 = vmatprep.mubr.bf16.mxu0 %v9659_v28  ;;  %5225 = vmatprep.mubr.bf16.mxu1 %v10449_v31 }
 0x343   :  { %5341 = vmatpush1.bf16.msra.mxu1 %v8461_v45  ;;  %v8523_v45 = vld [vmem:[#allocation8 + $0x104] ss:$8 sps:$4 sm:$0xff]  }
 0x344   :  { %5342 = vmatprep.subr.bf16.mxu1 %v8469_v36  ;;  %6418 = vmatprep.subr.bf16.mxu0 %v8523_v45  ;;  %v10463_v36 = vld [vmem:[#allocation55_spill] sm:$0xff] }
 0x347   :  { %5343 = vmatpush1.bf16.msra.mxu1 %v8467_v26 }
 0x348   :  { %5344 = vmatprep.subr.bf16.mxu1 %v8475_v4 }
 0x349   :  { %4687 = vmatmul.mubr.bf16.gmra.mrb[108].mxu0 %v10450_v13  ;;  %5226 = vmatmul.mubr.bf16.gmra.mrb[220].mxu1 %v10451_v2 }
 0x34a   :  { %4696 = vmatprep.mubr.bf16.mxu0 %v9671_v14  ;;  %5235 = vmatprep.mubr.bf16.mxu1 %v10452_v32  ;;  %v8526_v32 = vld [vmem:[#allocation8 + $0x114] ss:$8 sps:$4 sm:$0xff]  }
 0x34b   :  { %5345 = vmatpush1.bf16.msra.mxu1 %v8473_v49 }
 0x34c   :  { %5346 = vmatprep.subr.bf16.mxu1 %v8481_v22  ;;  %v8521_v22 = vld [vmem:[#allocation8 + $0x100] ss:$8 sps:$4 sm:$0xff]  }
 0x34f   :  { %5347 = vmatpush1.bf16.msra.mxu1 %v8479_v58 }
 0x351   :  { %4697 = vmatmul.mubr.bf16.gmra.mrb[112].mxu0 %v9668_v53  ;;  %5236 = vmatmul.mubr.bf16.gmra.mrb[224].mxu1 %v10453_v37  ;;  %v8524_v37 = vld [vmem:[#allocation8 + $0x110] ss:$8 sps:$4 sm:$0xff]  }
 0x352   :  { %4706 = vmatprep.mubr.bf16.mxu0 %v9683_v48  ;;  %5245 = vmatprep.mubr.bf16.mxu1 %v10454_v40 }
 0x359   :  { %4707 = vmatmul.mubr.bf16.gmra.mrb[116].mxu0 %v9680_v15  ;;  %5246 = vmatmul.mubr.bf16.gmra.mrb[228].mxu1 %v10455_v20 }
 0x35a   :  { %4716 = vmatprep.mubr.bf16.mxu0 %v9695_v63  ;;  %5255 = vmatprep.mubr.bf16.mxu1 %v10456_v7  ;;  %v8529_v7 = vld [vmem:[#allocation8 + $0x124] ss:$8 sps:$4 sm:$0xff]  }
 0x361   :  { %4717 = vmatmul.mubr.bf16.gmra.mrb[120].mxu0 %v9692_v9  ;;  %5256 = vmatmul.mubr.bf16.gmra.mrb[232].mxu1 %v10457_v12 }
 0x362   :  { %4726 = vmatprep.mubr.bf16.mxu0 %v9705_v44  ;;  %5265 = vmatprep.mubr.bf16.mxu1 %v10458_v16 }
 0x369   :  { %4727 = vmatmul.mubr.bf16.gmra.mrb[124].mxu0 %v9703_v29  ;;  %5266 = vmatmul.mubr.bf16.gmra.mrb[236].mxu1 %v10459_v60 }
 0x36a   :  { %5275 = vmatprep.mubr.bf16.mxu1 %v10460_v30 }
 0x371   :  { %5276 = vmatmul.mubr.bf16.gmra.mrb[240].mxu1 %v10428_v6 }
 0x372   :  { %5285 = vmatprep.mubr.bf16.mxu1 %v10461_v19 }
 0x379   :  { %5286 = vmatmul.mubr.bf16.gmra.mrb[244].mxu1 %v10462_v62 }
 0x37a   :  { %5295 = vmatprep.mubr.bf16.mxu1 %v10463_v36 }
 0x381   :  { %5296 = vmatmul.mubr.bf16.gmra.mrb[248].mxu1 %v10432_v11 }
 0x382   :  { %5305 = vmatprep.mubr.bf16.mxu1 %v10433_v54 }
 0x389   :  { %5306 = vmatmul.mubr.bf16.gmra.mrb[252].mxu1 %v10434_v18 }
 0x38a   :  { %5348 = vmatprep.mubr.bf16.mxu1 %v9527_v52 }
 0x391   :  { %5349 = vmatmul.mubr.bf16.vlgmr.msra.gmra.mrb[192].mxu1 %v9523_v33  ;;  %v10464_v33 = vld [vmem:[#allocation16_spill] sm:$0xff] }
 0x392   :  { %5358 = vmatprep.mubr.bf16.mxu1 %v9539_v55  ;;  %v9797_v55 = vld [vmem:[%s10276_s4] sm:$0xf] }
 0x393   :  { %v9802_v52 = vrot.slane %v9797_v55, %v10464_v33 }
 0x399   :  { %5359 = vmatmul.mubr.bf16.gmra.mrb[196].mxu1 %v9536_v5 }
 0x39a   :  { %5368 = vmatprep.mubr.bf16.mxu1 %v9551_v10 }
 0x3a1   :  { %5369 = vmatmul.mubr.bf16.gmra.mrb[200].mxu1 %v9548_v35 }
 0x3a2   :  { %5378 = vmatprep.mubr.bf16.mxu1 %v9563_v8 }
 0x3a9   :  { %5379 = vmatmul.mubr.bf16.gmra.mrb[204].mxu1 %v9560_v43 }
 0x3aa   :  { %5388 = vmatprep.mubr.bf16.mxu1 %v9575_v34  ;;  %v10465_v34 = vld [vmem:[#allocation17_spill] sm:$0xff] }
 0x3ab   :  { %v9807_v5 = vrot.slane %v9797_v55, %v10465_v34 }
 0x3b1   :  { %5389 = vmatmul.mubr.bf16.gmra.mrb[208].mxu1 %v9572_v47 }
 0x3b2   :  { %5398 = vmatprep.mubr.bf16.mxu1 %v9587_v51 }
 0x3b9   :  { %5399 = vmatmul.mubr.bf16.gmra.mrb[212].mxu1 %v9584_v17 }
 0x3ba   :  { %5408 = vmatprep.mubr.bf16.mxu1 %v9599_v38 }
 0x3c1   :  { %5409 = vmatmul.mubr.bf16.gmra.mrb[216].mxu1 %v9596_v25 }
 0x3c2   :  { %5418 = vmatprep.mubr.bf16.mxu1 %v9611_v56 }
 0x3c4   :  { %v4578_v17 = vpop.f32.mrb[64].mxu0 }
 0x3c5   :  { %v7439_v10 = vadd.f32 %v4578_v17, %v9802_v52  ;;  %v4580_v35 = vpop.f32.mrb[65].mxu0  ;;  %v8527_v17 = vld [vmem:[#allocation8 + $0x120] ss:$8 sps:$4 sm:$0xff]  }
 0x3c6   :  { %v7440_v8 = vadd.f32 %v4580_v35, %v9807_v5  ;;  %v4582_v43 = vpop.f32.mrb[66].mxu0 }
 0x3c7   :  { %v5509_v47 = vmul.f32 0.2, %v7439_v10  ;;  %v7441_v25 = vadd.f32 %v4582_v43, %v9802_v52  ;;  %v4584_v51 = vpop.f32.mrb[67].mxu0 }
 0x3c8   :  { %v5510_v38 = vmul.f32 0.2, %v7440_v8  ;;  %v7442_v6 = vadd.f32 %v4584_v51, %v9807_v5 }
 0x3c9   :  { %v5513_v11 = vmul.f32 0.2, %v7441_v25  ;;  %5419 = vmatmul.mubr.bf16.gmra.mrb[220].mxu1 %v9608_v39  ;;  %v5637_v54 = vmax.f32 %v7439_v10, %v5509_v47 }
 0x3ca   :  { %v5514_v56 = vmul.f32 0.2, %v7442_v6  ;;  %5428 = vmatprep.mubr.bf16.mxu1 %v9623_v0  ;;  %v5638_v3 = vmax.f32 %v7440_v8, %v5510_v38  ;;  %v8532_v8 = vld [vmem:[#allocation8 + $0x134] ss:$8 sps:$4 sm:$0xff]   ;;  %v8530_v38 = vld [vmem:[#allocation8 + $0x130] ss:$8 sps:$4 sm:$0xff]  }
 0x3cb   :  { %v5641_v18 = vmax.f32 %v7441_v25, %v5513_v11 }
 0x3cc   :  { %v5642_v50 = vmax.f32 %v7442_v6, %v5514_v56  ;;  %v4588_v31 = vpop.f32.mrb[68].mxu0  ;;  %v8535_v56 = vld [vmem:[#allocation8 + $0x144] ss:$8 sps:$4 sm:$0xff]  }
 0x3cd   :  { %v5765_v26 = vpack.c.bf16 %v5641_v18, %v5637_v54  ;;  %v7443_v23 = vadd.f32 %v4588_v31, %v9802_v52  ;;  %v4590_v4 = vpop.f32.mrb[69].mxu0 }
 0x3ce   :  { %v7444_v21 = vadd.f32 %v4590_v4, %v9807_v5  ;;  %v4592_v49 = vpop.f32.mrb[70].mxu0  ;;  %v5766_v59 = vpack.c.bf16 %v5642_v50, %v5638_v3 }
 0x3cf   :  { %v5517_v46 = vmul.f32 0.2, %v7443_v23  ;;  %v7445_v39 = vadd.f32 %v4592_v49, %v9802_v52  ;;  %v4594_v2 = vpop.f32.mrb[71].mxu0 }
 0x3d0   :  { %v5518_v0 = vmul.f32 0.2, %v7444_v21  ;;  %v7446_v58 = vadd.f32 %v4594_v2, %v9807_v5  ;;  %6257 = vmatprep.mubr.bf16.mxu0 %v5766_v59 }
 0x3d1   :  { %v5521_v61 = vmul.f32 0.2, %v7445_v39  ;;  %5429 = vmatmul.mubr.bf16.gmra.mrb[224].mxu1 %v9620_v57  ;;  %6258 = vmatmul.mubr.bf16.vlgmr.msra.gmra.mrb[128].mxu0 %v5765_v26  ;;  %v5645_v40 = vmax.f32 %v7443_v23, %v5517_v46 }
 0x3d2   :  { %v5522_v1 = vmul.f32 0.2, %v7446_v58  ;;  %5438 = vmatprep.mubr.bf16.mxu1 %v9635_v27  ;;  %6419 = vmatpush1.bf16.msra.mxu0 %v8521_v22  ;;  %v5646_v12 = vmax.f32 %v7444_v21, %v5518_v0  ;;  %v8533_v21 = vld [vmem:[#allocation8 + $0x140] ss:$8 sps:$4 sm:$0xff]   ;;  %v8538_v22 = vld [vmem:[#allocation8 + $0x154] ss:$8 sps:$4 sm:$0xff]  }
 0x3d3   :  { %v5649_v20 = vmax.f32 %v7445_v39, %v5521_v61  ;;  %6420 = vmatprep.subr.bf16.mxu0 %v8526_v32  ;;  %v8536_v0 = vld [vmem:[#allocation8 + $0x150] ss:$8 sps:$4 sm:$0xff]  }
 0x3d4   :  { %v5650_v16 = vmax.f32 %v7446_v58, %v5522_v1  ;;  %v4598_v60 = vpop.f32.mrb[72].mxu0  ;;  %v8541_v1 = vld [vmem:[#allocation8 + $0x164] ss:$8 sps:$4 sm:$0xff]  }
 0x3d5   :  { %v7447_v30 = vadd.f32 %v4598_v60, %v9802_v52  ;;  %v4600_v19 = vpop.f32.mrb[73].mxu0  ;;  %v5769_v45 = vpack.c.bf16 %v5649_v20, %v5645_v40 }
 0x3d6   :  { %v7448_v62 = vadd.f32 %v4600_v19, %v9807_v5  ;;  %v4602_v57 = vpop.f32.mrb[74].mxu0  ;;  %v5770_v36 = vpack.c.bf16 %v5650_v16, %v5646_v12  ;;  %6421 = vmatpush1.bf16.msra.mxu0 %v8524_v37  ;;  %v8539_v19 = vld [vmem:[#allocation8 + $0x160] ss:$8 sps:$4 sm:$0xff]  }
 0x3d7   :  { %v5525_v27 = vmul.f32 0.2, %v7447_v30  ;;  %v7449_v10 = vadd.f32 %v4602_v57, %v9802_v52  ;;  %v4604_v35 = vpop.f32.mrb[75].mxu0  ;;  %6422 = vmatprep.subr.bf16.mxu0 %v8529_v7  ;;  %v8544_v57 = vld [vmem:[#allocation8 + $0x174] ss:$8 sps:$4 sm:$0xff]  }
 0x3d8   :  { %v5526_v43 = vmul.f32 0.2, %v7448_v62  ;;  %v7450_v47 = vadd.f32 %v4604_v35, %v9807_v5  ;;  %6267 = vmatprep.mubr.bf16.mxu0 %v5770_v36  ;;  %v8542_v35 = vld [vmem:[#allocation8 + $0x170] ss:$8 sps:$4 sm:$0xff]  }
 0x3d9   :  { %v5529_v25 = vmul.f32 0.2, %v7449_v10  ;;  %5439 = vmatmul.mubr.bf16.gmra.mrb[228].mxu1 %v9632_v42  ;;  %6268 = vmatmul.mubr.bf16.gmra.mrb[132].mxu0 %v5769_v45  ;;  %v5653_v6 = vmax.f32 %v7447_v30, %v5525_v27 }
 0x3da   :  { %v5530_v51 = vmul.f32 0.2, %v7450_v47  ;;  %5448 = vmatprep.mubr.bf16.mxu1 %v9647_v41  ;;  %6423 = vmatpush1.bf16.msra.mxu0 %v8527_v17  ;;  %v5654_v54 = vmax.f32 %v7448_v62, %v5526_v43 }
 0x3db   :  { %v5657_v11 = vmax.f32 %v7449_v10, %v5529_v25  ;;  %6424 = vmatprep.subr.bf16.mxu0 %v8532_v8 }
 0x3dc   :  { %v5658_v18 = vmax.f32 %v7450_v47, %v5530_v51  ;;  %v4608_v3 = vpop.f32.mrb[76].mxu0  ;;  %v8547_v47 = vld [vmem:[#allocation8 + $0x184] ss:$8 sps:$4 sm:$0xff]  }
 0x3dd   :  { %v7451_v50 = vadd.f32 %v4608_v3, %v9802_v52  ;;  %v4610_v31 = vpop.f32.mrb[77].mxu0  ;;  %v5773_v26 = vpack.c.bf16 %v5657_v11, %v5653_v6  ;;  %v8545_v3 = vld [vmem:[#allocation8 + $0x180] ss:$8 sps:$4 sm:$0xff]  }
 0x3de   :  { %v7452_v23 = vadd.f32 %v4610_v31, %v9807_v5  ;;  %v4612_v42 = vpop.f32.mrb[78].mxu0  ;;  %v5774_v4 = vpack.c.bf16 %v5658_v18, %v5654_v54  ;;  %6425 = vmatpush1.bf16.msra.mxu0 %v8530_v38 }
 0x3df   :  { %v5533_v41 = vmul.f32 0.2, %v7451_v50  ;;  %v7453_v49 = vadd.f32 %v4612_v42, %v9802_v52  ;;  %v4614_v59 = vpop.f32.mrb[79].mxu0  ;;  %6426 = vmatprep.subr.bf16.mxu0 %v8535_v56 }
 0x3e0   :  { %v5534_v46 = vmul.f32 0.2, %v7452_v23  ;;  %v7454_v39 = vadd.f32 %v4614_v59, %v9807_v5  ;;  %6277 = vmatprep.mubr.bf16.mxu0 %v5774_v4 }
 0x3e1   :  { %v5537_v2 = vmul.f32 0.2, %v7453_v49  ;;  %5449 = vmatmul.mubr.bf16.gmra.mrb[232].mxu1 %v10447_v24  ;;  %6278 = vmatmul.mubr.bf16.gmra.mrb[136].mxu0 %v5773_v26  ;;  %v5661_v58 = vmax.f32 %v7451_v50, %v5533_v41  ;;  %v8550_v26 = vld [vmem:[#allocation8 + $0x194] ss:$8 sps:$4 sm:$0xff]   ;;  %v8548_v41 = vld [vmem:[#allocation8 + $0x190] ss:$8 sps:$4 sm:$0xff]  }
 0x3e2   :  { %v5538_v32 = vmul.f32 0.2, %v7454_v39  ;;  %5458 = vmatprep.mubr.bf16.mxu1 %v9659_v28  ;;  %6427 = vmatpush1.bf16.msra.mxu0 %v8533_v21  ;;  %v5662_v37 = vmax.f32 %v7452_v23, %v5534_v46 }
 0x3e3   :  { %v5665_v61 = vmax.f32 %v7453_v49, %v5537_v2  ;;  %6428 = vmatprep.subr.bf16.mxu0 %v8538_v22  ;;  %v8553_v22 = vld [vmem:[#allocation8 + $0x1a4] ss:$8 sps:$4 sm:$0xff]  }
 0x3e4   :  { %v5666_v40 = vmax.f32 %v7454_v39, %v5538_v32  ;;  %v4618_v20 = vpop.f32.mrb[80].mxu0 }
 0x3e5   :  { %v7455_v7 = vadd.f32 %v4618_v20, %v9802_v52  ;;  %v4620_v12 = vpop.f32.mrb[81].mxu0  ;;  %v5777_v16 = vpack.c.bf16 %v5665_v61, %v5661_v58 }
 0x3e6   :  { %v7456_v60 = vadd.f32 %v4620_v12, %v9807_v5  ;;  %v4622_v24 = vpop.f32.mrb[82].mxu0  ;;  %v5778_v30 = vpack.c.bf16 %v5666_v40, %v5662_v37  ;;  %6429 = vmatpush1.bf16.msra.mxu0 %v8536_v0  ;;  %v8551_v37 = vld [vmem:[#allocation8 + $0x1a0] ss:$8 sps:$4 sm:$0xff]  }
 0x3e7   :  { %v5541_v28 = vmul.f32 0.2, %v7455_v7  ;;  %v7457_v45 = vadd.f32 %v4622_v24, %v9802_v52  ;;  %v4624_v62 = vpop.f32.mrb[83].mxu0  ;;  %6430 = vmatprep.subr.bf16.mxu0 %v8541_v1 }
 0x3e8   :  { %v5542_v36 = vmul.f32 0.2, %v7456_v60  ;;  %v7458_v17 = vadd.f32 %v4624_v62, %v9807_v5  ;;  %6287 = vmatprep.mubr.bf16.mxu0 %v5778_v30  ;;  %v8554_v30 = vld [vmem:[#allocation8 + $0x1b0] ss:$8 sps:$4 sm:$0xff]  }
 0x3e9   :  { %v5545_v27 = vmul.f32 0.2, %v7457_v45  ;;  %5459 = vmatmul.mubr.bf16.gmra.mrb[236].mxu1 %v10450_v13  ;;  %6288 = vmatmul.mubr.bf16.gmra.mrb[140].mxu0 %v5777_v16  ;;  %v5669_v8 = vmax.f32 %v7455_v7, %v5541_v28  ;;  %v8556_v7 = vld [vmem:[#allocation8 + $0x1b4] ss:$8 sps:$4 sm:$0xff]  }
 0x3ea   :  { %v5546_v10 = vmul.f32 0.2, %v7458_v17  ;;  %5468 = vmatprep.mubr.bf16.mxu1 %v9671_v14  ;;  %6431 = vmatpush1.bf16.msra.mxu0 %v8539_v19  ;;  %v5670_v25 = vmax.f32 %v7456_v60, %v5542_v36 }
 0x3eb   :  { %v5673_v43 = vmax.f32 %v7457_v45, %v5545_v27  ;;  %6432 = vmatprep.subr.bf16.mxu0 %v8544_v57  ;;  %v8559_v45 = vld [vmem:[#allocation8 + $0x1c4] ss:$8 sps:$4 sm:$0xff]  }
 0x3ec   :  { %v5674_v51 = vmax.f32 %v7458_v17, %v5546_v10  ;;  %v4628_v38 = vpop.f32.mrb[84].mxu0 }
 0x3ed   :  { %v7459_v6 = vadd.f32 %v4628_v38, %v9802_v52  ;;  %v4630_v11 = vpop.f32.mrb[85].mxu0  ;;  %v5781_v56 = vpack.c.bf16 %v5673_v43, %v5669_v8  ;;  %v8557_v43 = vld [vmem:[#allocation8 + $0x1c0] ss:$8 sps:$4 sm:$0xff]  }
 0x3ee   :  { %v7460_v54 = vadd.f32 %v4630_v11, %v9807_v5  ;;  %v4632_v13 = vpop.f32.mrb[86].mxu0  ;;  %v5782_v18 = vpack.c.bf16 %v5674_v51, %v5670_v25  ;;  %6433 = vmatpush1.bf16.msra.mxu0 %v8542_v35  ;;  %v8562_v51 = vld [vmem:[#allocation8 + $0x1d4] ss:$8 sps:$4 sm:$0xff]  }
 0x3ef   :  { %v5549_v14 = vmul.f32 0.2, %v7459_v6  ;;  %v7461_v50 = vadd.f32 %v4632_v13, %v9802_v52  ;;  %v4634_v31 = vpop.f32.mrb[87].mxu0  ;;  %6434 = vmatprep.subr.bf16.mxu0 %v8547_v47 }
 0x3f0   :  { %v5550_v23 = vmul.f32 0.2, %v7460_v54  ;;  %v7462_v42 = vadd.f32 %v4634_v31, %v9807_v5  ;;  %6297 = vmatprep.mubr.bf16.mxu0 %v5782_v18 }
 0x3f1   :  { %v5553_v4 = vmul.f32 0.2, %v7461_v50  ;;  %5469 = vmatmul.mubr.bf16.gmra.mrb[240].mxu1 %v9668_v53  ;;  %6298 = vmatmul.mubr.bf16.gmra.mrb[144].mxu0 %v5781_v56  ;;  %v5677_v49 = vmax.f32 %v7459_v6, %v5549_v14 }
 0x3f2   :  { %v5554_v21 = vmul.f32 0.2, %v7462_v42  ;;  %5478 = vmatprep.mubr.bf16.mxu1 %v9683_v48  ;;  %6435 = vmatpush1.bf16.msra.mxu0 %v8545_v3  ;;  %v5678_v46 = vmax.f32 %v7460_v54, %v5550_v23  ;;  %v8560_v54 = vld [vmem:[#allocation8 + $0x1d0] ss:$8 sps:$4 sm:$0xff]   ;;  %v8565_v3 = vld [vmem:[#allocation8 + $0x1e4] ss:$8 sps:$4 sm:$0xff]  }
 0x3f3   :  { %v5681_v59 = vmax.f32 %v7461_v50, %v5553_v4  ;;  %6436 = vmatprep.subr.bf16.mxu0 %v8550_v26 }
 0x3f4   :  { %v5682_v39 = vmax.f32 %v7462_v42, %v5554_v21  ;;  %v4638_v2 = vpop.f32.mrb[88].mxu0 }
 0x3f5   :  { %v7463_v32 = vadd.f32 %v4638_v2, %v9802_v52  ;;  %v4640_v0 = vpop.f32.mrb[89].mxu0  ;;  %v5785_v58 = vpack.c.bf16 %v5681_v59, %v5677_v49 }
 0x3f6   :  { %v7464_v61 = vadd.f32 %v4640_v0, %v9807_v5  ;;  %v4642_v53 = vpop.f32.mrb[90].mxu0  ;;  %v5786_v1 = vpack.c.bf16 %v5682_v39, %v5678_v46  ;;  %6437 = vmatpush1.bf16.msra.mxu0 %v8548_v41  ;;  %v8563_v41 = vld [vmem:[#allocation8 + $0x1e0] ss:$8 sps:$4 sm:$0xff]   ;;  %v8566_v0 = vld [vmem:[#allocation8 + $0x1f0] ss:$8 sps:$4 sm:$0xff]  }
 0x3f7   :  { %v5557_v48 = vmul.f32 0.2, %v7463_v32  ;;  %v7465_v40 = vadd.f32 %v4642_v53, %v9802_v52  ;;  %v4644_v20 = vpop.f32.mrb[91].mxu0  ;;  %6438 = vmatprep.subr.bf16.mxu0 %v8553_v22  ;;  %v8568_v22 = vld [vmem:[#allocation8 + $0x1f4] ss:$8 sps:$4 sm:$0xff]  }
 0x3f8   :  { %v5558_v12 = vmul.f32 0.2, %v7464_v61  ;;  %v7466_v16 = vadd.f32 %v4644_v20, %v9807_v5  ;;  %6307 = vmatprep.mubr.bf16.mxu0 %v5786_v1 }
 0x3f9   :  { %v5561_v60 = vmul.f32 0.2, %v7465_v40  ;;  %5479 = vmatmul.mubr.bf16.gmra.mrb[244].mxu1 %v9680_v15  ;;  %6308 = vmatmul.mubr.bf16.gmra.mrb[148].mxu0 %v5785_v58  ;;  %v5685_v19 = vmax.f32 %v7463_v32, %v5557_v48 }
 0x3fa   :  { %v5562_v24 = vmul.f32 0.2, %v7466_v16  ;;  %5488 = vmatprep.mubr.bf16.mxu1 %v9695_v63  ;;  %6439 = vmatpush1.bf16.msra.mxu0 %v8551_v37  ;;  %v5686_v62 = vmax.f32 %v7464_v61, %v5558_v12 }
 0x3fb   :  { %v5689_v28 = vmax.f32 %v7465_v40, %v5561_v60  ;;  %6440 = vmatprep.subr.bf16.mxu0 %v8556_v7 }
 0x3fc   :  { %v5690_v57 = vmax.f32 %v7466_v16, %v5562_v24  ;;  %v4648_v36 = vpop.f32.mrb[92].mxu0 }
 0x3fd   :  { %v7467_v17 = vadd.f32 %v4648_v36, %v9802_v52  ;;  %v4650_v27 = vpop.f32.mrb[93].mxu0  ;;  %v5789_v10 = vpack.c.bf16 %v5689_v28, %v5685_v19 }
 0x3fe   :  { %v7468_v35 = vadd.f32 %v4650_v27, %v9807_v5  ;;  %v4652_v15 = vpop.f32.mrb[94].mxu0  ;;  %v5790_v8 = vpack.c.bf16 %v5690_v57, %v5686_v62  ;;  %6441 = vmatpush1.bf16.msra.mxu0 %v8554_v30 }
 0x3ff   :  { %v5565_v63 = vmul.f32 0.2, %v7467_v17  ;;  %v7469_v47 = vadd.f32 %v4652_v15, %v9802_v52  ;;  %v4654_v25 = vpop.f32.mrb[95].mxu0  ;;  %6442 = vmatprep.subr.bf16.mxu0 %v8559_v45 }
 0x400   :  { %v5566_v38 = vmul.f32 0.2, %v7468_v35  ;;  %v7470_v6 = vadd.f32 %v4654_v25, %v9807_v5  ;;  %6317 = vmatprep.mubr.bf16.mxu0 %v5790_v8 }
 0x401   :  { %v5569_v11 = vmul.f32 0.2, %v7469_v47  ;;  %5489 = vmatmul.mubr.bf16.gmra.mrb[248].mxu1 %v9692_v9  ;;  %6318 = vmatmul.mubr.bf16.gmra.mrb[152].mxu0 %v5789_v10  ;;  %v5693_v13 = vmax.f32 %v7467_v17, %v5565_v63 }
 0x402   :  { %v5570_v56 = vmul.f32 0.2, %v7470_v6  ;;  %5498 = vmatprep.mubr.bf16.mxu1 %v9705_v44  ;;  %6443 = vmatpush1.bf16.msra.mxu0 %v8557_v43  ;;  %v5694_v14 = vmax.f32 %v7468_v35, %v5566_v38 }
 0x403   :  { %v5697_v18 = vmax.f32 %v7469_v47, %v5569_v11  ;;  %6444 = vmatprep.subr.bf16.mxu0 %v8562_v51 }
 0x404   :  { %v5698_v50 = vmax.f32 %v7470_v6, %v5570_v56  ;;  %v4658_v31 = vpop.f32.mrb[96].mxu0 }
 0x405   :  { %v7471_v26 = vadd.f32 %v4658_v31, %v9802_v52  ;;  %v4660_v23 = vpop.f32.mrb[97].mxu0  ;;  %v5793_v42 = vpack.c.bf16 %v5697_v18, %v5693_v13 }
 0x406   :  { %v7472_v4 = vadd.f32 %v4660_v23, %v9807_v5  ;;  %v4662_v9 = vpop.f32.mrb[98].mxu0  ;;  %v5794_v21 = vpack.c.bf16 %v5698_v50, %v5694_v14  ;;  %6445 = vmatpush1.bf16.msra.mxu0 %v8560_v54 }
 0x407   :  { %v5573_v44 = vmul.f32 0.2, %v7471_v26  ;;  %v7473_v49 = vadd.f32 %v4662_v9, %v9802_v52  ;;  %v4664_v59 = vpop.f32.mrb[99].mxu0  ;;  %6446 = vmatprep.subr.bf16.mxu0 %v8565_v3 }
 0x408   :  { %v5574_v46 = vmul.f32 0.2, %v7472_v4  ;;  %v7474_v39 = vadd.f32 %v4664_v59, %v9807_v5  ;;  %6327 = vmatprep.mubr.bf16.mxu0 %v5794_v21 }
 0x409   :  { %v5577_v2 = vmul.f32 0.2, %v7473_v49  ;;  %5499 = vmatmul.mubr.bf16.gmra.mrb[252].mxu1 %v9703_v29  ;;  %6328 = vmatmul.mubr.bf16.gmra.mrb[156].mxu0 %v5793_v42  ;;  %v5701_v58 = vmax.f32 %v7471_v26, %v5573_v44 }
 0x40a   :  { %v5578_v32 = vmul.f32 0.2, %v7474_v39  ;;  %6447 = vmatpush1.bf16.msra.mxu0 %v8563_v41  ;;  %v5702_v53 = vmax.f32 %v7472_v4, %v5574_v46 }
 0x40b   :  { %v5705_v61 = vmax.f32 %v7473_v49, %v5577_v2  ;;  %6448 = vmatprep.subr.bf16.mxu0 %v8568_v22 }
 0x40c   :  { %v5706_v1 = vmax.f32 %v7474_v39, %v5578_v32  ;;  %v4668_v37 = vpop.f32.mrb[100].mxu0 }
 0x40d   :  { %v7475_v48 = vadd.f32 %v4668_v37, %v9802_v52  ;;  %v4670_v40 = vpop.f32.mrb[101].mxu0  ;;  %v5797_v20 = vpack.c.bf16 %v5705_v61, %v5701_v58 }
 0x40e   :  { %v7476_v7 = vadd.f32 %v4670_v40, %v9807_v5  ;;  %v4672_v12 = vpop.f32.mrb[102].mxu0  ;;  %v5798_v16 = vpack.c.bf16 %v5706_v1, %v5702_v53  ;;  %6449 = vmatpush1.bf16.msra.mxu0 %v8566_v0 }
 0x40f   :  { %v5581_v29 = vmul.f32 0.2, %v7475_v48  ;;  %v7477_v60 = vadd.f32 %v4672_v12, %v9802_v52  ;;  %v4674_v24 = vpop.f32.mrb[103].mxu0 }
 0x410   :  { %v5582_v30 = vmul.f32 0.2, %v7476_v7  ;;  %v7478_v19 = vadd.f32 %v4674_v24, %v9807_v5  ;;  %6337 = vmatprep.mubr.bf16.mxu0 %v5798_v16 }
 0x411   :  { %v5585_v28 = vmul.f32 0.2, %v7477_v60  ;;  %6338 = vmatmul.mubr.bf16.gmra.mrb[160].mxu0 %v5797_v20  ;;  %v5709_v62 = vmax.f32 %v7475_v48, %v5581_v29 }
 0x412   :  { %v5586_v45 = vmul.f32 0.2, %v7478_v19  ;;  %v5710_v36 = vmax.f32 %v7476_v7, %v5582_v30 }
 0x413   :  { %v5713_v57 = vmax.f32 %v7477_v60, %v5585_v28 }
 0x414   :  { %v5714_v17 = vmax.f32 %v7478_v19, %v5586_v45  ;;  %v4678_v27 = vpop.f32.mrb[104].mxu0 }
 0x415   :  { %v7479_v10 = vadd.f32 %v4678_v27, %v9802_v52  ;;  %v4680_v35 = vpop.f32.mrb[105].mxu0  ;;  %v5801_v15 = vpack.c.bf16 %v5713_v57, %v5709_v62 }
 0x416   :  { %v7480_v8 = vadd.f32 %v4680_v35, %v9807_v5  ;;  %v4682_v43 = vpop.f32.mrb[106].mxu0  ;;  %v5802_v63 = vpack.c.bf16 %v5714_v17, %v5710_v36 }
 0x417   :  { %v5589_v47 = vmul.f32 0.2, %v7479_v10  ;;  %v7481_v25 = vadd.f32 %v4682_v43, %v9802_v52  ;;  %v4684_v51 = vpop.f32.mrb[107].mxu0 }
 0x418   :  { %v5590_v38 = vmul.f32 0.2, %v7480_v8  ;;  %v7482_v6 = vadd.f32 %v4684_v51, %v9807_v5  ;;  %6347 = vmatprep.mubr.bf16.mxu0 %v5802_v63 }
 0x419   :  { %v5593_v11 = vmul.f32 0.2, %v7481_v25  ;;  %6348 = vmatmul.mubr.bf16.gmra.mrb[164].mxu0 %v5801_v15  ;;  %v5717_v54 = vmax.f32 %v7479_v10, %v5589_v47 }
 0x41a   :  { %v5594_v56 = vmul.f32 0.2, %v7482_v6  ;;  %v5718_v18 = vmax.f32 %v7480_v8, %v5590_v38 }
 0x41b   :  { %v5721_v13 = vmax.f32 %v7481_v25, %v5593_v11 }
 0x41c   :  { %v5722_v3 = vmax.f32 %v7482_v6, %v5594_v56  ;;  %v4688_v14 = vpop.f32.mrb[108].mxu0 }
 0x41d   :  { %v7483_v50 = vadd.f32 %v4688_v14, %v9802_v52  ;;  %v4690_v31 = vpop.f32.mrb[109].mxu0  ;;  %v5805_v26 = vpack.c.bf16 %v5721_v13, %v5717_v54 }
 0x41e   :  { %v7484_v23 = vadd.f32 %v4690_v31, %v9807_v5  ;;  %v4692_v42 = vpop.f32.mrb[110].mxu0  ;;  %v5806_v4 = vpack.c.bf16 %v5722_v3, %v5718_v18 }
 0x41f   :  { %v5597_v9 = vmul.f32 0.2, %v7483_v50  ;;  %v7485_v21 = vadd.f32 %v4692_v42, %v9802_v52  ;;  %v4694_v41 = vpop.f32.mrb[111].mxu0 }
 0x420   :  { %v5598_v44 = vmul.f32 0.2, %v7484_v23  ;;  %v7486_v49 = vadd.f32 %v4694_v41, %v9807_v5  ;;  %6357 = vmatprep.mubr.bf16.mxu0 %v5806_v4 }
 0x421   :  { %v5601_v59 = vmul.f32 0.2, %v7485_v21  ;;  %6358 = vmatmul.mubr.bf16.gmra.mrb[168].mxu0 %v5805_v26  ;;  %v5725_v46 = vmax.f32 %v7483_v50, %v5597_v9 }
 0x422   :  { %v5602_v22 = vmul.f32 0.2, %v7486_v49  ;;  %v5726_v2 = vmax.f32 %v7484_v23, %v5598_v44 }
 0x423   :  { %v5729_v39 = vmax.f32 %v7485_v21, %v5601_v59 }
 0x424   :  { %v5730_v32 = vmax.f32 %v7486_v49, %v5602_v22  ;;  %v4698_v0 = vpop.f32.mrb[112].mxu0 }
 0x425   :  { %v7487_v58 = vadd.f32 %v4698_v0, %v9802_v52  ;;  %v4700_v61 = vpop.f32.mrb[113].mxu0  ;;  %v5809_v53 = vpack.c.bf16 %v5729_v39, %v5725_v46 }
 0x426   :  { %v7488_v1 = vadd.f32 %v4700_v61, %v9807_v5  ;;  %v4702_v37 = vpop.f32.mrb[114].mxu0  ;;  %v5810_v48 = vpack.c.bf16 %v5730_v32, %v5726_v2 }
 0x427   :  { %v5605_v40 = vmul.f32 0.2, %v7487_v58  ;;  %v7489_v20 = vadd.f32 %v4702_v37, %v9802_v52  ;;  %v4704_v7 = vpop.f32.mrb[115].mxu0 }
 0x428   :  { %v5606_v12 = vmul.f32 0.2, %v7488_v1  ;;  %v7490_v16 = vadd.f32 %v4704_v7, %v9807_v5  ;;  %6367 = vmatprep.mubr.bf16.mxu0 %v5810_v48 }
 0x429   :  { %v5609_v29 = vmul.f32 0.2, %v7489_v20  ;;  %6368 = vmatmul.mubr.bf16.gmra.mrb[172].mxu0 %v5809_v53  ;;  %v5733_v24 = vmax.f32 %v7487_v58, %v5605_v40 }
 0x42a   :  { %v5610_v60 = vmul.f32 0.2, %v7490_v16  ;;  %v5734_v19 = vmax.f32 %v7488_v1, %v5606_v12 }
 0x42b   :  { %v5737_v30 = vmax.f32 %v7489_v20, %v5609_v29 }
 0x42c   :  { %v5738_v28 = vmax.f32 %v7490_v16, %v5610_v60  ;;  %v4708_v45 = vpop.f32.mrb[116].mxu0 }
 0x42d   :  { %v7491_v62 = vadd.f32 %v4708_v45, %v9802_v52  ;;  %v4710_v57 = vpop.f32.mrb[117].mxu0  ;;  %v5813_v36 = vpack.c.bf16 %v5737_v30, %v5733_v24  ;;  %v10466_v30 = vld [vmem:[#allocation15_spill] sm:$0xff] }
 0x42e   :  { %v7492_v17 = vadd.f32 %v4710_v57, %v9807_v5  ;;  %v4712_v27 = vpop.f32.mrb[118].mxu0  ;;  %v5814_v10 = vpack.c.bf16 %v5738_v28, %v5734_v19  ;;  %v10467_v19 = vsub.s32 2, %v10466_v30  ;;  %v10468_v28 = vsub.s32 3, %v10466_v30 }
 0x42f   :  { %v5613_v35 = vmul.f32 0.2, %v7491_v62  ;;  %v7493_v15 = vadd.f32 %v4712_v27, %v9802_v52  ;;  %v4714_v8 = vpop.f32.mrb[119].mxu0 }
 0x430   :  { %v5614_v43 = vmul.f32 0.2, %v7492_v17  ;;  %v7494_v63 = vadd.f32 %v4714_v8, %v9807_v5  ;;  %6377 = vmatprep.mubr.bf16.mxu0 %v5814_v10 }
 0x431   :  { %v5617_v47 = vmul.f32 0.2, %v7493_v15  ;;  %6378 = vmatmul.mubr.bf16.gmra.mrb[176].mxu0 %v5813_v36  ;;  %v5741_v51 = vmax.f32 %v7491_v62, %v5613_v35 }
 0x432   :  { %v5618_v25 = vmul.f32 0.2, %v7494_v63  ;;  %v5742_v6 = vmax.f32 %v7492_v17, %v5614_v43 }
 0x433   :  { %v5745_v38 = vmax.f32 %v7493_v15, %v5617_v47 }
 0x434   :  { %v5746_v11 = vmax.f32 %v7494_v63, %v5618_v25  ;;  %v4718_v56 = vpop.f32.mrb[120].mxu0 }
 0x435   :  { %v7495_v54 = vadd.f32 %v4718_v56, %v9802_v52  ;;  %v4720_v13 = vpop.f32.mrb[121].mxu0  ;;  %v5817_v18 = vpack.c.bf16 %v5745_v38, %v5741_v51 }
 0x436   :  { %v7496_v3 = vadd.f32 %v4720_v13, %v9807_v5  ;;  %v4722_v14 = vpop.f32.mrb[122].mxu0  ;;  %v5818_v50 = vpack.c.bf16 %v5746_v11, %v5742_v6 }
 0x437   :  { %v5621_v31 = vmul.f32 0.2, %v7495_v54  ;;  %v7497_v26 = vadd.f32 %v4722_v14, %v9802_v52  ;;  %v4724_v23 = vpop.f32.mrb[123].mxu0 }
 0x438   :  { %v5622_v42 = vmul.f32 0.2, %v7496_v3  ;;  %v7498_v4 = vadd.f32 %v4724_v23, %v9807_v5  ;;  %6387 = vmatprep.mubr.bf16.mxu0 %v5818_v50 }
 0x439   :  { %v5625_v9 = vmul.f32 0.2, %v7497_v26  ;;  %6388 = vmatmul.mubr.bf16.gmra.mrb[180].mxu0 %v5817_v18  ;;  %v5749_v41 = vmax.f32 %v7495_v54, %v5621_v31 }
 0x43a   :  { %v5626_v21 = vmul.f32 0.2, %v7498_v4  ;;  %v5750_v49 = vmax.f32 %v7496_v3, %v5622_v42 }
 0x43b   :  { %v5753_v44 = vmax.f32 %v7497_v26, %v5625_v9 }
 0x43c   :  { %v5754_v59 = vmax.f32 %v7498_v4, %v5626_v21  ;;  %v4728_v22 = vpop.f32.mrb[124].mxu0 }
 0x43d   :  { %v7499_v46 = vadd.f32 %v4728_v22, %v9802_v52  ;;  %v4730_v39 = vpop.f32.mrb[125].mxu0  ;;  %v5821_v2 = vpack.c.bf16 %v5753_v44, %v5749_v41 }
 0x43e   :  { %v7500_v32 = vadd.f32 %v4730_v39, %v9807_v5  ;;  %v4732_v0 = vpop.f32.mrb[126].mxu0  ;;  %v5822_v58 = vpack.c.bf16 %v5754_v59, %v5750_v49 }
 0x43f   :  { %v5629_v61 = vmul.f32 0.2, %v7499_v46  ;;  %v7501_v53 = vadd.f32 %v4732_v0, %v9802_v52  ;;  %v4734_v1 = vpop.f32.mrb[127].mxu0  ;;  %v9893_v52 = vrot.slane %v9797_v55, %v10467_v19 }
 0x440   :  { %v5630_v37 = vmul.f32 0.2, %v7500_v32  ;;  %v7502_v48 = vadd.f32 %v4734_v1, %v9807_v5  ;;  %6397 = vmatprep.mubr.bf16.mxu0 %v5822_v58  ;;  %v9898_v5 = vrot.slane %v9797_v55, %v10468_v28 }
 0x441   :  { %v5633_v40 = vmul.f32 0.2, %v7501_v53  ;;  %6398 = vmatmul.mubr.bf16.gmra.mrb[184].mxu0 %v5821_v2  ;;  %v5757_v7 = vmax.f32 %v7499_v46, %v5629_v61 }
 0x442   :  { %v5634_v20 = vmul.f32 0.2, %v7502_v48  ;;  %v5758_v16 = vmax.f32 %v7500_v32, %v5630_v37 }
 0x443   :  { %v5761_v12 = vmax.f32 %v7501_v53, %v5633_v40 }
 0x444   :  { %v5762_v29 = vmax.f32 %v7502_v48, %v5634_v20 }
 0x445   :  { %v5825_v60 = vpack.c.bf16 %v5761_v12, %v5757_v7 }
 0x446   :  { %v5826_v24 = vpack.c.bf16 %v5762_v29, %v5758_v16 }
 0x448   :  { %6407 = vmatprep.mubr.bf16.mxu0 %v5826_v24 }
 0x449   :  { %6408 = vmatmul.mubr.bf16.gmra.mrb[188].mxu0 %v5825_v60 }
 0x464   :  { %v5350_v45 = vpop.f32.mrb[192].mxu1 }
 0x465   :  { %v7503_v62 = vadd.f32 %v5350_v45, %v9893_v52  ;;  %v5352_v57 = vpop.f32.mrb[193].mxu1 }
 0x466   :  { %v7504_v36 = vadd.f32 %v5352_v57, %v9898_v5  ;;  %v5354_v17 = vpop.f32.mrb[194].mxu1 }
 0x467   :  { %v5511_v27 = vmul.f32 0.2, %v7503_v62  ;;  %v7505_v10 = vadd.f32 %v5354_v17, %v9893_v52  ;;  %v5356_v35 = vpop.f32.mrb[195].mxu1 }
 0x468   :  { %v5512_v15 = vmul.f32 0.2, %v7504_v36  ;;  %v7506_v8 = vadd.f32 %v5356_v35, %v9898_v5 }
 0x469   :  { %v5515_v43 = vmul.f32 0.2, %v7505_v10  ;;  %v5639_v47 = vmax.f32 %v7503_v62, %v5511_v27 }
 0x46a   :  { %v5516_v63 = vmul.f32 0.2, %v7506_v8  ;;  %v5640_v55 = vmax.f32 %v7504_v36, %v5512_v15 }
 0x46b   :  { %v5643_v25 = vmax.f32 %v7505_v10, %v5515_v43 }
 0x46c   :  { %v5644_v51 = vmax.f32 %v7506_v8, %v5516_v63  ;;  %v5360_v38 = vpop.f32.mrb[196].mxu1 }
 0x46d   :  { %v5767_v6 = vpack.c.bf16 %v5643_v25, %v5639_v47  ;;  %v7507_v11 = vadd.f32 %v5360_v38, %v9893_v52  ;;  %v5362_v56 = vpop.f32.mrb[197].mxu1 }
 0x46e   :  { %v7508_v54 = vadd.f32 %v5362_v56, %v9898_v5  ;;  %v5364_v13 = vpop.f32.mrb[198].mxu1  ;;  %v5768_v18 = vpack.c.bf16 %v5644_v51, %v5640_v55 }
 0x46f   :  { %v5519_v3 = vmul.f32 0.2, %v7507_v11  ;;  %v7509_v14 = vadd.f32 %v5364_v13, %v9893_v52  ;;  %v5366_v50 = vpop.f32.mrb[199].mxu1 }
 0x470   :  { %v5520_v31 = vmul.f32 0.2, %v7508_v54  ;;  %v7510_v26 = vadd.f32 %v5366_v50, %v9898_v5  ;;  %6450 = vmatprep.mubr.bf16.mxu0 %v5768_v18 }
 0x471   :  { %v5523_v23 = vmul.f32 0.2, %v7509_v14  ;;  %6451 = vmatmul.mubr.bf16.vlgmr.msra.gmra.mrb[128].mxu0 %v5767_v6  ;;  %v5647_v4 = vmax.f32 %v7507_v11, %v5519_v3 }
 0x472   :  { %v5524_v42 = vmul.f32 0.2, %v7510_v26  ;;  %v5648_v21 = vmax.f32 %v7508_v54, %v5520_v31 }
 0x473   :  { %v5651_v9 = vmax.f32 %v7509_v14, %v5523_v23 }
 0x474   :  { %v5652_v41 = vmax.f32 %v7510_v26, %v5524_v42  ;;  %v5370_v44 = vpop.f32.mrb[200].mxu1 }
 0x475   :  { %v7511_v49 = vadd.f32 %v5370_v44, %v9893_v52  ;;  %v5372_v59 = vpop.f32.mrb[201].mxu1  ;;  %v5771_v22 = vpack.c.bf16 %v5651_v9, %v5647_v4 }
 0x476   :  { %v7512_v46 = vadd.f32 %v5372_v59, %v9898_v5  ;;  %v5374_v39 = vpop.f32.mrb[202].mxu1  ;;  %v5772_v2 = vpack.c.bf16 %v5652_v41, %v5648_v21 }
 0x477   :  { %v5527_v32 = vmul.f32 0.2, %v7511_v49  ;;  %v7513_v0 = vadd.f32 %v5374_v39, %v9893_v52  ;;  %v5376_v58 = vpop.f32.mrb[203].mxu1 }
 0x478   :  { %v5528_v61 = vmul.f32 0.2, %v7512_v46  ;;  %v7514_v53 = vadd.f32 %v5376_v58, %v9898_v5  ;;  %6460 = vmatprep.mubr.bf16.mxu0 %v5772_v2 }
 0x479   :  { %v5531_v1 = vmul.f32 0.2, %v7513_v0  ;;  %6461 = vmatmul.mubr.bf16.gmra.mrb[132].mxu0 %v5771_v22  ;;  %v5655_v48 = vmax.f32 %v7511_v49, %v5527_v32 }
 0x47a   :  { %v5532_v37 = vmul.f32 0.2, %v7514_v53  ;;  %v5656_v20 = vmax.f32 %v7512_v46, %v5528_v61 }
 0x47b   :  { %v5659_v40 = vmax.f32 %v7513_v0, %v5531_v1 }
 0x47c   :  { %v5660_v7 = vmax.f32 %v7514_v53, %v5532_v37  ;;  %v5380_v12 = vpop.f32.mrb[204].mxu1 }
 0x47d   :  { %v7515_v16 = vadd.f32 %v5380_v12, %v9893_v52  ;;  %v5382_v29 = vpop.f32.mrb[205].mxu1  ;;  %v5775_v60 = vpack.c.bf16 %v5659_v40, %v5655_v48 }
 0x47e   :  { %v7516_v24 = vadd.f32 %v5382_v29, %v9898_v5  ;;  %v5384_v30 = vpop.f32.mrb[206].mxu1  ;;  %v5776_v19 = vpack.c.bf16 %v5660_v7, %v5656_v20 }
 0x47f   :  { %v5535_v28 = vmul.f32 0.2, %v7515_v16  ;;  %v7517_v45 = vadd.f32 %v5384_v30, %v9893_v52  ;;  %v5386_v62 = vpop.f32.mrb[207].mxu1 }
 0x480   :  { %v5536_v57 = vmul.f32 0.2, %v7516_v24  ;;  %v7518_v36 = vadd.f32 %v5386_v62, %v9898_v5  ;;  %6470 = vmatprep.mubr.bf16.mxu0 %v5776_v19 }
 0x481   :  { %v5539_v17 = vmul.f32 0.2, %v7517_v45  ;;  %6471 = vmatmul.mubr.bf16.gmra.mrb[136].mxu0 %v5775_v60  ;;  %v5663_v10 = vmax.f32 %v7515_v16, %v5535_v28 }
 0x482   :  { %v5540_v27 = vmul.f32 0.2, %v7518_v36  ;;  %v5664_v15 = vmax.f32 %v7516_v24, %v5536_v57 }
 0x483   :  { %v5667_v35 = vmax.f32 %v7517_v45, %v5539_v17 }
 0x484   :  { %v5668_v8 = vmax.f32 %v7518_v36, %v5540_v27  ;;  %v5390_v43 = vpop.f32.mrb[208].mxu1 }
 0x485   :  { %v7519_v63 = vadd.f32 %v5390_v43, %v9893_v52  ;;  %v5392_v47 = vpop.f32.mrb[209].mxu1  ;;  %v5779_v25 = vpack.c.bf16 %v5667_v35, %v5663_v10 }
 0x486   :  { %v7520_v55 = vadd.f32 %v5392_v47, %v9898_v5  ;;  %v5394_v51 = vpop.f32.mrb[210].mxu1  ;;  %v5780_v38 = vpack.c.bf16 %v5668_v8, %v5664_v15 }
 0x487   :  { %v5543_v6 = vmul.f32 0.2, %v7519_v63  ;;  %v7521_v11 = vadd.f32 %v5394_v51, %v9893_v52  ;;  %v5396_v56 = vpop.f32.mrb[211].mxu1 }
 0x488   :  { %v5544_v54 = vmul.f32 0.2, %v7520_v55  ;;  %v7522_v13 = vadd.f32 %v5396_v56, %v9898_v5  ;;  %6480 = vmatprep.mubr.bf16.mxu0 %v5780_v38 }
 0x489   :  { %v5547_v18 = vmul.f32 0.2, %v7521_v11  ;;  %6481 = vmatmul.mubr.bf16.gmra.mrb[140].mxu0 %v5779_v25  ;;  %v5671_v14 = vmax.f32 %v7519_v63, %v5543_v6 }
 0x48a   :  { %v5548_v3 = vmul.f32 0.2, %v7522_v13  ;;  %v5672_v31 = vmax.f32 %v7520_v55, %v5544_v54 }
 0x48b   :  { %v5675_v50 = vmax.f32 %v7521_v11, %v5547_v18 }
 0x48c   :  { %v5676_v26 = vmax.f32 %v7522_v13, %v5548_v3  ;;  %v5400_v23 = vpop.f32.mrb[212].mxu1 }
 0x48d   :  { %v7523_v42 = vadd.f32 %v5400_v23, %v9893_v52  ;;  %v5402_v4 = vpop.f32.mrb[213].mxu1  ;;  %v5783_v9 = vpack.c.bf16 %v5675_v50, %v5671_v14 }
 0x48e   :  { %v7524_v21 = vadd.f32 %v5402_v4, %v9898_v5  ;;  %v5404_v41 = vpop.f32.mrb[214].mxu1  ;;  %v5784_v44 = vpack.c.bf16 %v5676_v26, %v5672_v31 }
 0x48f   :  { %v5551_v49 = vmul.f32 0.2, %v7523_v42  ;;  %v7525_v59 = vadd.f32 %v5404_v41, %v9893_v52  ;;  %v5406_v22 = vpop.f32.mrb[215].mxu1 }
 0x490   :  { %v5552_v46 = vmul.f32 0.2, %v7524_v21  ;;  %v7526_v39 = vadd.f32 %v5406_v22, %v9898_v5  ;;  %6490 = vmatprep.mubr.bf16.mxu0 %v5784_v44 }
 0x491   :  { %v5555_v2 = vmul.f32 0.2, %v7525_v59  ;;  %6491 = vmatmul.mubr.bf16.gmra.mrb[144].mxu0 %v5783_v9  ;;  %v5679_v0 = vmax.f32 %v7523_v42, %v5551_v49 }
 0x492   :  { %v5556_v32 = vmul.f32 0.2, %v7526_v39  ;;  %v5680_v61 = vmax.f32 %v7524_v21, %v5552_v46 }
 0x493   :  { %v5683_v58 = vmax.f32 %v7525_v59, %v5555_v2 }
 0x494   :  { %v5684_v53 = vmax.f32 %v7526_v39, %v5556_v32  ;;  %v5410_v1 = vpop.f32.mrb[216].mxu1 }
 0x495   :  { %v7527_v37 = vadd.f32 %v5410_v1, %v9893_v52  ;;  %v5412_v48 = vpop.f32.mrb[217].mxu1  ;;  %v5787_v40 = vpack.c.bf16 %v5683_v58, %v5679_v0 }
 0x496   :  { %v7528_v20 = vadd.f32 %v5412_v48, %v9898_v5  ;;  %v5414_v7 = vpop.f32.mrb[218].mxu1  ;;  %v5788_v12 = vpack.c.bf16 %v5684_v53, %v5680_v61 }
 0x497   :  { %v5559_v16 = vmul.f32 0.2, %v7527_v37  ;;  %v7529_v29 = vadd.f32 %v5414_v7, %v9893_v52  ;;  %v5416_v60 = vpop.f32.mrb[219].mxu1 }
 0x498   :  { %v5560_v24 = vmul.f32 0.2, %v7528_v20  ;;  %v7530_v30 = vadd.f32 %v5416_v60, %v9898_v5  ;;  %6500 = vmatprep.mubr.bf16.mxu0 %v5788_v12 }
 0x499   :  { %v5563_v19 = vmul.f32 0.2, %v7529_v29  ;;  %6501 = vmatmul.mubr.bf16.gmra.mrb[148].mxu0 %v5787_v40  ;;  %v5687_v45 = vmax.f32 %v7527_v37, %v5559_v16 }
 0x49a   :  { %v5564_v28 = vmul.f32 0.2, %v7530_v30  ;;  %v5688_v57 = vmax.f32 %v7528_v20, %v5560_v24 }
 0x49b   :  { %v5691_v62 = vmax.f32 %v7529_v29, %v5563_v19 }
 0x49c   :  { %v5692_v36 = vmax.f32 %v7530_v30, %v5564_v28  ;;  %v5420_v17 = vpop.f32.mrb[220].mxu1 }
 0x49d   :  { %v7531_v27 = vadd.f32 %v5420_v17, %v9893_v52  ;;  %v5422_v10 = vpop.f32.mrb[221].mxu1  ;;  %v5791_v35 = vpack.c.bf16 %v5691_v62, %v5687_v45 }
 0x49e   :  { %v7532_v15 = vadd.f32 %v5422_v10, %v9898_v5  ;;  %v5424_v8 = vpop.f32.mrb[222].mxu1  ;;  %v5792_v43 = vpack.c.bf16 %v5692_v36, %v5688_v57 }
 0x49f   :  { %v5567_v63 = vmul.f32 0.2, %v7531_v27  ;;  %v7533_v47 = vadd.f32 %v5424_v8, %v9893_v52  ;;  %v5426_v25 = vpop.f32.mrb[223].mxu1 }
 0x4a0   :  { %v5568_v55 = vmul.f32 0.2, %v7532_v15  ;;  %v7534_v51 = vadd.f32 %v5426_v25, %v9898_v5  ;;  %6510 = vmatprep.mubr.bf16.mxu0 %v5792_v43 }
 0x4a1   :  { %v5571_v38 = vmul.f32 0.2, %v7533_v47  ;;  %6511 = vmatmul.mubr.bf16.gmra.mrb[152].mxu0 %v5791_v35  ;;  %v5695_v11 = vmax.f32 %v7531_v27, %v5567_v63 }
 0x4a2   :  { %v5572_v6 = vmul.f32 0.2, %v7534_v51  ;;  %v5696_v54 = vmax.f32 %v7532_v15, %v5568_v55 }
 0x4a3   :  { %v5699_v56 = vmax.f32 %v7533_v47, %v5571_v38 }
 0x4a4   :  { %v5700_v13 = vmax.f32 %v7534_v51, %v5572_v6  ;;  %v5430_v18 = vpop.f32.mrb[224].mxu1 }
 0x4a5   :  { %v7535_v3 = vadd.f32 %v5430_v18, %v9893_v52  ;;  %v5432_v14 = vpop.f32.mrb[225].mxu1  ;;  %v5795_v50 = vpack.c.bf16 %v5699_v56, %v5695_v11 }
 0x4a6   :  { %v7536_v31 = vadd.f32 %v5432_v14, %v9898_v5  ;;  %v5434_v26 = vpop.f32.mrb[226].mxu1  ;;  %v5796_v23 = vpack.c.bf16 %v5700_v13, %v5696_v54 }
 0x4a7   :  { %v5575_v42 = vmul.f32 0.2, %v7535_v3  ;;  %v7537_v4 = vadd.f32 %v5434_v26, %v9893_v52  ;;  %v5436_v9 = vpop.f32.mrb[227].mxu1 }
 0x4a8   :  { %v5576_v21 = vmul.f32 0.2, %v7536_v31  ;;  %v7538_v41 = vadd.f32 %v5436_v9, %v9898_v5  ;;  %6520 = vmatprep.mubr.bf16.mxu0 %v5796_v23 }
 0x4a9   :  { %v5579_v44 = vmul.f32 0.2, %v7537_v4  ;;  %6521 = vmatmul.mubr.bf16.gmra.mrb[156].mxu0 %v5795_v50  ;;  %v5703_v59 = vmax.f32 %v7535_v3, %v5575_v42 }
 0x4aa   :  { %v5580_v49 = vmul.f32 0.2, %v7538_v41  ;;  %v5704_v46 = vmax.f32 %v7536_v31, %v5576_v21 }
 0x4ab   :  { %v5707_v22 = vmax.f32 %v7537_v4, %v5579_v44 }
 0x4ac   :  { %v5708_v39 = vmax.f32 %v7538_v41, %v5580_v49  ;;  %v5440_v2 = vpop.f32.mrb[228].mxu1 }
 0x4ad   :  { %v7539_v32 = vadd.f32 %v5440_v2, %v9893_v52  ;;  %v5442_v0 = vpop.f32.mrb[229].mxu1  ;;  %v5799_v58 = vpack.c.bf16 %v5707_v22, %v5703_v59 }
 0x4ae   :  { %v7540_v61 = vadd.f32 %v5442_v0, %v9898_v5  ;;  %v5444_v53 = vpop.f32.mrb[230].mxu1  ;;  %v5800_v1 = vpack.c.bf16 %v5708_v39, %v5704_v46 }
 0x4af   :  { %v5583_v37 = vmul.f32 0.2, %v7539_v32  ;;  %v7541_v48 = vadd.f32 %v5444_v53, %v9893_v52  ;;  %v5446_v40 = vpop.f32.mrb[231].mxu1 }
 0x4b0   :  { %v5584_v20 = vmul.f32 0.2, %v7540_v61  ;;  %v7542_v7 = vadd.f32 %v5446_v40, %v9898_v5  ;;  %6530 = vmatprep.mubr.bf16.mxu0 %v5800_v1 }
 0x4b1   :  { %v5587_v12 = vmul.f32 0.2, %v7541_v48  ;;  %6531 = vmatmul.mubr.bf16.gmra.mrb[160].mxu0 %v5799_v58  ;;  %v5711_v29 = vmax.f32 %v7539_v32, %v5583_v37 }
 0x4b2   :  { %v5588_v16 = vmul.f32 0.2, %v7542_v7  ;;  %v5712_v24 = vmax.f32 %v7540_v61, %v5584_v20 }
 0x4b3   :  { %v5715_v60 = vmax.f32 %v7541_v48, %v5587_v12 }
 0x4b4   :  { %v5716_v30 = vmax.f32 %v7542_v7, %v5588_v16  ;;  %v5450_v19 = vpop.f32.mrb[232].mxu1 }
 0x4b5   :  { %v7543_v28 = vadd.f32 %v5450_v19, %v9893_v52  ;;  %v5452_v45 = vpop.f32.mrb[233].mxu1  ;;  %v5803_v62 = vpack.c.bf16 %v5715_v60, %v5711_v29 }
 0x4b6   :  { %v7544_v57 = vadd.f32 %v5452_v45, %v9898_v5  ;;  %v5454_v36 = vpop.f32.mrb[234].mxu1  ;;  %v5804_v17 = vpack.c.bf16 %v5716_v30, %v5712_v24 }
 0x4b7   :  { %v5591_v27 = vmul.f32 0.2, %v7543_v28  ;;  %v7545_v10 = vadd.f32 %v5454_v36, %v9893_v52  ;;  %v5456_v35 = vpop.f32.mrb[235].mxu1 }
 0x4b8   :  { %v5592_v15 = vmul.f32 0.2, %v7544_v57  ;;  %v7546_v8 = vadd.f32 %v5456_v35, %v9898_v5  ;;  %6540 = vmatprep.mubr.bf16.mxu0 %v5804_v17 }
 0x4b9   :  { %v5595_v43 = vmul.f32 0.2, %v7545_v10  ;;  %6541 = vmatmul.mubr.bf16.gmra.mrb[164].mxu0 %v5803_v62  ;;  %v5719_v47 = vmax.f32 %v7543_v28, %v5591_v27 }
 0x4ba   :  { %v5596_v63 = vmul.f32 0.2, %v7546_v8  ;;  %v5720_v55 = vmax.f32 %v7544_v57, %v5592_v15 }
 0x4bb   :  { %v5723_v25 = vmax.f32 %v7545_v10, %v5595_v43 }
 0x4bc   :  { %v5724_v51 = vmax.f32 %v7546_v8, %v5596_v63  ;;  %v5460_v38 = vpop.f32.mrb[236].mxu1 }
 0x4bd   :  { %v7547_v6 = vadd.f32 %v5460_v38, %v9893_v52  ;;  %v5462_v11 = vpop.f32.mrb[237].mxu1  ;;  %v5807_v56 = vpack.c.bf16 %v5723_v25, %v5719_v47 }
 0x4be   :  { %v7548_v54 = vadd.f32 %v5462_v11, %v9898_v5  ;;  %v5464_v13 = vpop.f32.mrb[238].mxu1  ;;  %v5808_v18 = vpack.c.bf16 %v5724_v51, %v5720_v55 }
 0x4bf   :  { %v5599_v3 = vmul.f32 0.2, %v7547_v6  ;;  %v7549_v14 = vadd.f32 %v5464_v13, %v9893_v52  ;;  %v5466_v50 = vpop.f32.mrb[239].mxu1 }
 0x4c0   :  { %v5600_v31 = vmul.f32 0.2, %v7548_v54  ;;  %v7550_v26 = vadd.f32 %v5466_v50, %v9898_v5  ;;  %6550 = vmatprep.mubr.bf16.mxu0 %v5808_v18 }
 0x4c1   :  { %v5603_v23 = vmul.f32 0.2, %v7549_v14  ;;  %6551 = vmatmul.mubr.bf16.gmra.mrb[168].mxu0 %v5807_v56  ;;  %v5727_v4 = vmax.f32 %v7547_v6, %v5599_v3 }
 0x4c2   :  { %v5604_v42 = vmul.f32 0.2, %v7550_v26  ;;  %v5728_v21 = vmax.f32 %v7548_v54, %v5600_v31 }
 0x4c3   :  { %v5731_v9 = vmax.f32 %v7549_v14, %v5603_v23 }
 0x4c4   :  { %v5732_v41 = vmax.f32 %v7550_v26, %v5604_v42  ;;  %v5470_v44 = vpop.f32.mrb[240].mxu1 }
 0x4c5   :  { %v7551_v49 = vadd.f32 %v5470_v44, %v9893_v52  ;;  %v5472_v59 = vpop.f32.mrb[241].mxu1  ;;  %v5811_v22 = vpack.c.bf16 %v5731_v9, %v5727_v4 }
 0x4c6   :  { %v7552_v46 = vadd.f32 %v5472_v59, %v9898_v5  ;;  %v5474_v39 = vpop.f32.mrb[242].mxu1  ;;  %v5812_v2 = vpack.c.bf16 %v5732_v41, %v5728_v21 }
 0x4c7   :  { %v5607_v32 = vmul.f32 0.2, %v7551_v49  ;;  %v7553_v0 = vadd.f32 %v5474_v39, %v9893_v52  ;;  %v5476_v58 = vpop.f32.mrb[243].mxu1 }
 0x4c8   :  { %v5608_v61 = vmul.f32 0.2, %v7552_v46  ;;  %v7554_v53 = vadd.f32 %v5476_v58, %v9898_v5  ;;  %6560 = vmatprep.mubr.bf16.mxu0 %v5812_v2 }
 0x4c9   :  { %v5611_v1 = vmul.f32 0.2, %v7553_v0  ;;  %6561 = vmatmul.mubr.bf16.gmra.mrb[172].mxu0 %v5811_v22  ;;  %v5735_v48 = vmax.f32 %v7551_v49, %v5607_v32 }
 0x4ca   :  { %v5612_v37 = vmul.f32 0.2, %v7554_v53  ;;  %v5736_v20 = vmax.f32 %v7552_v46, %v5608_v61 }
 0x4cb   :  { %v5739_v40 = vmax.f32 %v7553_v0, %v5611_v1 }
 0x4cc   :  { %v5740_v7 = vmax.f32 %v7554_v53, %v5612_v37  ;;  %v5480_v12 = vpop.f32.mrb[244].mxu1 }
 0x4cd   :  { %v7555_v16 = vadd.f32 %v5480_v12, %v9893_v52  ;;  %v5482_v29 = vpop.f32.mrb[245].mxu1  ;;  %v5815_v60 = vpack.c.bf16 %v5739_v40, %v5735_v48 }
 0x4ce   :  { %v7556_v24 = vadd.f32 %v5482_v29, %v9898_v5  ;;  %v5484_v30 = vpop.f32.mrb[246].mxu1  ;;  %v5816_v19 = vpack.c.bf16 %v5740_v7, %v5736_v20  ;;  %v6739_v20 = vld [vmem:[%s10279_s7] sm:$0x3] }
 0x4cf   :  { %v5615_v28 = vmul.f32 0.2, %v7555_v16  ;;  %v7557_v45 = vadd.f32 %v5484_v30, %v9893_v52  ;;  %v5486_v62 = vpop.f32.mrb[247].mxu1 }
 0x4d0   :  { %v5616_v57 = vmul.f32 0.2, %v7556_v24  ;;  %v7558_v36 = vadd.f32 %v5486_v62, %v9898_v5  ;;  %6570 = vmatprep.mubr.bf16.mxu0 %v5816_v19  ;;  %v9980_v19 = vrot.slane %v6739_v20, %v10464_v33  ;;  %v9984_v62 = vrot.slane %v6739_v20, %v10465_v34 }
 0x4d1   :  { %v5619_v17 = vmul.f32 0.2, %v7557_v45  ;;  %6571 = vmatmul.mubr.bf16.gmra.mrb[176].mxu0 %v5815_v60  ;;  %v5743_v10 = vmax.f32 %v7555_v16, %v5615_v28 }
 0x4d2   :  { %v5620_v27 = vmul.f32 0.2, %v7558_v36  ;;  %v5744_v15 = vmax.f32 %v7556_v24, %v5616_v57 }
 0x4d3   :  { %v5747_v35 = vmax.f32 %v7557_v45, %v5619_v17 }
 0x4d4   :  { %v5748_v8 = vmax.f32 %v7558_v36, %v5620_v27  ;;  %v5490_v43 = vpop.f32.mrb[248].mxu1 }
 0x4d5   :  { %v7559_v63 = vadd.f32 %v5490_v43, %v9893_v52  ;;  %v5492_v47 = vpop.f32.mrb[249].mxu1  ;;  %v5819_v25 = vpack.c.bf16 %v5747_v35, %v5743_v10 }
 0x4d6   :  { %v7560_v55 = vadd.f32 %v5492_v47, %v9898_v5  ;;  %v5494_v51 = vpop.f32.mrb[250].mxu1  ;;  %v5820_v38 = vpack.c.bf16 %v5748_v8, %v5744_v15 }
 0x4d7   :  { %v5623_v6 = vmul.f32 0.2, %v7559_v63  ;;  %v7561_v11 = vadd.f32 %v5494_v51, %v9893_v52  ;;  %v5496_v56 = vpop.f32.mrb[251].mxu1 }
 0x4d8   :  { %v5624_v54 = vmul.f32 0.2, %v7560_v55  ;;  %v7562_v13 = vadd.f32 %v5496_v56, %v9898_v5  ;;  %6580 = vmatprep.mubr.bf16.mxu0 %v5820_v38 }
 0x4d9   :  { %v5627_v18 = vmul.f32 0.2, %v7561_v11  ;;  %6581 = vmatmul.mubr.bf16.gmra.mrb[180].mxu0 %v5819_v25  ;;  %v5751_v14 = vmax.f32 %v7559_v63, %v5623_v6 }
 0x4da   :  { %v5628_v3 = vmul.f32 0.2, %v7562_v13  ;;  %v5752_v31 = vmax.f32 %v7560_v55, %v5624_v54 }
 0x4db   :  { %v5755_v50 = vmax.f32 %v7561_v11, %v5627_v18 }
 0x4dc   :  { %v5756_v26 = vmax.f32 %v7562_v13, %v5628_v3  ;;  %v5500_v23 = vpop.f32.mrb[252].mxu1 }
 0x4dd   :  { %v7563_v42 = vadd.f32 %v5500_v23, %v9893_v52  ;;  %v5502_v4 = vpop.f32.mrb[253].mxu1  ;;  %v5823_v9 = vpack.c.bf16 %v5755_v50, %v5751_v14 }
 0x4de   :  { %v7564_v21 = vadd.f32 %v5502_v4, %v9898_v5  ;;  %v5504_v41 = vpop.f32.mrb[254].mxu1  ;;  %v5824_v44 = vpack.c.bf16 %v5756_v26, %v5752_v31 }
 0x4df   :  { %v5631_v49 = vmul.f32 0.2, %v7563_v42  ;;  %v7565_v59 = vadd.f32 %v5504_v41, %v9893_v52  ;;  %v5506_v22 = vpop.f32.mrb[255].mxu1  ;;  %v5893_v52 = vld [vmem:[%s10278_s6] sm:$0x3] }
 0x4e0   :  { %v5632_v46 = vmul.f32 0.2, %v7564_v21  ;;  %v7566_v39 = vadd.f32 %v5506_v22, %v9898_v5  ;;  %6590 = vmatprep.mubr.bf16.mxu0 %v5824_v44  ;;  %v9968_v48 = vrot.slane %v5893_v52, %v10464_v33  ;;  %v9971_v5 = vrot.slane %v5893_v52, %v10465_v34 }
 0x4e1   :  { %v5635_v2 = vmul.f32 0.2, %v7565_v59  ;;  %6591 = vmatmul.mubr.bf16.gmra.mrb[184].mxu0 %v5823_v9  ;;  %v5759_v0 = vmax.f32 %v7563_v42, %v5631_v49 }
 0x4e2   :  { %v5636_v32 = vmul.f32 0.2, %v7566_v39  ;;  %v5760_v61 = vmax.f32 %v7564_v21, %v5632_v46 }
 0x4e3   :  { %v5763_v58 = vmax.f32 %v7565_v59, %v5635_v2 }
 0x4e4   :  { %v5764_v53 = vmax.f32 %v7566_v39, %v5636_v32 }
 0x4e5   :  { %v5827_v1 = vpack.c.bf16 %v5763_v58, %v5759_v0 }
 0x4e6   :  { %v5828_v37 = vpack.c.bf16 %v5764_v53, %v5760_v61 }
 0x4e8   :  { %6600 = vmatprep.mubr.bf16.mxu0 %v5828_v37 }
 0x4e9   :  { %6601 = vmatmul.mubr.bf16.gmra.mrb[188].mxu0 %v5827_v1 }
 0x544   :  { %v6452_v40 = vpop.f32.mrb[128].mxu0 }
 0x545   :  { %v7567_v7 = vadd.f32 %v6452_v40, %v9968_v48  ;;  %v6454_v12 = vpop.f32.mrb[129].mxu0 }
 0x546   :  { %v7568_v16 = vadd.f32 %v6454_v12, %v9971_v5  ;;  %v6456_v29 = vpop.f32.mrb[130].mxu0 }
 0x547   :  { %v6611_v60 = vmul.f32 0.2, %v7567_v7  ;;  %v7569_v24 = vadd.f32 %v6456_v29, %v9968_v48  ;;  %v6458_v30 = vpop.f32.mrb[131].mxu0 }
 0x548   :  { %v6612_v28 = vmul.f32 0.2, %v7568_v16  ;;  %v7570_v45 = vadd.f32 %v6458_v30, %v9971_v5 }
 0x549   :  { %v6675_v57 = vmax.f32 %v7567_v7, %v6611_v60  ;;  %v6613_v36 = vmul.f32 0.2, %v7569_v24 }
 0x54a   :  { %v6676_v17 = vmax.f32 %v7568_v16, %v6612_v28  ;;  %v6614_v27 = vmul.f32 0.2, %v7570_v45 }
 0x54b   :  { %v6677_v10 = vmax.f32 %v7569_v24, %v6613_v36  ;;  %v6751_v35 = vmul.f32 %v9980_v19, %v6675_v57 }
 0x54c   :  { %v6678_v15 = vmax.f32 %v7570_v45, %v6614_v27  ;;  %v6462_v8 = vpop.f32.mrb[132].mxu0  ;;  %v6752_v43 = vmul.f32 %v9984_v62, %v6676_v17 }
 0x54d   :  { %v7571_v33 = vadd.f32 %v6462_v8, %v9968_v48  ;;  %v6464_v63 = vpop.f32.mrb[133].mxu0  ;;  %v6753_v47 = vmul.f32 %v9980_v19, %v6677_v10 }
 0x54e   :  { %v7572_v25 = vadd.f32 %v6464_v63, %v9971_v5  ;;  %v6466_v34 = vpop.f32.mrb[134].mxu0  ;;  %v6815_v55 = vadd.f32 %v6752_v43, %v6751_v35  ;;  %v6754_v51 = vmul.f32 %v9984_v62, %v6678_v15 }
 0x54f   :  { %v6615_v38 = vmul.f32 0.2, %v7571_v33  ;;  %v7573_v6 = vadd.f32 %v6466_v34, %v9968_v48  ;;  %v6468_v11 = vpop.f32.mrb[135].mxu0 }
 0x550   :  { %v6616_v56 = vmul.f32 0.2, %v7572_v25  ;;  %v7574_v54 = vadd.f32 %v6468_v11, %v9971_v5  ;;  %6816 = vadd.xlane.f32.xlu0 %v6815_v55  ;;  %v6818_v13 = vadd.f32 %v6754_v51, %v6753_v47 }
 0x551   :  { %v6679_v18 = vmax.f32 %v7571_v33, %v6615_v38  ;;  %v6617_v3 = vmul.f32 0.2, %v7573_v6 }
 0x552   :  { %v6680_v14 = vmax.f32 %v7572_v25, %v6616_v56  ;;  %v6618_v50 = vmul.f32 0.2, %v7574_v54 }
 0x553   :  { %v6681_v31 = vmax.f32 %v7573_v6, %v6617_v3  ;;  %v6755_v26 = vmul.f32 %v9980_v19, %v6679_v18 }
 0x554   :  { %v6682_v23 = vmax.f32 %v7574_v54, %v6618_v50  ;;  %v6472_v42 = vpop.f32.mrb[136].mxu0  ;;  %6819 = vadd.xlane.f32.xlu0 %v6818_v13  ;;  %v6756_v4 = vmul.f32 %v9984_v62, %v6680_v14 }
 0x555   :  { %v7575_v9 = vadd.f32 %v6472_v42, %v9968_v48  ;;  %v6474_v21 = vpop.f32.mrb[137].mxu0  ;;  %v6757_v41 = vmul.f32 %v9980_v19, %v6681_v31 }
 0x556   :  { %v7576_v44 = vadd.f32 %v6474_v21, %v9971_v5  ;;  %v6476_v49 = vpop.f32.mrb[138].mxu0  ;;  %v6821_v59 = vadd.f32 %v6756_v4, %v6755_v26  ;;  %v6758_v22 = vmul.f32 %v9984_v62, %v6682_v23 }
 0x557   :  { %v6619_v46 = vmul.f32 0.2, %v7575_v9  ;;  %v7577_v39 = vadd.f32 %v6476_v49, %v9968_v48  ;;  %v6478_v2 = vpop.f32.mrb[139].mxu0 }
 0x558   :  { %v6620_v32 = vmul.f32 0.2, %v7576_v44  ;;  %v7578_v0 = vadd.f32 %v6478_v2, %v9971_v5  ;;  %6822 = vadd.xlane.f32.xlu1 %v6821_v59  ;;  %v6824_v58 = vadd.f32 %v6758_v22, %v6757_v41 }
 0x559   :  { %v6683_v61 = vmax.f32 %v7575_v9, %v6619_v46  ;;  %v6621_v53 = vmul.f32 0.2, %v7577_v39 }
 0x55a   :  { %v6684_v1 = vmax.f32 %v7576_v44, %v6620_v32  ;;  %v6622_v37 = vmul.f32 0.2, %v7578_v0 }
 0x55b   :  { %v6685_v52 = vmax.f32 %v7577_v39, %v6621_v53  ;;  %v6759_v40 = vmul.f32 %v9980_v19, %v6683_v61 }
 0x55c   :  { %v6686_v20 = vmax.f32 %v7578_v0, %v6622_v37  ;;  %v6482_v7 = vpop.f32.mrb[140].mxu0  ;;  %6825 = vadd.xlane.f32.xlu1 %v6824_v58  ;;  %v6760_v12 = vmul.f32 %v9984_v62, %v6684_v1 }
 0x55d   :  { %v7579_v16 = vadd.f32 %v6482_v7, %v9968_v48  ;;  %v6484_v29 = vpop.f32.mrb[141].mxu0  ;;  %v6761_v60 = vmul.f32 %v9980_v19, %v6685_v52 }
 0x55e   :  { %v7580_v24 = vadd.f32 %v6484_v29, %v9971_v5  ;;  %v6486_v30 = vpop.f32.mrb[142].mxu0  ;;  %v6827_v28 = vadd.f32 %v6760_v12, %v6759_v40  ;;  %v6762_v45 = vmul.f32 %v9984_v62, %v6686_v20 }
 0x55f   :  { %v6623_v57 = vmul.f32 0.2, %v7579_v16  ;;  %v7581_v36 = vadd.f32 %v6486_v30, %v9968_v48  ;;  %v6488_v17 = vpop.f32.mrb[143].mxu0 }
 0x560   :  { %v6624_v27 = vmul.f32 0.2, %v7580_v24  ;;  %v7582_v10 = vadd.f32 %v6488_v17, %v9971_v5  ;;  %6828 = vadd.xlane.f32.xlu0 %v6827_v28  ;;  %v6830_v35 = vadd.f32 %v6762_v45, %v6761_v60 }
 0x561   :  { %v6687_v15 = vmax.f32 %v7579_v16, %v6623_v57  ;;  %v6625_v8 = vmul.f32 0.2, %v7581_v36 }
 0x562   :  { %v6688_v43 = vmax.f32 %v7580_v24, %v6624_v27  ;;  %v6626_v33 = vmul.f32 0.2, %v7582_v10  ;;  %6831 = vadd.xlane.f32.xlu1 %v6830_v35 }
 0x563   :  { %v6689_v63 = vmax.f32 %v7581_v36, %v6625_v8  ;;  %v6763_v47 = vmul.f32 %v9980_v19, %v6687_v15 }
 0x564   :  { %v6690_v25 = vmax.f32 %v7582_v10, %v6626_v33  ;;  %v6492_v34 = vpop.f32.mrb[144].mxu0  ;;  %v6764_v55 = vmul.f32 %v9984_v62, %v6688_v43 }
 0x565   :  { %v7583_v51 = vadd.f32 %v6492_v34, %v9968_v48  ;;  %v6494_v38 = vpop.f32.mrb[145].mxu0  ;;  %v6765_v6 = vmul.f32 %v9980_v19, %v6689_v63 }
 0x566   :  { %v7584_v11 = vadd.f32 %v6494_v38, %v9971_v5  ;;  %v6496_v56 = vpop.f32.mrb[146].mxu0  ;;  %v6833_v54 = vadd.f32 %v6764_v55, %v6763_v47  ;;  %v6766_v13 = vmul.f32 %v9984_v62, %v6690_v25 }
 0x567   :  { %v6627_v18 = vmul.f32 0.2, %v7583_v51  ;;  %v7585_v3 = vadd.f32 %v6496_v56, %v9968_v48  ;;  %v6498_v14 = vpop.f32.mrb[147].mxu0 }
 0x568   :  { %v6628_v50 = vmul.f32 0.2, %v7584_v11  ;;  %v7586_v31 = vadd.f32 %v6498_v14, %v9971_v5  ;;  %6834 = vadd.xlane.f32.xlu0 %v6833_v54  ;;  %v6836_v26 = vadd.f32 %v6766_v13, %v6765_v6 }
 0x569   :  { %v6691_v23 = vmax.f32 %v7583_v51, %v6627_v18  ;;  %v6629_v42 = vmul.f32 0.2, %v7585_v3 }
 0x56a   :  { %v6692_v4 = vmax.f32 %v7584_v11, %v6628_v50  ;;  %v6630_v9 = vmul.f32 0.2, %v7586_v31  ;;  %6837 = vadd.xlane.f32.xlu1 %v6836_v26 }
 0x56b   :  { %v6693_v21 = vmax.f32 %v7585_v3, %v6629_v42  ;;  %v6767_v41 = vmul.f32 %v9980_v19, %v6691_v23 }
 0x56c   :  { %v6694_v44 = vmax.f32 %v7586_v31, %v6630_v9  ;;  %v6502_v49 = vpop.f32.mrb[148].mxu0  ;;  %v6768_v59 = vmul.f32 %v9984_v62, %v6692_v4 }
 0x56d   :  { %v7587_v22 = vadd.f32 %v6502_v49, %v9968_v48  ;;  %v6504_v46 = vpop.f32.mrb[149].mxu0  ;;  %v6769_v39 = vmul.f32 %v9980_v19, %v6693_v21 }
 0x56e   :  { %v7588_v2 = vadd.f32 %v6504_v46, %v9971_v5  ;;  %v6506_v32 = vpop.f32.mrb[150].mxu0  ;;  %v6839_v0 = vadd.f32 %v6768_v59, %v6767_v41  ;;  %v6770_v58 = vmul.f32 %v9984_v62, %v6694_v44 }
 0x56f   :  { %v6631_v61 = vmul.f32 0.2, %v7587_v22  ;;  %v7589_v53 = vadd.f32 %v6506_v32, %v9968_v48  ;;  %v6508_v1 = vpop.f32.mrb[151].mxu0 }
 0x570   :  { %v6632_v37 = vmul.f32 0.2, %v7588_v2  ;;  %v7590_v52 = vadd.f32 %v6508_v1, %v9971_v5  ;;  %6840 = vadd.xlane.f32.xlu0 %v6839_v0  ;;  %v6842_v40 = vadd.f32 %v6770_v58, %v6769_v39 }
 0x571   :  { %v6695_v20 = vmax.f32 %v7587_v22, %v6631_v61  ;;  %v6633_v7 = vmul.f32 0.2, %v7589_v53 }
 0x572   :  { %v6696_v12 = vmax.f32 %v7588_v2, %v6632_v37  ;;  %v6634_v16 = vmul.f32 0.2, %v7590_v52  ;;  %6843 = vadd.xlane.f32.xlu1 %v6842_v40 }
 0x573   :  { %v6697_v29 = vmax.f32 %v7589_v53, %v6633_v7  ;;  %v6771_v60 = vmul.f32 %v9980_v19, %v6695_v20 }
 0x574   :  { %v6698_v24 = vmax.f32 %v7590_v52, %v6634_v16  ;;  %v6512_v30 = vpop.f32.mrb[152].mxu0  ;;  %v6772_v28 = vmul.f32 %v9984_v62, %v6696_v12 }
 0x575   :  { %v7591_v45 = vadd.f32 %v6512_v30, %v9968_v48  ;;  %v6514_v57 = vpop.f32.mrb[153].mxu0  ;;  %v6773_v36 = vmul.f32 %v9980_v19, %v6697_v29 }
 0x576   :  { %v7592_v17 = vadd.f32 %v6514_v57, %v9971_v5  ;;  %v6516_v27 = vpop.f32.mrb[154].mxu0  ;;  %v6845_v10 = vadd.f32 %v6772_v28, %v6771_v60  ;;  %v6774_v35 = vmul.f32 %v9984_v62, %v6698_v24 }
 0x577   :  { %v6635_v15 = vmul.f32 0.2, %v7591_v45  ;;  %v7593_v8 = vadd.f32 %v6516_v27, %v9968_v48  ;;  %v6518_v43 = vpop.f32.mrb[155].mxu0 }
 0x578   :  { %v6636_v33 = vmul.f32 0.2, %v7592_v17  ;;  %v7594_v63 = vadd.f32 %v6518_v43, %v9971_v5  ;;  %6846 = vadd.xlane.f32.xlu0 %v6845_v10  ;;  %v6848_v47 = vadd.f32 %v6774_v35, %v6773_v36 }
 0x579   :  { %v6699_v25 = vmax.f32 %v7591_v45, %v6635_v15  ;;  %v6637_v34 = vmul.f32 0.2, %v7593_v8 }
 0x57a   :  { %v6700_v55 = vmax.f32 %v7592_v17, %v6636_v33  ;;  %v6638_v51 = vmul.f32 0.2, %v7594_v63  ;;  %6849 = vadd.xlane.f32.xlu1 %v6848_v47 }
 0x57b   :  { %v6701_v38 = vmax.f32 %v7593_v8, %v6637_v34  ;;  %v6775_v6 = vmul.f32 %v9980_v19, %v6699_v25 }
 0x57c   :  { %v6702_v11 = vmax.f32 %v7594_v63, %v6638_v51  ;;  %v6522_v56 = vpop.f32.mrb[156].mxu0  ;;  %v6776_v54 = vmul.f32 %v9984_v62, %v6700_v55 }
 0x57d   :  { %v7595_v13 = vadd.f32 %v6522_v56, %v9968_v48  ;;  %v6524_v18 = vpop.f32.mrb[157].mxu0  ;;  %v6777_v3 = vmul.f32 %v9980_v19, %v6701_v38 }
 0x57e   :  { %v7596_v14 = vadd.f32 %v6524_v18, %v9971_v5  ;;  %v6526_v50 = vpop.f32.mrb[158].mxu0  ;;  %v6851_v31 = vadd.f32 %v6776_v54, %v6775_v6  ;;  %v6778_v26 = vmul.f32 %v9984_v62, %v6702_v11 }
 0x57f   :  { %v6639_v23 = vmul.f32 0.2, %v7595_v13  ;;  %v7597_v42 = vadd.f32 %v6526_v50, %v9968_v48  ;;  %v6528_v4 = vpop.f32.mrb[159].mxu0 }
 0x580   :  { %v6640_v9 = vmul.f32 0.2, %v7596_v14  ;;  %v7598_v21 = vadd.f32 %v6528_v4, %v9971_v5  ;;  %6852 = vadd.xlane.f32.xlu0 %v6851_v31  ;;  %v6854_v41 = vadd.f32 %v6778_v26, %v6777_v3 }
 0x581   :  { %v6703_v44 = vmax.f32 %v7595_v13, %v6639_v23  ;;  %v6641_v49 = vmul.f32 0.2, %v7597_v42 }
 0x582   :  { %v6704_v59 = vmax.f32 %v7596_v14, %v6640_v9  ;;  %v6642_v22 = vmul.f32 0.2, %v7598_v21  ;;  %6855 = vadd.xlane.f32.xlu1 %v6854_v41 }
 0x583   :  { %v6705_v46 = vmax.f32 %v7597_v42, %v6641_v49  ;;  %v6779_v39 = vmul.f32 %v9980_v19, %v6703_v44 }
 0x584   :  { %v6706_v2 = vmax.f32 %v7598_v21, %v6642_v22  ;;  %v6532_v32 = vpop.f32.mrb[160].mxu0  ;;  %v6780_v0 = vmul.f32 %v9984_v62, %v6704_v59 }
 0x585   :  { %v7599_v58 = vadd.f32 %v6532_v32, %v9968_v48  ;;  %v6534_v61 = vpop.f32.mrb[161].mxu0  ;;  %v6781_v53 = vmul.f32 %v9980_v19, %v6705_v46 }
 0x586   :  { %v7600_v1 = vadd.f32 %v6534_v61, %v9971_v5  ;;  %v6536_v37 = vpop.f32.mrb[162].mxu0  ;;  %v6857_v52 = vadd.f32 %v6780_v0, %v6779_v39  ;;  %v6782_v40 = vmul.f32 %v9984_v62, %v6706_v2 }
 0x587   :  { %v6643_v20 = vmul.f32 0.2, %v7599_v58  ;;  %v7601_v7 = vadd.f32 %v6536_v37, %v9968_v48  ;;  %v6538_v12 = vpop.f32.mrb[163].mxu0 }
 0x588   :  { %v6644_v16 = vmul.f32 0.2, %v7600_v1  ;;  %v7602_v29 = vadd.f32 %v6538_v12, %v9971_v5  ;;  %6858 = vadd.xlane.f32.xlu0 %v6857_v52  ;;  %v6860_v60 = vadd.f32 %v6782_v40, %v6781_v53 }
 0x589   :  { %v6707_v24 = vmax.f32 %v7599_v58, %v6643_v20  ;;  %v6645_v30 = vmul.f32 0.2, %v7601_v7 }
 0x58a   :  { %v6708_v28 = vmax.f32 %v7600_v1, %v6644_v16  ;;  %v6646_v45 = vmul.f32 0.2, %v7602_v29  ;;  %6861 = vadd.xlane.f32.xlu1 %v6860_v60 }
 0x58b   :  { %v6709_v57 = vmax.f32 %v7601_v7, %v6645_v30  ;;  %v6783_v36 = vmul.f32 %v9980_v19, %v6707_v24 }
 0x58c   :  { %v6710_v17 = vmax.f32 %v7602_v29, %v6646_v45  ;;  %v6542_v27 = vpop.f32.mrb[164].mxu0  ;;  %v6784_v10 = vmul.f32 %v9984_v62, %v6708_v28 }
 0x58d   :  { %v7603_v35 = vadd.f32 %v6542_v27, %v9968_v48  ;;  %v6544_v15 = vpop.f32.mrb[165].mxu0  ;;  %v6785_v8 = vmul.f32 %v9980_v19, %v6709_v57 }
 0x58e   :  { %v7604_v43 = vadd.f32 %v6544_v15, %v9971_v5  ;;  %v6546_v33 = vpop.f32.mrb[166].mxu0  ;;  %v6863_v63 = vadd.f32 %v6784_v10, %v6783_v36  ;;  %v6786_v47 = vmul.f32 %v9984_v62, %v6710_v17 }
 0x58f   :  { %v6647_v25 = vmul.f32 0.2, %v7603_v35  ;;  %v7605_v34 = vadd.f32 %v6546_v33, %v9968_v48  ;;  %v6548_v55 = vpop.f32.mrb[167].mxu0 }
 0x590   :  { %v6648_v51 = vmul.f32 0.2, %v7604_v43  ;;  %v7606_v38 = vadd.f32 %v6548_v55, %v9971_v5  ;;  %6864 = vadd.xlane.f32.xlu0 %v6863_v63  ;;  %v6866_v6 = vadd.f32 %v6786_v47, %v6785_v8 }
 0x591   :  { %v6711_v11 = vmax.f32 %v7603_v35, %v6647_v25  ;;  %v6649_v56 = vmul.f32 0.2, %v7605_v34 }
 0x592   :  { %v6712_v54 = vmax.f32 %v7604_v43, %v6648_v51  ;;  %v6650_v13 = vmul.f32 0.2, %v7606_v38  ;;  %6867 = vadd.xlane.f32.xlu1 %v6866_v6 }
 0x593   :  { %v6713_v18 = vmax.f32 %v7605_v34, %v6649_v56  ;;  %v6787_v3 = vmul.f32 %v9980_v19, %v6711_v11 }
 0x594   :  { %v6714_v14 = vmax.f32 %v7606_v38, %v6650_v13  ;;  %v6552_v50 = vpop.f32.mrb[168].mxu0  ;;  %v6788_v31 = vmul.f32 %v9984_v62, %v6712_v54 }
 0x595   :  { %v7607_v26 = vadd.f32 %v6552_v50, %v9968_v48  ;;  %v6554_v23 = vpop.f32.mrb[169].mxu0  ;;  %v6789_v42 = vmul.f32 %v9980_v19, %v6713_v18 }
 0x596   :  { %v7608_v4 = vadd.f32 %v6554_v23, %v9971_v5  ;;  %v6556_v9 = vpop.f32.mrb[170].mxu0  ;;  %v6869_v21 = vadd.f32 %v6788_v31, %v6787_v3  ;;  %v6790_v41 = vmul.f32 %v9984_v62, %v6714_v14 }
 0x597   :  { %v6651_v44 = vmul.f32 0.2, %v7607_v26  ;;  %v7609_v49 = vadd.f32 %v6556_v9, %v9968_v48  ;;  %v6558_v59 = vpop.f32.mrb[171].mxu0 }
 0x598   :  { %v6652_v22 = vmul.f32 0.2, %v7608_v4  ;;  %v7610_v46 = vadd.f32 %v6558_v59, %v9971_v5  ;;  %6870 = vadd.xlane.f32.xlu0 %v6869_v21  ;;  %v6872_v39 = vadd.f32 %v6790_v41, %v6789_v42 }
 0x599   :  { %v6715_v2 = vmax.f32 %v7607_v26, %v6651_v44  ;;  %v6653_v32 = vmul.f32 0.2, %v7609_v49 }
 0x59a   :  { %v6716_v0 = vmax.f32 %v7608_v4, %v6652_v22  ;;  %v6654_v58 = vmul.f32 0.2, %v7610_v46  ;;  %6873 = vadd.xlane.f32.xlu1 %v6872_v39 }
 0x59b   :  { %v6717_v61 = vmax.f32 %v7609_v49, %v6653_v32  ;;  %v6791_v53 = vmul.f32 %v9980_v19, %v6715_v2 }
 0x59c   :  { %v6718_v1 = vmax.f32 %v7610_v46, %v6654_v58  ;;  %v6562_v37 = vpop.f32.mrb[172].mxu0  ;;  %v6792_v52 = vmul.f32 %v9984_v62, %v6716_v0 }
 0x59d   :  { %v7611_v40 = vadd.f32 %v6562_v37, %v9968_v48  ;;  %v6564_v20 = vpop.f32.mrb[173].mxu0  ;;  %v6793_v7 = vmul.f32 %v9980_v19, %v6717_v61 }
 0x59e   :  { %v7612_v12 = vadd.f32 %v6564_v20, %v9971_v5  ;;  %v6566_v16 = vpop.f32.mrb[174].mxu0  ;;  %v6875_v29 = vadd.f32 %v6792_v52, %v6791_v53  ;;  %v6794_v60 = vmul.f32 %v9984_v62, %v6718_v1 }
 0x59f   :  { %v6655_v24 = vmul.f32 0.2, %v7611_v40  ;;  %v7613_v30 = vadd.f32 %v6566_v16, %v9968_v48  ;;  %v6568_v28 = vpop.f32.mrb[175].mxu0 }
 0x5a0   :  { %v6656_v45 = vmul.f32 0.2, %v7612_v12  ;;  %v7614_v57 = vadd.f32 %v6568_v28, %v9971_v5  ;;  %6876 = vadd.xlane.f32.xlu0 %v6875_v29  ;;  %v6878_v36 = vadd.f32 %v6794_v60, %v6793_v7 }
 0x5a1   :  { %v6719_v17 = vmax.f32 %v7611_v40, %v6655_v24  ;;  %v6657_v27 = vmul.f32 0.2, %v7613_v30 }
 0x5a2   :  { %v6720_v10 = vmax.f32 %v7612_v12, %v6656_v45  ;;  %v6658_v35 = vmul.f32 0.2, %v7614_v57  ;;  %6879 = vadd.xlane.f32.xlu1 %v6878_v36 }
 0x5a3   :  { %v6721_v15 = vmax.f32 %v7613_v30, %v6657_v27  ;;  %v6795_v8 = vmul.f32 %v9980_v19, %v6719_v17 }
 0x5a4   :  { %v6722_v43 = vmax.f32 %v7614_v57, %v6658_v35  ;;  %v6572_v33 = vpop.f32.mrb[176].mxu0  ;;  %v6796_v63 = vmul.f32 %v9984_v62, %v6720_v10 }
 0x5a5   :  { %v7615_v47 = vadd.f32 %v6572_v33, %v9968_v48  ;;  %v6574_v25 = vpop.f32.mrb[177].mxu0  ;;  %v6797_v34 = vmul.f32 %v9980_v19, %v6721_v15 }
 0x5a6   :  { %v7616_v55 = vadd.f32 %v6574_v25, %v9971_v5  ;;  %v6576_v51 = vpop.f32.mrb[178].mxu0  ;;  %v6881_v38 = vadd.f32 %v6796_v63, %v6795_v8  ;;  %v6798_v6 = vmul.f32 %v9984_v62, %v6722_v43 }
 0x5a7   :  { %v6659_v11 = vmul.f32 0.2, %v7615_v47  ;;  %v7617_v56 = vadd.f32 %v6576_v51, %v9968_v48  ;;  %v6578_v54 = vpop.f32.mrb[179].mxu0 }
 0x5a8   :  { %v6660_v13 = vmul.f32 0.2, %v7616_v55  ;;  %v7618_v18 = vadd.f32 %v6578_v54, %v9971_v5  ;;  %6882 = vadd.xlane.f32.xlu0 %v6881_v38  ;;  %v6884_v3 = vadd.f32 %v6798_v6, %v6797_v34 }
 0x5a9   :  { %v6723_v14 = vmax.f32 %v7615_v47, %v6659_v11  ;;  %v6661_v50 = vmul.f32 0.2, %v7617_v56 }
 0x5aa   :  { %v6724_v31 = vmax.f32 %v7616_v55, %v6660_v13  ;;  %v6662_v26 = vmul.f32 0.2, %v7618_v18  ;;  %6885 = vadd.xlane.f32.xlu1 %v6884_v3 }
 0x5ab   :  { %v6725_v23 = vmax.f32 %v7617_v56, %v6661_v50  ;;  %v6799_v42 = vmul.f32 %v9980_v19, %v6723_v14 }
 0x5ac   :  { %v6726_v4 = vmax.f32 %v7618_v18, %v6662_v26  ;;  %v6582_v9 = vpop.f32.mrb[180].mxu0  ;;  %v6800_v21 = vmul.f32 %v9984_v62, %v6724_v31 }
 0x5ad   :  { %v7619_v41 = vadd.f32 %v6582_v9, %v9968_v48  ;;  %v6584_v44 = vpop.f32.mrb[181].mxu0  ;;  %v6801_v49 = vmul.f32 %v9980_v19, %v6725_v23 }
 0x5ae   :  { %v7620_v59 = vadd.f32 %v6584_v44, %v9971_v5  ;;  %v6586_v22 = vpop.f32.mrb[182].mxu0  ;;  %v6887_v46 = vadd.f32 %v6800_v21, %v6799_v42  ;;  %v6802_v39 = vmul.f32 %v9984_v62, %v6726_v4 }
 0x5af   :  { %v6663_v2 = vmul.f32 0.2, %v7619_v41  ;;  %v7621_v32 = vadd.f32 %v6586_v22, %v9968_v48  ;;  %v6588_v0 = vpop.f32.mrb[183].mxu0 }
 0x5b0   :  { %v6664_v58 = vmul.f32 0.2, %v7620_v59  ;;  %v7622_v61 = vadd.f32 %v6588_v0, %v9971_v5  ;;  %6888 = vadd.xlane.f32.xlu0 %v6887_v46  ;;  %v6890_v53 = vadd.f32 %v6802_v39, %v6801_v49 }
 0x5b1   :  { %v6727_v1 = vmax.f32 %v7619_v41, %v6663_v2  ;;  %v6665_v37 = vmul.f32 0.2, %v7621_v32  ;;  %v10110_v2 = vld [vmem:[#allocation2] ss:$0 sm:$0xff] }
 0x5b2   :  { %v6728_v52 = vmax.f32 %v7620_v59, %v6664_v58  ;;  %v6666_v40 = vmul.f32 0.2, %v7622_v61  ;;  %6891 = vadd.xlane.f32.xlu1 %v6890_v53 }
 0x5b3   :  { %v6729_v20 = vmax.f32 %v7621_v32, %v6665_v37  ;;  %v6803_v7 = vmul.f32 %v9980_v19, %v6727_v1 }
 0x5b4   :  { %v6730_v12 = vmax.f32 %v7622_v61, %v6666_v40  ;;  %v6592_v16 = vpop.f32.mrb[184].mxu0  ;;  %v6804_v29 = vmul.f32 %v9984_v62, %v6728_v52 }
 0x5b5   :  { %v7623_v60 = vadd.f32 %v6592_v16, %v9968_v48  ;;  %v6594_v24 = vpop.f32.mrb[185].mxu0  ;;  %v6805_v30 = vmul.f32 %v9980_v19, %v6729_v20 }
 0x5b6   :  { %v7624_v28 = vadd.f32 %v6594_v24, %v9971_v5  ;;  %v6596_v45 = vpop.f32.mrb[186].mxu0  ;;  %v6893_v57 = vadd.f32 %v6804_v29, %v6803_v7  ;;  %v6806_v36 = vmul.f32 %v9984_v62, %v6730_v12 }
 0x5b7   :  { %v6667_v17 = vmul.f32 0.2, %v7623_v60  ;;  %v7625_v27 = vadd.f32 %v6596_v45, %v9968_v48  ;;  %v6598_v10 = vpop.f32.mrb[187].mxu0 }
 0x5b8   :  { %v6668_v35 = vmul.f32 0.2, %v7624_v28  ;;  %v7626_v15 = vadd.f32 %v6598_v10, %v9971_v5  ;;  %6894 = vadd.xlane.f32.xlu0 %v6893_v57  ;;  %v6896_v8 = vadd.f32 %v6806_v36, %v6805_v30 }
 0x5b9   :  { %v6731_v43 = vmax.f32 %v7623_v60, %v6667_v17  ;;  %v6669_v33 = vmul.f32 0.2, %v7625_v27 }
 0x5ba   :  { %v6732_v63 = vmax.f32 %v7624_v28, %v6668_v35  ;;  %v6670_v47 = vmul.f32 0.2, %v7626_v15  ;;  %6897 = vadd.xlane.f32.xlu1 %v6896_v8 }
 0x5bb   :  { %v6733_v25 = vmax.f32 %v7625_v27, %v6669_v33  ;;  %v6807_v34 = vmul.f32 %v9980_v19, %v6731_v43 }
 0x5bc   :  { %v6734_v55 = vmax.f32 %v7626_v15, %v6670_v47  ;;  %v6602_v51 = vpop.f32.mrb[188].mxu0  ;;  %v6808_v38 = vmul.f32 %v9984_v62, %v6732_v63 }
 0x5bd   :  { %v7627_v6 = vadd.f32 %v6602_v51, %v9968_v48  ;;  %v6604_v11 = vpop.f32.mrb[189].mxu0  ;;  %v6809_v56 = vmul.f32 %v9980_v19, %v6733_v25 }
 0x5be   :  { %v7628_v54 = vadd.f32 %v6604_v11, %v9971_v5  ;;  %v6606_v13 = vpop.f32.mrb[190].mxu0  ;;  %v6899_v18 = vadd.f32 %v6808_v38, %v6807_v34  ;;  %v6810_v3 = vmul.f32 %v9984_v62, %v6734_v55 }
 0x5bf   :  { %v6671_v14 = vmul.f32 0.2, %v7627_v6  ;;  %v7629_v50 = vadd.f32 %v6606_v13, %v9968_v48  ;;  %v6608_v31 = vpop.f32.mrb[191].mxu0 }
 0x5c0   :  { %v6672_v26 = vmul.f32 0.2, %v7628_v54  ;;  %v7630_v23 = vadd.f32 %v6608_v31, %v9971_v5  ;;  %6900 = vadd.xlane.f32.xlu0 %v6899_v18  ;;  %v6902_v42 = vadd.f32 %v6810_v3, %v6809_v56 }
 0x5c1   :  { %v6735_v4 = vmax.f32 %v7627_v6, %v6671_v14  ;;  %v6673_v9 = vmul.f32 0.2, %v7629_v50 }
 0x5c2   :  { %v6736_v21 = vmax.f32 %v7628_v54, %v6672_v26  ;;  %v6674_v41 = vmul.f32 0.2, %v7630_v23  ;;  %6903 = vadd.xlane.f32.xlu1 %v6902_v42 }
 0x5c3   :  { %v6737_v44 = vmax.f32 %v7629_v50, %v6673_v9  ;;  %v6811_v49 = vmul.f32 %v9980_v19, %v6735_v4 }
 0x5c4   :  { %v6738_v59 = vmax.f32 %v7630_v23, %v6674_v41  ;;  %v6812_v22 = vmul.f32 %v9984_v62, %v6736_v21 }
 0x5c5   :  { %v6813_v46 = vmul.f32 %v9980_v19, %v6737_v44 }
 0x5c6   :  { %v6905_v48 = vadd.f32 %v6812_v22, %v6811_v49  ;;  %v6814_v39 = vmul.f32 %v9984_v62, %v6738_v59 }
 0x5c8   :  { %6906 = vadd.xlane.f32.xlu0 %v6905_v48  ;;  %v6908_v5 = vadd.f32 %v6814_v39, %v6813_v46 }
 0x5ca   :  { %6909 = vadd.xlane.f32.xlu1 %v6908_v5 }
 0x5dd   :  { %v6817_v32 = vpop.xlane.xlu0 %6816 }
 0x5de   :  { %v6918_v0 = vadd.f32 %v10110_v2, %v6817_v32 }
 0x5e0   :  { %6951 = vst.msk [vmem:[%s10281_s9] sm:$0xff] %vm6950_vm0, %v6918_v0 }
 0x5e1   :  { %v6820_v58 = vpop.xlane.xlu0 %6819 }
 0x5e2   :  { %v6919_v19 = vadd.f32 %v10110_v2, %v6820_v58 }
 0x5e4   :  { %6952 = vst.msk [vmem:[%s10281_s9 + $0x8] sm:$0xff] %vm6950_vm0, %v6919_v19 }
 0x5e5   :  { %v6823_v62 = vpop.xlane.xlu1 %6822 }
 0x5e6   :  { %v6920_v61 = vadd.f32 %v10110_v2, %v6823_v62 }
 0x5e8   :  { %6953 = vst.msk [vmem:[%s10281_s9 + $0x10] sm:$0xff] %vm6950_vm0, %v6920_v61 }
 0x5e9   :  { %v6826_v53 = vpop.xlane.xlu1 %6825 }
 0x5ea   :  { %v6921_v1 = vadd.f32 %v10110_v2, %v6826_v53 }
 0x5ec   :  { %6954 = vst.msk [vmem:[%s10281_s9 + $0x18] sm:$0xff] %vm6950_vm0, %v6921_v1 }
 0x5ed   :  { %v6829_v37 = vpop.xlane.xlu0 %6828 }
 0x5ee   :  { %v6922_v52 = vadd.f32 %v10110_v2, %v6829_v37 }
 0x5ef   :  { %v6832_v40 = vpop.xlane.xlu1 %6831 }
 0x5f0   :  { %6955 = vst.msk [vmem:[%s10281_s9 + $0x20] sm:$0xff] %vm6950_vm0, %v6922_v52  ;;  %v6923_v20 = vadd.f32 %v10110_v2, %v6832_v40 }
 0x5f2   :  { %6956 = vst.msk [vmem:[%s10281_s9 + $0x28] sm:$0xff] %vm6950_vm0, %v6923_v20 }
 0x5f5   :  { %v6835_v7 = vpop.xlane.xlu0 %6834 }
 0x5f6   :  { %v6924_v12 = vadd.f32 %v10110_v2, %v6835_v7 }
 0x5f7   :  { %v6838_v16 = vpop.xlane.xlu1 %6837 }
 0x5f8   :  { %6957 = vst.msk [vmem:[%s10281_s9 + $0x30] sm:$0xff] %vm6950_vm0, %v6924_v12  ;;  %v6925_v29 = vadd.f32 %v10110_v2, %v6838_v16 }
 0x5fa   :  { %6958 = vst.msk [vmem:[%s10281_s9 + $0x38] sm:$0xff] %vm6950_vm0, %v6925_v29 }
 0x5fd   :  { %v6841_v60 = vpop.xlane.xlu0 %6840 }
 0x5fe   :  { %v6926_v24 = vadd.f32 %v10110_v2, %v6841_v60 }
 0x5ff   :  { %v6844_v30 = vpop.xlane.xlu1 %6843 }
 0x600   :  { %6959 = vst.msk [vmem:[%s10281_s9 + $0x40] sm:$0xff] %vm6950_vm0, %v6926_v24  ;;  %v6927_v28 = vadd.f32 %v10110_v2, %v6844_v30 }
 0x602   :  { %6960 = vst.msk [vmem:[%s10281_s9 + $0x48] sm:$0xff] %vm6950_vm0, %v6927_v28 }
 0x605   :  { %v6847_v45 = vpop.xlane.xlu0 %6846 }
 0x606   :  { %v6928_v57 = vadd.f32 %v10110_v2, %v6847_v45 }
 0x607   :  { %v6850_v36 = vpop.xlane.xlu1 %6849 }
 0x608   :  { %6961 = vst.msk [vmem:[%s10281_s9 + $0x50] sm:$0xff] %vm6950_vm0, %v6928_v57  ;;  %v6929_v17 = vadd.f32 %v10110_v2, %v6850_v36 }
 0x60a   :  { %6962 = vst.msk [vmem:[%s10281_s9 + $0x58] sm:$0xff] %vm6950_vm0, %v6929_v17 }
 0x60d   :  { %v6853_v27 = vpop.xlane.xlu0 %6852 }
 0x60e   :  { %v6930_v10 = vadd.f32 %v10110_v2, %v6853_v27 }
 0x60f   :  { %v6856_v35 = vpop.xlane.xlu1 %6855 }
 0x610   :  { %6963 = vst.msk [vmem:[%s10281_s9 + $0x60] sm:$0xff] %vm6950_vm0, %v6930_v10  ;;  %v6931_v15 = vadd.f32 %v10110_v2, %v6856_v35 }
 0x612   :  { %6964 = vst.msk [vmem:[%s10281_s9 + $0x68] sm:$0xff] %vm6950_vm0, %v6931_v15 }
 0x615   :  { %v6859_v8 = vpop.xlane.xlu0 %6858 }
 0x616   :  { %v6932_v43 = vadd.f32 %v10110_v2, %v6859_v8 }
 0x617   :  { %v6862_v33 = vpop.xlane.xlu1 %6861 }
 0x618   :  { %6965 = vst.msk [vmem:[%s10281_s9 + $0x70] sm:$0xff] %vm6950_vm0, %v6932_v43  ;;  %v6933_v63 = vadd.f32 %v10110_v2, %v6862_v33 }
 0x61a   :  { %6966 = vst.msk [vmem:[%s10281_s9 + $0x78] sm:$0xff] %vm6950_vm0, %v6933_v63 }
 0x61d   :  { %v6865_v47 = vpop.xlane.xlu0 %6864 }
 0x61e   :  { %v6934_v25 = vadd.f32 %v10110_v2, %v6865_v47 }
 0x61f   :  { %v6868_v34 = vpop.xlane.xlu1 %6867 }
 0x620   :  { %6967 = vst.msk [vmem:[%s10281_s9 + $0x80] sm:$0xff] %vm6950_vm0, %v6934_v25  ;;  %v6935_v55 = vadd.f32 %v10110_v2, %v6868_v34 }
 0x622   :  { %6968 = vst.msk [vmem:[%s10281_s9 + $0x88] sm:$0xff] %vm6950_vm0, %v6935_v55 }
 0x625   :  { %v6871_v51 = vpop.xlane.xlu0 %6870 }
 0x626   :  { %v6936_v38 = vadd.f32 %v10110_v2, %v6871_v51 }
 0x627   :  { %v6874_v6 = vpop.xlane.xlu1 %6873 }
 0x628   :  { %6969 = vst.msk [vmem:[%s10281_s9 + $0x90] sm:$0xff] %vm6950_vm0, %v6936_v38  ;;  %v6937_v11 = vadd.f32 %v10110_v2, %v6874_v6 }
 0x62a   :  { %6970 = vst.msk [vmem:[%s10281_s9 + $0x98] sm:$0xff] %vm6950_vm0, %v6937_v11 }
 0x62d   :  { %v6877_v56 = vpop.xlane.xlu0 %6876 }
 0x62e   :  { %v6938_v54 = vadd.f32 %v10110_v2, %v6877_v56 }
 0x62f   :  { %v6880_v13 = vpop.xlane.xlu1 %6879 }
 0x630   :  { %6971 = vst.msk [vmem:[%s10281_s9 + $0xa0] sm:$0xff] %vm6950_vm0, %v6938_v54  ;;  %v6939_v18 = vadd.f32 %v10110_v2, %v6880_v13 }
 0x632   :  { %6972 = vst.msk [vmem:[%s10281_s9 + $0xa8] sm:$0xff] %vm6950_vm0, %v6939_v18 }
 0x635   :  { %v6883_v3 = vpop.xlane.xlu0 %6882 }
 0x636   :  { %v6940_v14 = vadd.f32 %v10110_v2, %v6883_v3 }
 0x637   :  { %v6886_v50 = vpop.xlane.xlu1 %6885 }
 0x638   :  { %6973 = vst.msk [vmem:[%s10281_s9 + $0xb0] sm:$0xff] %vm6950_vm0, %v6940_v14  ;;  %v6941_v31 = vadd.f32 %v10110_v2, %v6886_v50 }
 0x63a   :  { %6974 = vst.msk [vmem:[%s10281_s9 + $0xb8] sm:$0xff] %vm6950_vm0, %v6941_v31 }
 0x63d   :  { %v6889_v26 = vpop.xlane.xlu0 %6888 }
 0x63e   :  { %v6942_v23 = vadd.f32 %v10110_v2, %v6889_v26 }
 0x63f   :  { %v6892_v42 = vpop.xlane.xlu1 %6891 }
 0x640   :  { %6975 = vst.msk [vmem:[%s10281_s9 + $0xc0] sm:$0xff] %vm6950_vm0, %v6942_v23  ;;  %v6943_v4 = vadd.f32 %v10110_v2, %v6892_v42 }
 0x642   :  { %6976 = vst.msk [vmem:[%s10281_s9 + $0xc8] sm:$0xff] %vm6950_vm0, %v6943_v4 }
 0x645   :  { %v6895_v9 = vpop.xlane.xlu0 %6894 }
 0x646   :  { %v6944_v21 = vadd.f32 %v10110_v2, %v6895_v9 }
 0x647   :  { %v6898_v41 = vpop.xlane.xlu1 %6897 }
 0x648   :  { %6977 = vst.msk [vmem:[%s10281_s9 + $0xd0] sm:$0xff] %vm6950_vm0, %v6944_v21  ;;  %v6945_v44 = vadd.f32 %v10110_v2, %v6898_v41 }
 0x64a   :  { %6978 = vst.msk [vmem:[%s10281_s9 + $0xd8] sm:$0xff] %vm6950_vm0, %v6945_v44 }
 0x64d   :  { %v6901_v49 = vpop.xlane.xlu0 %6900 }
 0x64e   :  { %v6946_v59 = vadd.f32 %v10110_v2, %v6901_v49 }
 0x64f   :  { %v6904_v22 = vpop.xlane.xlu1 %6903 }
 0x650   :  { %6979 = vst.msk [vmem:[%s10281_s9 + $0xe0] sm:$0xff] %vm6950_vm0, %v6946_v59  ;;  %v6947_v46 = vadd.f32 %v10110_v2, %v6904_v22 }
 0x652   :  { %6980 = vst.msk [vmem:[%s10281_s9 + $0xe8] sm:$0xff] %vm6950_vm0, %v6947_v46 }
 0x655   :  { %v6907_v48 = vpop.xlane.xlu0 %6906 }
 0x656   :  { %v6948_v39 = vadd.f32 %v10110_v2, %v6907_v48 }
 0x657   :  { %v6910_v5 = vpop.xlane.xlu1 %6909 }
 0x658   :  { %6981 = vst.msk [vmem:[%s10281_s9 + $0xf0] sm:$0xff] %vm6950_vm0, %v6948_v39  ;;  %v6949_v32 = vadd.f32 %v10110_v2, %v6910_v5 }
 0x65a   :  { %6982 = vst.msk [vmem:[%s10281_s9 + $0xf8] sm:$0xff] %vm6950_vm0, %v6949_v32 }
 0x65b   :  { %6987 = vsyncpa [#allocation4], 1 }
 0x65c   :  { %6988 = vsyncpa [#allocation6], 1 }
 0x65d   :  { %6989 = vsyncpa [#allocation9], 1 }

</bundles_post_ra>
